<compile_context>
chip_gen: v6e
topology: v6e:2x2x1
jax: 0.10.0
libtpu: 0.0.40
codegen_flags: <defaults>
</compile_context>

<pallas_src>
import functools

import jax
import jax.numpy as jnp
from jax import lax
from jax.experimental import pallas as pl
from jax.experimental.pallas import tpu as pltpu

BN_EPS = 1e-3


def _round_up(v, m):
    return ((v + m - 1) // m) * m


def _silu(v, approx):
    # v * sigmoid(v); the reciprocal runs on the EUP (approx=True on the bf16 path).
    return v * pl.reciprocal(1.0 + jnp.exp(-v), approx=approx)


# ---------------------------------------------------------------------------
# Fused kernel: conv3x3+BN+SiLU -> conv3x3+BN+SiLU -> conv1x1+bias (one image)
# ---------------------------------------------------------------------------
def _segmentation_kernel(H, W, approx,
                         x_ref, w1_ref, b1_ref, w2_ref, b2_ref, w3_ref, b3_ref,
                         o_ref, y1p_ref):
    # x_ref  : (1, H+2, W+2, Cin) spatially pre-padded input image (compute dtype)
    # w1_ref : (9, Cin, Cn) folded conv1 weights   b1_ref: (1, Cn) folded BN1 bias
    # w2_ref : (9, Cn, Cn)  folded conv2 weights   b2_ref: (1, Cn) folded BN2 bias
    # w3_ref : (Cn, Np)     1x1 conv weights (Np = num_maskes padded to 128)
    # b3_ref : (1, Np)      1x1 conv bias (zero padded)
    # o_ref  : (1, H, W, Np) f32 output, lane-dense last dim
    # y1p_ref: (H+2, W+2, Cn) f32 VMEM scratch: first activation with zero halo
    Cin = x_ref.shape[-1]
    Cn = w1_ref.shape[-1]
    Np = w3_ref.shape[-1]
    M = H * W
    cdt = w1_ref.dtype

    # --- conv1 (3x3, s1, p1): 9 shifted MXU dots, folded BN bias, SiLU ---
    acc = jnp.zeros((M, Cn), jnp.float32)
    for kh in range(3):
        for kw in range(3):
            slab = x_ref[0, kh:kh + H, kw:kw + W, :].reshape(M, Cin)
            acc = acc + jnp.dot(slab, w1_ref[kh * 3 + kw],
                                preferred_element_type=jnp.float32)
    y1 = _silu(acc + b1_ref[...], approx)

    # Stage y1 with a zero halo in VMEM (intermediate never touches HBM).
    y1p_ref[...] = jnp.zeros_like(y1p_ref)
    y1p_ref[1:H + 1, 1:W + 1, :] = y1.reshape(H, W, Cn)

    # --- conv2 (3x3, s1, p1): 9 shifted MXU dots, folded BN bias, SiLU ---
    acc2 = jnp.zeros((M, Cn), jnp.float32)
    for kh in range(3):
        for kw in range(3):
            slab = y1p_ref[kh:kh + H, kw:kw + W, :].reshape(M, Cn).astype(cdt)
            acc2 = acc2 + jnp.dot(slab, w2_ref[kh * 3 + kw],
                                  preferred_element_type=jnp.float32)
    y2 = _silu(acc2 + b2_ref[...], approx)

    # --- 1x1 conv + bias (no BN / activation) ---
    out = jnp.dot(y2.astype(cdt), w3_ref[...],
                  preferred_element_type=jnp.float32) + b3_ref[...]
    o_ref[0] = out.reshape(H, W, Np).astype(o_ref.dtype)


# ---------------------------------------------------------------------------
# Wrapper: NCHW in -> NCHW out (PyTorch-compatible interface)
# ---------------------------------------------------------------------------
def segmentation_forward(x_nchw, params, *, compute_dtype=jnp.bfloat16):
    w1 = params["w1"]          # (3, 3, Cin, Cn)  HWIO
    w2 = params["w2"]          # (3, 3, Cn, Cn)   HWIO
    w3 = params["w3"]          # (Cn, Nm)         1x1 conv
    b3 = params["b3"]          # (Nm,)

    x = jnp.transpose(x_nchw, (0, 2, 3, 1)).astype(jnp.float32)      # NHWC
    B, H, W, Cin = x.shape
    Cn = w1.shape[-1]
    Nm = w3.shape[-1]
    Np = _round_up(Nm, 128)    # lane-dense output stores

    # --- fold BN (inference mode) into conv weights / biases ---
    s1 = params["gamma1"] / jnp.sqrt(params["var1"] + BN_EPS)
    s2 = params["gamma2"] / jnp.sqrt(params["var2"] + BN_EPS)
    b1 = (params["beta1"] - params["mean1"] * s1).astype(jnp.float32).reshape(1, Cn)
    b2 = (params["beta2"] - params["mean2"] * s2).astype(jnp.float32).reshape(1, Cn)
    w1f = (w1 * s1).reshape(9, Cin, Cn).astype(compute_dtype)
    w2f = (w2 * s2).reshape(9, Cn, Cn).astype(compute_dtype)
    w3p = jnp.pad(w3, ((0, 0), (0, Np - Nm))).astype(compute_dtype)
    b3p = jnp.pad(b3, (0, Np - Nm)).astype(jnp.float32).reshape(1, Np)

    # Spatial pad for the first 3x3 conv; the second conv's halo is built in VMEM.
    xp = jnp.pad(x, ((0, 0), (1, 1), (1, 1), (0, 0))).astype(compute_dtype)
    Hp, Wp = H + 2, W + 2

    # VMEM budget: double-buffered in/out/weight blocks + scratch, with headroom.
    csz = jnp.dtype(compute_dtype).itemsize
    est = (2 * Hp * Wp * Cin * csz
           + 2 * (9 * Cin * Cn + 9 * Cn * Cn + Cn * Np) * csz
           + 2 * (2 * Cn + Np) * 4
           + 2 * H * W * Np * 4
           + Hp * Wp * Cn * 4)
    vmem_limit = int(min(max(4 * est, 16 * 1024 * 1024), 64 * 1024 * 1024))

    approx = bool(jnp.dtype(compute_dtype) == jnp.dtype(jnp.bfloat16))
    kernel = functools.partial(_segmentation_kernel, H, W, approx)

    out = pl.pallas_call(
        kernel,
        out_shape=jax.ShapeDtypeStruct((B, H, W, Np), jnp.float32),
        grid=(B,),
        in_specs=[
            pl.BlockSpec((1, Hp, Wp, Cin), lambda b: (b, 0, 0, 0)),
            pl.BlockSpec((9, Cin, Cn), lambda b: (0, 0, 0)),
            pl.BlockSpec((1, Cn), lambda b: (0, 0)),
            pl.BlockSpec((9, Cn, Cn), lambda b: (0, 0, 0)),
            pl.BlockSpec((1, Cn), lambda b: (0, 0)),
            pl.BlockSpec((Cn, Np), lambda b: (0, 0)),
            pl.BlockSpec((1, Np), lambda b: (0, 0)),
        ],
        out_specs=pl.BlockSpec((1, H, W, Np), lambda b: (b, 0, 0, 0)),
        scratch_shapes=[pltpu.VMEM((Hp, Wp, Cn), jnp.float32)],
        compiler_params=pltpu.CompilerParams(
            dimension_semantics=("parallel",),
            vmem_limit_bytes=vmem_limit),
    )(xp, w1f, b1, w2f, b2, w3p, b3p)

    out = out[..., :Nm]                                    # drop lane padding
    return jnp.transpose(out, (0, 3, 1, 2))                # NCHW


# ---------------------------------------------------------------------------
# Pure-JAX reference (for correctness check)
# ---------------------------------------------------------------------------
def _conv_bn_silu_ref(h, w_hwio, gamma, beta, mean, var):
    y = lax.conv_general_dilated(
        h, w_hwio, window_strides=(1, 1), padding=((1, 1), (1, 1)),
        dimension_numbers=("NHWC", "HWIO", "NHWC"))
    s = gamma / jnp.sqrt(var + BN_EPS)
    y = y * s + (beta - mean * s)
    return y * jax.nn.sigmoid(y)


def segmentation_reference(x_nchw, params):
    x = jnp.transpose(x_nchw, (0, 2, 3, 1)).astype(jnp.float32)
    h = _conv_bn_silu_ref(x, params["w1"], params["gamma1"], params["beta1"],
                          params["mean1"], params["var1"])
    h = _conv_bn_silu_ref(h, params["w2"], params["gamma2"], params["beta2"],
                          params["mean2"], params["var2"])
    Cn, Nm = params["w3"].shape
    y = lax.conv_general_dilated(
        h, params["w3"].reshape(1, 1, Cn, Nm), window_strides=(1, 1),
        padding=((0, 0), (0, 0)), dimension_numbers=("NHWC", "HWIO", "NHWC"))
    y = y + params["b3"]
    return jnp.transpose(y, (0, 3, 1, 2))


if __name__ == "__main__":
    # Segmentation(in_channels=(32, 4), num_maskes=8) -> mask_neck = max(32//4, 8) = 8
    B, Cin, H, W = 2, 4, 16, 16
    first_neck, num_maskes = 32, 8
    mask_neck = max(first_neck // 4, num_maskes)

    key = jax.random.PRNGKey(0)
    ks = jax.random.split(key, 13)

    x = jax.random.normal(ks[0], (B, Cin, H, W), dtype=jnp.float32)
    params = {
        "w1": jax.random.normal(ks[1], (3, 3, Cin, mask_neck), jnp.float32) * 0.1,
        "gamma1": jax.random.uniform(ks[2], (mask_neck,), jnp.float32, 0.5, 1.5),
        "beta1": jax.random.normal(ks[3], (mask_neck,), jnp.float32) * 0.1,
        "mean1": jax.random.normal(ks[4], (mask_neck,), jnp.float32) * 0.1,
        "var1": jax.random.uniform(ks[5], (mask_neck,), jnp.float32, 0.5, 1.5),
        "w2": jax.random.normal(ks[6], (3, 3, mask_neck, mask_neck), jnp.float32) * 0.1,
        "gamma2": jax.random.uniform(ks[7], (mask_neck,), jnp.float32, 0.5, 1.5),
        "beta2": jax.random.normal(ks[8], (mask_neck,), jnp.float32) * 0.1,
        "mean2": jax.random.normal(ks[9], (mask_neck,), jnp.float32) * 0.1,
        "var2": jax.random.uniform(ks[10], (mask_neck,), jnp.float32, 0.5, 1.5),
        "w3": jax.random.normal(ks[11], (mask_neck, num_maskes), jnp.float32) * 0.1,
        "b3": jax.random.normal(ks[12], (num_maskes,), jnp.float32) * 0.1,
    }

    ref = jax.block_until_ready(segmentation_reference(x, params))

    # f32-fed MXU path (tighter numerical check)
    out_f32 = jax.block_until_ready(
        segmentation_forward(x, params, compute_dtype=jnp.float32))
    assert out_f32.shape == (B, num_maskes, H, W), out_f32.shape
    assert jnp.allclose(out_f32, ref, atol=2e-2, rtol=2e-2), float(
        jnp.max(jnp.abs(out_f32 - ref)))

    # bf16-fed MXU path (recommended perf configuration on v6e/v7x)
    out_bf16 = jax.block_until_ready(
        segmentation_forward(x, params, compute_dtype=jnp.bfloat16))
    assert out_bf16.shape == (B, num_maskes, H, W), out_bf16.shape
    assert jnp.allclose(out_bf16, ref, atol=6e-2, rtol=6e-2), float(
        jnp.max(jnp.abs(out_bf16 - ref)))

    print("KERNEL_OK")
</pallas_src>

<mosaic_0001>
module attributes {stable_mosaic.version = 11 : i64} {
  func.func @_segmentation_kernel(%arg0: i32, %arg1: memref<1x18x18x4xf32, #tpu.memory_space<vmem>>, %arg2: memref<9x4x8xf32, #tpu.memory_space<vmem>>, %arg3: memref<1x8xf32, #tpu.memory_space<vmem>>, %arg4: memref<9x8x8xf32, #tpu.memory_space<vmem>>, %arg5: memref<1x8xf32, #tpu.memory_space<vmem>>, %arg6: memref<8x128xf32, #tpu.memory_space<vmem>>, %arg7: memref<1x128xf32, #tpu.memory_space<vmem>>, %arg8: memref<1x16x16x128xf32, #tpu.memory_space<vmem>>, %arg9: memref<18x18x8xf32, #tpu.memory_space<vmem>>) attributes {dimension_semantics = [#tpu.dimension_semantics<parallel>], iteration_bounds = array<i64: 2>, scalar_prefetch = 0 : i64, scratch_operands = 1 : i64, tpu.core_type = #tpu.core_type<tc>, window_params = [{transform_indices = @transform_0, window_bounds = array<i64: 1, 18, 18, 4>}, {pipeline_mode = #tpu.pipeline_mode<synchronous>, transform_indices = @transform_1, window_bounds = array<i64: 9, 4, 8>}, {pipeline_mode = #tpu.pipeline_mode<synchronous>, transform_indices = @transform_2, window_bounds = array<i64: 1, 8>}, {pipeline_mode = #tpu.pipeline_mode<synchronous>, transform_indices = @transform_3, window_bounds = array<i64: 9, 8, 8>}, {pipeline_mode = #tpu.pipeline_mode<synchronous>, transform_indices = @transform_4, window_bounds = array<i64: 1, 8>}, {pipeline_mode = #tpu.pipeline_mode<synchronous>, transform_indices = @transform_5, window_bounds = array<i64: 8, 128>}, {pipeline_mode = #tpu.pipeline_mode<synchronous>, transform_indices = @transform_6, window_bounds = array<i64: 1, 128>}, {transform_indices = @transform_7, window_bounds = array<i64: 1, 16, 16, 128>}]} {
    %cst = arith.constant 0.000000e+00 : f32
    %0 = vector.broadcast %cst : f32 to vector<256x8xf32>
    %c0 = arith.constant 0 : index
    %c0_0 = arith.constant 0 : index
    %c0_1 = arith.constant 0 : index
    %c0_2 = arith.constant 0 : index
    %1 = vector.load %arg1[%c0, %c0_0, %c0_1, %c0_2] : memref<1x18x18x4xf32, #tpu.memory_space<vmem>>, vector<1x16x16x4xf32>
    %2 = vector.shape_cast %1 : vector<1x16x16x4xf32> to vector<16x16x4xf32>
    %3 = vector.shape_cast %2 : vector<16x16x4xf32> to vector<256x4xf32>
    %c0_3 = arith.constant 0 : index
    %c0_4 = arith.constant 0 : index
    %c0_5 = arith.constant 0 : index
    %4 = vector.load %arg2[%c0_3, %c0_4, %c0_5] : memref<9x4x8xf32, #tpu.memory_space<vmem>>, vector<1x4x8xf32>
    %5 = vector.shape_cast %4 : vector<1x4x8xf32> to vector<4x8xf32>
    %cst_6 = arith.constant dense<0.000000e+00> : vector<256x8xf32>
    %6 = tpu.matmul %3, %5, %cst_6 {dimension_numbers = #tpu.dot_dimension_numbers<[1], [0], [0], [1], [0, 0, 1, 1], [], []>} : vector<256x4xf32>, vector<4x8xf32>, vector<256x8xf32> -> vector<256x8xf32>
    %7 = arith.addf %0, %6 : vector<256x8xf32>
    %c0_7 = arith.constant 0 : index
    %c0_8 = arith.constant 0 : index
    %c1 = arith.constant 1 : index
    %c0_9 = arith.constant 0 : index
    %8 = vector.load %arg1[%c0_7, %c0_8, %c1, %c0_9] : memref<1x18x18x4xf32, #tpu.memory_space<vmem>>, vector<1x16x16x4xf32>
    %9 = vector.shape_cast %8 : vector<1x16x16x4xf32> to vector<16x16x4xf32>
    %10 = vector.shape_cast %9 : vector<16x16x4xf32> to vector<256x4xf32>
    %c1_10 = arith.constant 1 : index
    %c0_11 = arith.constant 0 : index
    %c0_12 = arith.constant 0 : index
    %11 = vector.load %arg2[%c1_10, %c0_11, %c0_12] : memref<9x4x8xf32, #tpu.memory_space<vmem>>, vector<1x4x8xf32>
    %12 = vector.shape_cast %11 : vector<1x4x8xf32> to vector<4x8xf32>
    %cst_13 = arith.constant dense<0.000000e+00> : vector<256x8xf32>
    %13 = tpu.matmul %10, %12, %cst_13 {dimension_numbers = #tpu.dot_dimension_numbers<[1], [0], [0], [1], [0, 0, 1, 1], [], []>} : vector<256x4xf32>, vector<4x8xf32>, vector<256x8xf32> -> vector<256x8xf32>
    %14 = arith.addf %7, %13 : vector<256x8xf32>
    %c0_14 = arith.constant 0 : index
    %c0_15 = arith.constant 0 : index
    %c2 = arith.constant 2 : index
    %c0_16 = arith.constant 0 : index
    %15 = vector.load %arg1[%c0_14, %c0_15, %c2, %c0_16] : memref<1x18x18x4xf32, #tpu.memory_space<vmem>>, vector<1x16x16x4xf32>
    %16 = vector.shape_cast %15 : vector<1x16x16x4xf32> to vector<16x16x4xf32>
    %17 = vector.shape_cast %16 : vector<16x16x4xf32> to vector<256x4xf32>
    %c2_17 = arith.constant 2 : index
    %c0_18 = arith.constant 0 : index
    %c0_19 = arith.constant 0 : index
    %18 = vector.load %arg2[%c2_17, %c0_18, %c0_19] : memref<9x4x8xf32, #tpu.memory_space<vmem>>, vector<1x4x8xf32>
    %19 = vector.shape_cast %18 : vector<1x4x8xf32> to vector<4x8xf32>
    %cst_20 = arith.constant dense<0.000000e+00> : vector<256x8xf32>
    %20 = tpu.matmul %17, %19, %cst_20 {dimension_numbers = #tpu.dot_dimension_numbers<[1], [0], [0], [1], [0, 0, 1, 1], [], []>} : vector<256x4xf32>, vector<4x8xf32>, vector<256x8xf32> -> vector<256x8xf32>
    %21 = arith.addf %14, %20 : vector<256x8xf32>
    %c0_21 = arith.constant 0 : index
    %c1_22 = arith.constant 1 : index
    %c0_23 = arith.constant 0 : index
    %c0_24 = arith.constant 0 : index
    %22 = vector.load %arg1[%c0_21, %c1_22, %c0_23, %c0_24] : memref<1x18x18x4xf32, #tpu.memory_space<vmem>>, vector<1x16x16x4xf32>
    %23 = vector.shape_cast %22 : vector<1x16x16x4xf32> to vector<16x16x4xf32>
    %24 = vector.shape_cast %23 : vector<16x16x4xf32> to vector<256x4xf32>
    %c3 = arith.constant 3 : index
    %c0_25 = arith.constant 0 : index
    %c0_26 = arith.constant 0 : index
    %25 = vector.load %arg2[%c3, %c0_25, %c0_26] : memref<9x4x8xf32, #tpu.memory_space<vmem>>, vector<1x4x8xf32>
    %26 = vector.shape_cast %25 : vector<1x4x8xf32> to vector<4x8xf32>
    %cst_27 = arith.constant dense<0.000000e+00> : vector<256x8xf32>
    %27 = tpu.matmul %24, %26, %cst_27 {dimension_numbers = #tpu.dot_dimension_numbers<[1], [0], [0], [1], [0, 0, 1, 1], [], []>} : vector<256x4xf32>, vector<4x8xf32>, vector<256x8xf32> -> vector<256x8xf32>
    %28 = arith.addf %21, %27 : vector<256x8xf32>
    %c0_28 = arith.constant 0 : index
    %c1_29 = arith.constant 1 : index
    %c1_30 = arith.constant 1 : index
    %c0_31 = arith.constant 0 : index
    %29 = vector.load %arg1[%c0_28, %c1_29, %c1_30, %c0_31] : memref<1x18x18x4xf32, #tpu.memory_space<vmem>>, vector<1x16x16x4xf32>
    %30 = vector.shape_cast %29 : vector<1x16x16x4xf32> to vector<16x16x4xf32>
    %31 = vector.shape_cast %30 : vector<16x16x4xf32> to vector<256x4xf32>
    %c4 = arith.constant 4 : index
    %c0_32 = arith.constant 0 : index
    %c0_33 = arith.constant 0 : index
    %32 = vector.load %arg2[%c4, %c0_32, %c0_33] : memref<9x4x8xf32, #tpu.memory_space<vmem>>, vector<1x4x8xf32>
    %33 = vector.shape_cast %32 : vector<1x4x8xf32> to vector<4x8xf32>
    %cst_34 = arith.constant dense<0.000000e+00> : vector<256x8xf32>
    %34 = tpu.matmul %31, %33, %cst_34 {dimension_numbers = #tpu.dot_dimension_numbers<[1], [0], [0], [1], [0, 0, 1, 1], [], []>} : vector<256x4xf32>, vector<4x8xf32>, vector<256x8xf32> -> vector<256x8xf32>
    %35 = arith.addf %28, %34 : vector<256x8xf32>
    %c0_35 = arith.constant 0 : index
    %c1_36 = arith.constant 1 : index
    %c2_37 = arith.constant 2 : index
    %c0_38 = arith.constant 0 : index
    %36 = vector.load %arg1[%c0_35, %c1_36, %c2_37, %c0_38] : memref<1x18x18x4xf32, #tpu.memory_space<vmem>>, vector<1x16x16x4xf32>
    %37 = vector.shape_cast %36 : vector<1x16x16x4xf32> to vector<16x16x4xf32>
    %38 = vector.shape_cast %37 : vector<16x16x4xf32> to vector<256x4xf32>
    %c5 = arith.constant 5 : index
    %c0_39 = arith.constant 0 : index
    %c0_40 = arith.constant 0 : index
    %39 = vector.load %arg2[%c5, %c0_39, %c0_40] : memref<9x4x8xf32, #tpu.memory_space<vmem>>, vector<1x4x8xf32>
    %40 = vector.shape_cast %39 : vector<1x4x8xf32> to vector<4x8xf32>
    %cst_41 = arith.constant dense<0.000000e+00> : vector<256x8xf32>
    %41 = tpu.matmul %38, %40, %cst_41 {dimension_numbers = #tpu.dot_dimension_numbers<[1], [0], [0], [1], [0, 0, 1, 1], [], []>} : vector<256x4xf32>, vector<4x8xf32>, vector<256x8xf32> -> vector<256x8xf32>
    %42 = arith.addf %35, %41 : vector<256x8xf32>
    %c0_42 = arith.constant 0 : index
    %c2_43 = arith.constant 2 : index
    %c0_44 = arith.constant 0 : index
    %c0_45 = arith.constant 0 : index
    %43 = vector.load %arg1[%c0_42, %c2_43, %c0_44, %c0_45] : memref<1x18x18x4xf32, #tpu.memory_space<vmem>>, vector<1x16x16x4xf32>
    %44 = vector.shape_cast %43 : vector<1x16x16x4xf32> to vector<16x16x4xf32>
    %45 = vector.shape_cast %44 : vector<16x16x4xf32> to vector<256x4xf32>
    %c6 = arith.constant 6 : index
    %c0_46 = arith.constant 0 : index
    %c0_47 = arith.constant 0 : index
    %46 = vector.load %arg2[%c6, %c0_46, %c0_47] : memref<9x4x8xf32, #tpu.memory_space<vmem>>, vector<1x4x8xf32>
    %47 = vector.shape_cast %46 : vector<1x4x8xf32> to vector<4x8xf32>
    %cst_48 = arith.constant dense<0.000000e+00> : vector<256x8xf32>
    %48 = tpu.matmul %45, %47, %cst_48 {dimension_numbers = #tpu.dot_dimension_numbers<[1], [0], [0], [1], [0, 0, 1, 1], [], []>} : vector<256x4xf32>, vector<4x8xf32>, vector<256x8xf32> -> vector<256x8xf32>
    %49 = arith.addf %42, %48 : vector<256x8xf32>
    %c0_49 = arith.constant 0 : index
    %c2_50 = arith.constant 2 : index
    %c1_51 = arith.constant 1 : index
    %c0_52 = arith.constant 0 : index
    %50 = vector.load %arg1[%c0_49, %c2_50, %c1_51, %c0_52] : memref<1x18x18x4xf32, #tpu.memory_space<vmem>>, vector<1x16x16x4xf32>
    %51 = vector.shape_cast %50 : vector<1x16x16x4xf32> to vector<16x16x4xf32>
    %52 = vector.shape_cast %51 : vector<16x16x4xf32> to vector<256x4xf32>
    %c7 = arith.constant 7 : index
    %c0_53 = arith.constant 0 : index
    %c0_54 = arith.constant 0 : index
    %53 = vector.load %arg2[%c7, %c0_53, %c0_54] : memref<9x4x8xf32, #tpu.memory_space<vmem>>, vector<1x4x8xf32>
    %54 = vector.shape_cast %53 : vector<1x4x8xf32> to vector<4x8xf32>
    %cst_55 = arith.constant dense<0.000000e+00> : vector<256x8xf32>
    %55 = tpu.matmul %52, %54, %cst_55 {dimension_numbers = #tpu.dot_dimension_numbers<[1], [0], [0], [1], [0, 0, 1, 1], [], []>} : vector<256x4xf32>, vector<4x8xf32>, vector<256x8xf32> -> vector<256x8xf32>
    %56 = arith.addf %49, %55 : vector<256x8xf32>
    %c0_56 = arith.constant 0 : index
    %c2_57 = arith.constant 2 : index
    %c2_58 = arith.constant 2 : index
    %c0_59 = arith.constant 0 : index
    %57 = vector.load %arg1[%c0_56, %c2_57, %c2_58, %c0_59] : memref<1x18x18x4xf32, #tpu.memory_space<vmem>>, vector<1x16x16x4xf32>
    %58 = vector.shape_cast %57 : vector<1x16x16x4xf32> to vector<16x16x4xf32>
    %59 = vector.shape_cast %58 : vector<16x16x4xf32> to vector<256x4xf32>
    %c8 = arith.constant 8 : index
    %c0_60 = arith.constant 0 : index
    %c0_61 = arith.constant 0 : index
    %60 = vector.load %arg2[%c8, %c0_60, %c0_61] : memref<9x4x8xf32, #tpu.memory_space<vmem>>, vector<1x4x8xf32>
    %61 = vector.shape_cast %60 : vector<1x4x8xf32> to vector<4x8xf32>
    %cst_62 = arith.constant dense<0.000000e+00> : vector<256x8xf32>
    %62 = tpu.matmul %59, %61, %cst_62 {dimension_numbers = #tpu.dot_dimension_numbers<[1], [0], [0], [1], [0, 0, 1, 1], [], []>} : vector<256x4xf32>, vector<4x8xf32>, vector<256x8xf32> -> vector<256x8xf32>
    %63 = arith.addf %56, %62 : vector<256x8xf32>
    %c0_63 = arith.constant 0 : index
    %c0_64 = arith.constant 0 : index
    %64 = vector.load %arg3[%c0_63, %c0_64] : memref<1x8xf32, #tpu.memory_space<vmem>>, vector<1x8xf32>
    %65 = vector.broadcast %64 : vector<1x8xf32> to vector<256x8xf32>
    %66 = arith.addf %63, %65 : vector<256x8xf32>
    %cst_65 = arith.constant 0.000000e+00 : f32
    %67 = vector.broadcast %cst_65 : f32 to vector<256x8xf32>
    %68 = arith.subf %67, %66 : vector<256x8xf32>
    %69 = math.exp %68 : vector<256x8xf32>
    %cst_66 = arith.constant 1.000000e+00 : f32
    %70 = vector.broadcast %cst_66 : f32 to vector<256x8xf32>
    %71 = arith.addf %70, %69 : vector<256x8xf32>
    %72 = tpu.reciprocal %71 : vector<256x8xf32> -> vector<256x8xf32>
    %73 = arith.mulf %66, %72 : vector<256x8xf32>
    %cst_67 = arith.constant 0.000000e+00 : f32
    %74 = vector.broadcast %cst_67 : f32 to vector<18x18x8xf32>
    %c0_68 = arith.constant 0 : index
    %c0_69 = arith.constant 0 : index
    %c0_70 = arith.constant 0 : index
    %75 = vector.load %arg9[%c0_68, %c0_69, %c0_70] : memref<18x18x8xf32, #tpu.memory_space<vmem>>, vector<18x18x8xf32>
    tpu.vector_store %arg9[%c0_68, %c0_69, %c0_70], %74 {strides = array<i32>} : memref<18x18x8xf32, #tpu.memory_space<vmem>>, vector<18x18x8xf32>,
    %76 = vector.shape_cast %73 : vector<256x8xf32> to vector<16x16x8xf32>
    %c1_71 = arith.constant 1 : index
    %c1_72 = arith.constant 1 : index
    %c0_73 = arith.constant 0 : index
    %77 = vector.load %arg9[%c1_71, %c1_72, %c0_73] : memref<18x18x8xf32, #tpu.memory_space<vmem>>, vector<16x16x8xf32>
    tpu.vector_store %arg9[%c1_71, %c1_72, %c0_73], %76 {strides = array<i32>} : memref<18x18x8xf32, #tpu.memory_space<vmem>>, vector<16x16x8xf32>,
    %cst_74 = arith.constant 0.000000e+00 : f32
    %78 = vector.broadcast %cst_74 : f32 to vector<256x8xf32>
    %c0_75 = arith.constant 0 : index
    %c0_76 = arith.constant 0 : index
    %c0_77 = arith.constant 0 : index
    %79 = vector.load %arg9[%c0_75, %c0_76, %c0_77] : memref<18x18x8xf32, #tpu.memory_space<vmem>>, vector<16x16x8xf32>
    %80 = vector.shape_cast %79 : vector<16x16x8xf32> to vector<256x8xf32>
    %c0_78 = arith.constant 0 : index
    %c0_79 = arith.constant 0 : index
    %c0_80 = arith.constant 0 : index
    %81 = vector.load %arg4[%c0_78, %c0_79, %c0_80] : memref<9x8x8xf32, #tpu.memory_space<vmem>>, vector<1x8x8xf32>
    %82 = vector.shape_cast %81 : vector<1x8x8xf32> to vector<8x8xf32>
    %cst_81 = arith.constant dense<0.000000e+00> : vector<256x8xf32>
    %83 = tpu.matmul %80, %82, %cst_81 {dimension_numbers = #tpu.dot_dimension_numbers<[1], [0], [0], [1], [0, 0, 1, 1], [], []>} : vector<256x8xf32>, vector<8x8xf32>, vector<256x8xf32> -> vector<256x8xf32>
    %84 = arith.addf %78, %83 : vector<256x8xf32>
    %c0_82 = arith.constant 0 : index
    %c1_83 = arith.constant 1 : index
    %c0_84 = arith.constant 0 : index
    %85 = vector.load %arg9[%c0_82, %c1_83, %c0_84] : memref<18x18x8xf32, #tpu.memory_space<vmem>>, vector<16x16x8xf32>
    %86 = vector.shape_cast %85 : vector<16x16x8xf32> to vector<256x8xf32>
    %c1_85 = arith.constant 1 : index
    %c0_86 = arith.constant 0 : index
    %c0_87 = arith.constant 0 : index
    %87 = vector.load %arg4[%c1_85, %c0_86, %c0_87] : memref<9x8x8xf32, #tpu.memory_space<vmem>>, vector<1x8x8xf32>
    %88 = vector.shape_cast %87 : vector<1x8x8xf32> to vector<8x8xf32>
    %cst_88 = arith.constant dense<0.000000e+00> : vector<256x8xf32>
    %89 = tpu.matmul %86, %88, %cst_88 {dimension_numbers = #tpu.dot_dimension_numbers<[1], [0], [0], [1], [0, 0, 1, 1], [], []>} : vector<256x8xf32>, vector<8x8xf32>, vector<256x8xf32> -> vector<256x8xf32>
    %90 = arith.addf %84, %89 : vector<256x8xf32>
    %c0_89 = arith.constant 0 : index
    %c2_90 = arith.constant 2 : index
    %c0_91 = arith.constant 0 : index
    %91 = vector.load %arg9[%c0_89, %c2_90, %c0_91] : memref<18x18x8xf32, #tpu.memory_space<vmem>>, vector<16x16x8xf32>
    %92 = vector.shape_cast %91 : vector<16x16x8xf32> to vector<256x8xf32>
    %c2_92 = arith.constant 2 : index
    %c0_93 = arith.constant 0 : index
    %c0_94 = arith.constant 0 : index
    %93 = vector.load %arg4[%c2_92, %c0_93, %c0_94] : memref<9x8x8xf32, #tpu.memory_space<vmem>>, vector<1x8x8xf32>
    %94 = vector.shape_cast %93 : vector<1x8x8xf32> to vector<8x8xf32>
    %cst_95 = arith.constant dense<0.000000e+00> : vector<256x8xf32>
    %95 = tpu.matmul %92, %94, %cst_95 {dimension_numbers = #tpu.dot_dimension_numbers<[1], [0], [0], [1], [0, 0, 1, 1], [], []>} : vector<256x8xf32>, vector<8x8xf32>, vector<256x8xf32> -> vector<256x8xf32>
    %96 = arith.addf %90, %95 : vector<256x8xf32>
    %c1_96 = arith.constant 1 : index
    %c0_97 = arith.constant 0 : index
    %c0_98 = arith.constant 0 : index
    %97 = vector.load %arg9[%c1_96, %c0_97, %c0_98] : memref<18x18x8xf32, #tpu.memory_space<vmem>>, vector<16x16x8xf32>
    %98 = vector.shape_cast %97 : vector<16x16x8xf32> to vector<256x8xf32>
    %c3_99 = arith.constant 3 : index
    %c0_100 = arith.constant 0 : index
    %c0_101 = arith.constant 0 : index
    %99 = vector.load %arg4[%c3_99, %c0_100, %c0_101] : memref<9x8x8xf32, #tpu.memory_space<vmem>>, vector<1x8x8xf32>
    %100 = vector.shape_cast %99 : vector<1x8x8xf32> to vector<8x8xf32>
    %cst_102 = arith.constant dense<0.000000e+00> : vector<256x8xf32>
    %101 = tpu.matmul %98, %100, %cst_102 {dimension_numbers = #tpu.dot_dimension_numbers<[1], [0], [0], [1], [0, 0, 1, 1], [], []>} : vector<256x8xf32>, vector<8x8xf32>, vector<256x8xf32> -> vector<256x8xf32>
    %102 = arith.addf %96, %101 : vector<256x8xf32>
    %c1_103 = arith.constant 1 : index
    %c1_104 = arith.constant 1 : index
    %c0_105 = arith.constant 0 : index
    %103 = vector.load %arg9[%c1_103, %c1_104, %c0_105] : memref<18x18x8xf32, #tpu.memory_space<vmem>>, vector<16x16x8xf32>
    %104 = vector.shape_cast %103 : vector<16x16x8xf32> to vector<256x8xf32>
    %c4_106 = arith.constant 4 : index
    %c0_107 = arith.constant 0 : index
    %c0_108 = arith.constant 0 : index
    %105 = vector.load %arg4[%c4_106, %c0_107, %c0_108] : memref<9x8x8xf32, #tpu.memory_space<vmem>>, vector<1x8x8xf32>
    %106 = vector.shape_cast %105 : vector<1x8x8xf32> to vector<8x8xf32>
    %cst_109 = arith.constant dense<0.000000e+00> : vector<256x8xf32>
    %107 = tpu.matmul %104, %106, %cst_109 {dimension_numbers = #tpu.dot_dimension_numbers<[1], [0], [0], [1], [0, 0, 1, 1], [], []>} : vector<256x8xf32>, vector<8x8xf32>, vector<256x8xf32> -> vector<256x8xf32>
    %108 = arith.addf %102, %107 : vector<256x8xf32>
    %c1_110 = arith.constant 1 : index
    %c2_111 = arith.constant 2 : index
    %c0_112 = arith.constant 0 : index
    %109 = vector.load %arg9[%c1_110, %c2_111, %c0_112] : memref<18x18x8xf32, #tpu.memory_space<vmem>>, vector<16x16x8xf32>
    %110 = vector.shape_cast %109 : vector<16x16x8xf32> to vector<256x8xf32>
    %c5_113 = arith.constant 5 : index
    %c0_114 = arith.constant 0 : index
    %c0_115 = arith.constant 0 : index
    %111 = vector.load %arg4[%c5_113, %c0_114, %c0_115] : memref<9x8x8xf32, #tpu.memory_space<vmem>>, vector<1x8x8xf32>
    %112 = vector.shape_cast %111 : vector<1x8x8xf32> to vector<8x8xf32>
    %cst_116 = arith.constant dense<0.000000e+00> : vector<256x8xf32>
    %113 = tpu.matmul %110, %112, %cst_116 {dimension_numbers = #tpu.dot_dimension_numbers<[1], [0], [0], [1], [0, 0, 1, 1], [], []>} : vector<256x8xf32>, vector<8x8xf32>, vector<256x8xf32> -> vector<256x8xf32>
    %114 = arith.addf %108, %113 : vector<256x8xf32>
    %c2_117 = arith.constant 2 : index
    %c0_118 = arith.constant 0 : index
    %c0_119 = arith.constant 0 : index
    %115 = vector.load %arg9[%c2_117, %c0_118, %c0_119] : memref<18x18x8xf32, #tpu.memory_space<vmem>>, vector<16x16x8xf32>
    %116 = vector.shape_cast %115 : vector<16x16x8xf32> to vector<256x8xf32>
    %c6_120 = arith.constant 6 : index
    %c0_121 = arith.constant 0 : index
    %c0_122 = arith.constant 0 : index
    %117 = vector.load %arg4[%c6_120, %c0_121, %c0_122] : memref<9x8x8xf32, #tpu.memory_space<vmem>>, vector<1x8x8xf32>
    %118 = vector.shape_cast %117 : vector<1x8x8xf32> to vector<8x8xf32>
    %cst_123 = arith.constant dense<0.000000e+00> : vector<256x8xf32>
    %119 = tpu.matmul %116, %118, %cst_123 {dimension_numbers = #tpu.dot_dimension_numbers<[1], [0], [0], [1], [0, 0, 1, 1], [], []>} : vector<256x8xf32>, vector<8x8xf32>, vector<256x8xf32> -> vector<256x8xf32>
    %120 = arith.addf %114, %119 : vector<256x8xf32>
    %c2_124 = arith.constant 2 : index
    %c1_125 = arith.constant 1 : index
    %c0_126 = arith.constant 0 : index
    %121 = vector.load %arg9[%c2_124, %c1_125, %c0_126] : memref<18x18x8xf32, #tpu.memory_space<vmem>>, vector<16x16x8xf32>
    %122 = vector.shape_cast %121 : vector<16x16x8xf32> to vector<256x8xf32>
    %c7_127 = arith.constant 7 : index
    %c0_128 = arith.constant 0 : index
    %c0_129 = arith.constant 0 : index
    %123 = vector.load %arg4[%c7_127, %c0_128, %c0_129] : memref<9x8x8xf32, #tpu.memory_space<vmem>>, vector<1x8x8xf32>
    %124 = vector.shape_cast %123 : vector<1x8x8xf32> to vector<8x8xf32>
    %cst_130 = arith.constant dense<0.000000e+00> : vector<256x8xf32>
    %125 = tpu.matmul %122, %124, %cst_130 {dimension_numbers = #tpu.dot_dimension_numbers<[1], [0], [0], [1], [0, 0, 1, 1], [], []>} : vector<256x8xf32>, vector<8x8xf32>, vector<256x8xf32> -> vector<256x8xf32>
    %126 = arith.addf %120, %125 : vector<256x8xf32>
    %c2_131 = arith.constant 2 : index
    %c2_132 = arith.constant 2 : index
    %c0_133 = arith.constant 0 : index
    %127 = vector.load %arg9[%c2_131, %c2_132, %c0_133] : memref<18x18x8xf32, #tpu.memory_space<vmem>>, vector<16x16x8xf32>
    %128 = vector.shape_cast %127 : vector<16x16x8xf32> to vector<256x8xf32>
    %c8_134 = arith.constant 8 : index
    %c0_135 = arith.constant 0 : index
    %c0_136 = arith.constant 0 : index
    %129 = vector.load %arg4[%c8_134, %c0_135, %c0_136] : memref<9x8x8xf32, #tpu.memory_space<vmem>>, vector<1x8x8xf32>
    %130 = vector.shape_cast %129 : vector<1x8x8xf32> to vector<8x8xf32>
    %cst_137 = arith.constant dense<0.000000e+00> : vector<256x8xf32>
    %131 = tpu.matmul %128, %130, %cst_137 {dimension_numbers = #tpu.dot_dimension_numbers<[1], [0], [0], [1], [0, 0, 1, 1], [], []>} : vector<256x8xf32>, vector<8x8xf32>, vector<256x8xf32> -> vector<256x8xf32>
    %132 = arith.addf %126, %131 : vector<256x8xf32>
    %c0_138 = arith.constant 0 : index
    %c0_139 = arith.constant 0 : index
    %133 = vector.load %arg5[%c0_138, %c0_139] : memref<1x8xf32, #tpu.memory_space<vmem>>, vector<1x8xf32>
    %134 = vector.broadcast %133 : vector<1x8xf32> to vector<256x8xf32>
    %135 = arith.addf %132, %134 : vector<256x8xf32>
    %cst_140 = arith.constant 0.000000e+00 : f32
    %136 = vector.broadcast %cst_140 : f32 to vector<256x8xf32>
    %137 = arith.subf %136, %135 : vector<256x8xf32>
    %138 = math.exp %137 : vector<256x8xf32>
    %cst_141 = arith.constant 1.000000e+00 : f32
    %139 = vector.broadcast %cst_141 : f32 to vector<256x8xf32>
    %140 = arith.addf %139, %138 : vector<256x8xf32>
    %141 = tpu.reciprocal %140 : vector<256x8xf32> -> vector<256x8xf32>
    %142 = arith.mulf %135, %141 : vector<256x8xf32>
    %c0_142 = arith.constant 0 : index
    %c0_143 = arith.constant 0 : index
    %143 = vector.load %arg6[%c0_142, %c0_143] : memref<8x128xf32, #tpu.memory_space<vmem>>, vector<8x128xf32>
    %cst_144 = arith.constant dense<0.000000e+00> : vector<256x128xf32>
    %144 = tpu.matmul %142, %143, %cst_144 {dimension_numbers = #tpu.dot_dimension_numbers<[1], [0], [0], [1], [0, 0, 1, 1], [], []>} : vector<256x8xf32>, vector<8x128xf32>, vector<256x128xf32> -> vector<256x128xf32>
    %c0_145 = arith.constant 0 : index
    %c0_146 = arith.constant 0 : index
    %145 = vector.load %arg7[%c0_145, %c0_146] : memref<1x128xf32, #tpu.memory_space<vmem>>, vector<1x128xf32>
    %146 = vector.broadcast %145 : vector<1x128xf32> to vector<256x128xf32>
    %147 = arith.addf %144, %146 : vector<256x128xf32>
    %148 = vector.shape_cast %147 : vector<256x128xf32> to vector<16x16x128xf32>
    %c0_147 = arith.constant 0 : index
    %c0_148 = arith.constant 0 : index
    %c0_149 = arith.constant 0 : index
    %c0_150 = arith.constant 0 : index
    %149 = vector.load %arg8[%c0_147, %c0_148, %c0_149, %c0_150] : memref<1x16x16x128xf32, #tpu.memory_space<vmem>>, vector<1x16x16x128xf32>
    %150 = vector.shape_cast %149 : vector<1x16x16x128xf32> to vector<16x16x128xf32>
    %151 = vector.shape_cast %148 : vector<16x16x128xf32> to vector<1x16x16x128xf32>
    tpu.vector_store %arg8[%c0_147, %c0_148, %c0_149, %c0_150], %151 {strides = array<i32>} : memref<1x16x16x128xf32, #tpu.memory_space<vmem>>, vector<1x16x16x128xf32>,
    return
  }
  func.func @transform_0(%arg0: i32) -> (i32, i32, i32, i32) {
    %c0_i32 = arith.constant 0 : i32
    %c0_i32_0 = arith.constant 0 : i32
    %c0_i32_1 = arith.constant 0 : i32
    %c0_i32_2 = arith.constant 0 : i32
    return %arg0, %c0_i32, %c0_i32_0, %c0_i32_1 : i32, i32, i32, i32
  }
  func.func @transform_1(%arg0: i32) -> (i32, i32, i32) {
    %c0_i32 = arith.constant 0 : i32
    %c0_i32_0 = arith.constant 0 : i32
    %c0_i32_1 = arith.constant 0 : i32
    %c0_i32_2 = arith.constant 0 : i32
    return %c0_i32, %c0_i32_0, %c0_i32_1 : i32, i32, i32
  }
  func.func @transform_2(%arg0: i32) -> (i32, i32) {
    %c0_i32 = arith.constant 0 : i32
    %c0_i32_0 = arith.constant 0 : i32
    %c0_i32_1 = arith.constant 0 : i32
    return %c0_i32, %c0_i32_0 : i32, i32
  }
  func.func @transform_3(%arg0: i32) -> (i32, i32, i32) {
    %c0_i32 = arith.constant 0 : i32
    %c0_i32_0 = arith.constant 0 : i32
    %c0_i32_1 = arith.constant 0 : i32
    %c0_i32_2 = arith.constant 0 : i32
    return %c0_i32, %c0_i32_0, %c0_i32_1 : i32, i32, i32
  }
  func.func @transform_4(%arg0: i32) -> (i32, i32) {
    %c0_i32 = arith.constant 0 : i32
    %c0_i32_0 = arith.constant 0 : i32
    %c0_i32_1 = arith.constant 0 : i32
    return %c0_i32, %c0_i32_0 : i32, i32
  }
  func.func @transform_5(%arg0: i32) -> (i32, i32) {
    %c0_i32 = arith.constant 0 : i32
    %c0_i32_0 = arith.constant 0 : i32
    %c0_i32_1 = arith.constant 0 : i32
    return %c0_i32, %c0_i32_0 : i32, i32
  }
  func.func @transform_6(%arg0: i32) -> (i32, i32) {
    %c0_i32 = arith.constant 0 : i32
    %c0_i32_0 = arith.constant 0 : i32
    %c0_i32_1 = arith.constant 0 : i32
    return %c0_i32, %c0_i32_0 : i32, i32
  }
  func.func @transform_7(%arg0: i32) -> (i32, i32, i32, i32) {
    %c0_i32 = arith.constant 0 : i32
    %c0_i32_0 = arith.constant 0 : i32
    %c0_i32_1 = arith.constant 0 : i32
    %c0_i32_2 = arith.constant 0 : i32
    return %arg0, %c0_i32, %c0_i32_0, %c0_i32_1 : i32, i32, i32, i32
  }
}

</mosaic_0001>

<bundles_post_ra>
// kernel: tpu_custom_call.1
= control target key start
LH: loop header
LB: loop body
LE: loop exit
PB: predicated region body
PF: predicated region fallthrough
CT: control target
= control target key end

     0   :  { %12 = vsyncpa [#allocation4], 0  ;;  %s14566_s0 = inlined_call_operand.vmem [shape: f32[2,18,18,4], index: 0, kind: input, shape index: {}]   ;;  %s14567_s1 = inlined_call_operand.vmem [shape: f32[9,4,8], index: 1, kind: input, shape index: {}]   ;;  %s14568_s2 = inlined_call_operand.vmem [shape: f32[1,8], index: 2, kind: input, shape index: {}]   ;;  %s14569_s3 = inlined_call_operand.vmem [shape: f32[9,8,8], index: 3, kind: input, shape index: {}]   ;;  %s14570_s4 = inlined_call_operand.vmem [shape: f32[1,8], index: 4, kind: input, shape index: {}]   ;;  %s14571_s5 = inlined_call_operand.vmem [shape: f32[8,128], index: 5, kind: input, shape index: {}]   ;;  %s14572_s6 = inlined_call_operand.vmem [shape: f32[1,128], index: 6, kind: input, shape index: {}]   ;;  %s14573_s7 = inlined_call_operand.hbm [shape: f32[2,16,16,128], index: 7, kind: output, shape index: {}]  }
   0x1   :  { %14 = vsyncpa [#allocation4 + $0x1], 0  ;;  %s10958_s24 = smov 0   ;;  %s10960_s25 = smov 0  }
   0x2   :  { %s10962_s26 = smov 0   ;;  %s10964_s27 = smov 0  }
   0x3 LB: > { %s10979_s28 = sadd.s32 4294967295, %s10912_s27   ;;  %s8133_s29 = sadd.s32 4294967294, %s10912_s27   ;;  %s10912_s27 = sphi %s10964_s27, %s15033_s27   ;;  %s10908_s26 = sphi %s10962_s26, %s15032_s26   ;;  %s10904_s25 = sphi %s10960_s25, %s15031_s25   ;;  %s10900_s24 = sphi %s10958_s24, %s15030_s24  }
   0x4   : > { %s10983_s30 = sadd.s32 1, %s10912_s27   ;;  %s179_s8 = sadd.s32 1, %s10908_s26 }
   0x5   : > { %s176_s9 = ssub.s32 %s10912_s27, %s10983_s30  ;;  %p189_p0 = scmp.ne.s32.totalorder %s10908_s26, %s10904_s25 }
   0x6   : > { %p177_p1 = scmp.eq.s32.totalorder %s176_s9, 0  ;;  %p190_p2 = scmp.eq.s32.totalorder %s10979_s28, 1 }
   0x7   : > { %p195_p3 = scmp.ne.s32.totalorder %s10904_s25, %s10900_s24  ;;  %p196_p4 = scmp.eq.s32.totalorder %s8133_s29, 1 }
   0x8   : > { %s10994_s10 = scalar_select %p177_p1, %s10908_s26, %s179_s8  }
   0x9   : > { %p10996_p5 = por %p190_p2, %p189_p0  ;;  %p11000_p6 = por %p196_p4, %p195_p3 }
   0xa   : > { %p8136_p7 = scmp.ge.s32.totalorder %s10912_s27, 1  ;;  %p240_p8 = scmp.lt.s32.totalorder %s10912_s27, 3 }
   0xc   : > { %p241_p9 = pnand %p8136_p7, %p240_p8 }
   0xe   : > { %244 = sbr.rel (%p241_p9) target bundleno = 1278 (0x4fe), region = 48 }
  0x13   : > { %v8139_v0 = vld [vmem:[%s14567_s1 + $0x4] sm:$0xf]  ;;  %vm441_vm0 = vcmask 1043456   ;;  %p272_p10 = scmp.lt.s32.totalorder %s10979_s28, 1  ;;  %v309_v1 = vld [vmem:[%s14567_s1] sm:$0xf] }
  0x14   : > { %10550 = vmatprep.subr.msk.mxu1 %vm441_vm0, %v8139_v0  ;;  %9600 = vmatprep.subr.msk.mxu0 %vm441_vm0, %v8139_v0  ;;  %v8206_v2 = vld [vmem:[%s14567_s1 + $0x8] sm:$0xf]  ;;  %vm344_vm1 = vcmask 31744   ;;  %v11051_v9 = vld [vmem:[%s14567_s1 + $0xc] sm:$0xf]  ;;  %vm3957_vm2 = vcmask 64512  }
  0x15   : > { %10551 = vmatpush3.msk.msra.mxu1 %vm441_vm0, %v8139_v0  ;;  %9601 = vmatpush3.msk.msra.mxu0 %vm441_vm0, %v8139_v0  ;;  %s273_s19 = scalar_select %p272_p10, %s10979_s28, 1  ;;  %v11056_v10 = vld [vmem:[%s14567_s1 + $0x10] sm:$0xf]  ;;  %v11215_v43 = vld [vmem:[%s14567_s1 + $0x14] sm:$0xf]  ;;  %vm3960_vm3 = vcmask 58368  }
  0x16   : > { %9650 = vmatprep.subr.msk.mxu1 %vm441_vm0, %v309_v1  ;;  %9700 = vmatprep.subr.msk.mxu0 %vm441_vm0, %v8206_v2  ;;  %v11220_v44 = vld [vmem:[%s14567_s1 + $0x18] sm:$0xf]  ;;  %s8972_s8 = sshll.u32 %s10979_s28, 12  ;;  %s10915_s17 = smov [#allocation3]  }
  0x17   : > { %s10552_s20 = smul.u32 432, %s273_s19  ;;  %s14517_s15 = scalar_lea.hbm %s14573_s7, %s8972_s8 }
  0x18   : > { %s10856_s18 = sshll.u32 %s10915_s17, 4  ;;  %s10857_s18 = int_to_ptr.vmem [resolvable:$false] %s10856_s18 }
  0x19   : > { %s11026_s23 = scalar_lea.vmem %s14566_s0, %s10552_s20  ;;  %s269_s20 = sand.u32 1, %s10904_s25  }
  0x1a   : > { %v310_v3 = vld [vmem:[%s11026_s23 + $0x1] sm:$0xff]  ;;  %v311_v5 = vld [vmem:[%s11026_s23 + $0x9] sm:$0xff]  ;;  %v11040_v7 = vld [vmem:[%s11026_s23 + $0x19] sm:$0xff]  ;;  %s8137_s21 = sshll.u32 %s269_s20, 8  ;;  %s14526_s28 = scalar_lea.sflag [#allocation4], %s269_s20 }
  0x1b   : > { %v11030_v4 = vld [vmem:[%s11026_s23 + $0xc1] sm:$0xff]  ;;  %9602 = vmatprep.mubr.msk.f32.mxu0 %vm344_vm1, %v310_v3  ;;  %v11037_v6 = vld [vmem:[%s11026_s23 + $0xc9] sm:$0xff]  ;;  %v11043_v8 = vld [vmem:[%s11026_s23 + $0xd9] sm:$0xff]  ;;  %s10858_s19 = scalar_lea.vmem %s10857_s18, 8192 }
  0x1c   : > { %9626 = vmatprep.mubr.msk.f32.mxu1 %vm344_vm1, %v11030_v4  ;;  %9603 = vmatmul.mubr.msk.f32.vlgmr.msra.gmra.mxu0 %vm344_vm1, %v311_v5  ;;  %v11061_v11 = vld [vmem:[%s11026_s23 + $0x21] sm:$0xff]  ;;  %v11071_v13 = vld [vmem:[%s11026_s23 + $0x31] sm:$0xff]  ;;  %v11089_v15 = vld [vmem:[%s11026_s23 + $0x39] sm:$0xff] }
  0x1d   : > { %9627 = vmatmul.mubr.msk.f32.vlgmr.msra.gmra.mxu1 %vm344_vm1, %v11037_v6  ;;  %9701 = vmatpush3.msk.msra.mxu0 %vm441_vm0, %v8206_v2  ;;  %v11064_v12 = vld [vmem:[%s11026_s23 + $0xe1] sm:$0xff]  ;;  %v11074_v14 = vld [vmem:[%s11026_s23 + $0xf1] sm:$0xff]  ;;  %v11092_v16 = vld [vmem:[%s11026_s23 + $0xf9] sm:$0xff] }
  0x1e   : > { %9651 = vmatpush3.msk.msra.mxu1 %vm441_vm0, %v309_v1  ;;  %9605 = vmatprep.mubr.msk.f32.mxu0 %vm344_vm1, %v11040_v7  ;;  %v11095_v17 = vld [vmem:[%s11026_s23 + $0x49] sm:$0xff]  ;;  %v11109_v19 = vld [vmem:[%s11026_s23 + $0x51] sm:$0xff]  ;;  %v11115_v21 = vld [vmem:[%s11026_s23 + $0x61] sm:$0xff] }
  0x1f   : > { %9629 = vmatprep.mubr.msk.f32.mxu1 %vm344_vm1, %v11043_v8  ;;  %9750 = vmatprep.subr.msk.mxu1 %vm441_vm0, %v11051_v9  ;;  %v11098_v18 = vld [vmem:[%s11026_s23 + $0x109] sm:$0xff]  ;;  %v11112_v20 = vld [vmem:[%s11026_s23 + $0x111] sm:$0xff]  ;;  %v11118_v22 = vld [vmem:[%s11026_s23 + $0x121] sm:$0xff] }
  0x20   : > { %9800 = vmatprep.subr.msk.mxu0 %vm441_vm0, %v11056_v10  ;;  %9606 = vmatmul.mubr.msk.f32.gmra.mxu0 %vm344_vm1, %v11061_v11  ;;  %v11129_v23 = vld [vmem:[%s11026_s23 + $0x69] sm:$0xff]  ;;  %v11135_v25 = vld [vmem:[%s11026_s23 + $0x79] sm:$0xff]  ;;  %v11149_v27 = vld [vmem:[%s11026_s23 + $0x81] sm:$0xff] }
  0x21   : > { %9630 = vmatmul.mubr.msk.f32.gmra.mxu1 %vm344_vm1, %v11064_v12  ;;  %9608 = vmatprep.mubr.msk.f32.mxu0 %vm344_vm1, %v11071_v13  ;;  %v11132_v24 = vld [vmem:[%s11026_s23 + $0x129] sm:$0xff]  ;;  %v11138_v26 = vld [vmem:[%s11026_s23 + $0x139] sm:$0xff]  ;;  %v11152_v28 = vld [vmem:[%s11026_s23 + $0x141] sm:$0xff] }
  0x22   : > { %9632 = vmatprep.mubr.msk.f32.mxu1 %vm344_vm1, %v11074_v14  ;;  %v11155_v29 = vld [vmem:[%s11026_s23 + $0x91] sm:$0xff]  ;;  %v11169_v31 = vld [vmem:[%s11026_s23 + $0x99] sm:$0xff]  ;;  %v11175_v33 = vld [vmem:[%s11026_s23 + $0xa9] sm:$0xff] }
  0x23   : > { %v11158_v30 = vld [vmem:[%s11026_s23 + $0x151] sm:$0xff]  ;;  %v11172_v32 = vld [vmem:[%s11026_s23 + $0x159] sm:$0xff]  ;;  %v11178_v34 = vld [vmem:[%s11026_s23 + $0x169] sm:$0xff] }
  0x24   : > { %9609 = vmatmul.mubr.msk.f32.gmra.mxu0 %vm344_vm1, %v11089_v15  ;;  %v11189_v35 = vld [vmem:[%s11026_s23 + $0xb1] sm:$0xff]  ;;  %v277_v37 = vld [vmem:[%s11026_s23] sm:$0xff]  ;;  %v278_v39 = vld [vmem:[%s11026_s23 + $0x8] sm:$0xff] }
  0x25   : > { %9633 = vmatmul.mubr.msk.f32.gmra.mxu1 %vm344_vm1, %v11092_v16  ;;  %9611 = vmatprep.mubr.msk.f32.mxu0 %vm344_vm1, %v11095_v17  ;;  %v11192_v36 = vld [vmem:[%s11026_s23 + $0x171] sm:$0xff]  ;;  %v994_v38 = vld [vmem:[%s11026_s23 + $0x2] sm:$0xff]  ;;  %v11208_v42 = vld [vmem:[%s11026_s23 + $0x1a] sm:$0xff] }
  0x26   : > { %9635 = vmatprep.mubr.msk.f32.mxu1 %vm344_vm1, %v11098_v18  ;;  %14668 = vst [vmem:[#allocation6_spill] sm:$0xff] %v11192_v36  ;;  %v995_v40 = vld [vmem:[%s11026_s23 + $0xa] sm:$0xff]  ;;  %v11205_v41 = vld [vmem:[%s11026_s23 + $0x18] sm:$0xff]  ;;  %14669 = vst [vmem:[#allocation7_spill] sm:$0xff] %v11208_v42 }
  0x27   : > { %v11227_v45 = vld [vmem:[%s11026_s23 + $0x20] sm:$0xff]  ;;  %v11237_v47 = vld [vmem:[%s11026_s23 + $0x30] sm:$0xff]  ;;  %v11255_v49 = vld [vmem:[%s11026_s23 + $0x38] sm:$0xff] }
  0x28   : > { %9612 = vmatmul.mubr.msk.f32.gmra.mxu0 %vm344_vm1, %v11109_v19  ;;  %v11230_v46 = vld [vmem:[%s11026_s23 + $0x22] sm:$0xff]  ;;  %v11240_v48 = vld [vmem:[%s11026_s23 + $0x32] sm:$0xff]  ;;  %v11258_v50 = vld [vmem:[%s11026_s23 + $0x3a] sm:$0xff] }
  0x29   : > { %9636 = vmatmul.mubr.msk.f32.gmra.mxu1 %vm344_vm1, %v11112_v20  ;;  %9614 = vmatprep.mubr.msk.f32.mxu0 %vm344_vm1, %v11115_v21  ;;  %14670 = vst [vmem:[#allocation8_spill] sm:$0xff] %v11230_v46  ;;  %14671 = vst [vmem:[#allocation9_spill] sm:$0xff] %v11240_v48  ;;  %v11261_v51 = vld [vmem:[%s11026_s23 + $0x48] sm:$0xff]  ;;  %v11275_v53 = vld [vmem:[%s11026_s23 + $0x50] sm:$0xff] }
  0x2a   : > { %9638 = vmatprep.mubr.msk.f32.mxu1 %vm344_vm1, %v11118_v22  ;;  %14672 = vst [vmem:[#allocation10_spill] sm:$0xff] %v11258_v50  ;;  %v11264_v52 = vld [vmem:[%s11026_s23 + $0x4a] sm:$0xff]  ;;  %v11278_v54 = vld [vmem:[%s11026_s23 + $0x52] sm:$0xff]  ;;  %v11281_v55 = vld [vmem:[%s11026_s23 + $0x60] sm:$0xff] }
  0x2b   : > { %14673 = vst [vmem:[#allocation11_spill] sm:$0xff] %v11264_v52  ;;  %14674 = vst [vmem:[#allocation12_spill] sm:$0xff] %v11278_v54  ;;  %v11284_v56 = vld [vmem:[%s11026_s23 + $0x62] sm:$0xff]  ;;  %v11298_v58 = vld [vmem:[%s11026_s23 + $0x6a] sm:$0xff] }
  0x2c   : > { %9615 = vmatmul.mubr.msk.f32.gmra.mxu0 %vm344_vm1, %v11129_v23  ;;  %14675 = vst [vmem:[#allocation13_spill] sm:$0xff] %v11284_v56  ;;  %v11295_v57 = vld [vmem:[%s11026_s23 + $0x68] sm:$0xff]  ;;  %14676 = vst [vmem:[#allocation14_spill] sm:$0xff] %v11298_v58  ;;  %v11301_v59 = vld [vmem:[%s11026_s23 + $0x78] sm:$0xff] }
  0x2d   : > { %9639 = vmatmul.mubr.msk.f32.gmra.mxu1 %vm344_vm1, %v11132_v24  ;;  %9617 = vmatprep.mubr.msk.f32.mxu0 %vm344_vm1, %v11135_v25  ;;  %v11304_v60 = vld [vmem:[%s11026_s23 + $0x7a] sm:$0xff]  ;;  %v11318_v62 = vld [vmem:[%s11026_s23 + $0x82] sm:$0xff]  ;;  %v11321_v63 = vld [vmem:[%s11026_s23 + $0x90] sm:$0xff] }
  0x2e   : > { %9641 = vmatprep.mubr.msk.f32.mxu1 %vm344_vm1, %v11138_v26  ;;  %14677 = vst [vmem:[#allocation15_spill] sm:$0xff] %v11304_v60  ;;  %v11315_v61 = vld [vmem:[%s11026_s23 + $0x80] sm:$0xff]  ;;  %14678 = vst [vmem:[#allocation16_spill] sm:$0xff] %v11318_v62  ;;  %v11324_v0 = vld [vmem:[%s11026_s23 + $0x92] sm:$0xff] }
  0x2f   : > { %14679 = vst [vmem:[#allocation17_spill] sm:$0xff] %v11324_v0  ;;  %v11335_v1 = vld [vmem:[%s11026_s23 + $0x98] sm:$0xff]  ;;  %v11341_v3 = vld [vmem:[%s11026_s23 + $0xa8] sm:$0xff] }
  0x30   : > { %9618 = vmatmul.mubr.msk.f32.gmra.mxu0 %vm344_vm1, %v11149_v27  ;;  %v11338_v2 = vld [vmem:[%s11026_s23 + $0x9a] sm:$0xff]  ;;  %v11344_v5 = vld [vmem:[%s11026_s23 + $0xaa] sm:$0xff] }
  0x31   : > { %9642 = vmatmul.mubr.msk.f32.gmra.mxu1 %vm344_vm1, %v11152_v28  ;;  %9620 = vmatprep.mubr.msk.f32.mxu0 %vm344_vm1, %v11155_v29  ;;  %14680 = vst [vmem:[#allocation18_spill] sm:$0xff] %v11338_v2  ;;  %14681 = vst [vmem:[#allocation19_spill] sm:$0xff] %v11344_v5 }
  0x32   : > { %9644 = vmatprep.mubr.msk.f32.mxu1 %vm344_vm1, %v11158_v30 }
  0x34   : > { %9621 = vmatmul.mubr.msk.f32.gmra.mxu0 %vm344_vm1, %v11169_v31 }
  0x35   : > { %9645 = vmatmul.mubr.msk.f32.gmra.mxu1 %vm344_vm1, %v11172_v32  ;;  %9623 = vmatprep.mubr.msk.f32.mxu0 %vm344_vm1, %v11175_v33 }
  0x36   : > { %9647 = vmatprep.mubr.msk.f32.mxu1 %vm344_vm1, %v11178_v34 }
  0x38   : > { %9624 = vmatmul.mubr.msk.f32.gmra.mxu0 %vm344_vm1, %v11189_v35 }
  0x39   : > { %9648 = vmatmul.mubr.msk.f32.gmra.mxu1 %vm344_vm1, %v11192_v36  ;;  %9702 = vmatprep.mubr.msk.f32.mxu0 %vm344_vm1, %v994_v38  ;;  %v11364_v38 = vld [vmem:[%s11026_s23 + $0xc2] sm:$0xff]  ;;  %v11504_v36 = vld [vmem:[%s11026_s23 + $0x16a] sm:$0xff] }
  0x3a   : > { %9652 = vmatprep.mubr.msk.f32.mxu1 %vm344_vm1, %v277_v37  ;;  %v11361_v37 = vld [vmem:[%s11026_s23 + $0xc0] sm:$0xff]  ;;  %14683 = vst [vmem:[#allocation21_spill] sm:$0xff] %v11364_v38  ;;  %14696 = vst [vmem:[#allocation34_spill] sm:$0xff] %v11504_v36 }
  0x3c   : > { %9703 = vmatmul.mubr.msk.f32.vlgmr.msra.gmra.mxu0 %vm344_vm1, %v995_v40  ;;  %v11378_v40 = vld [vmem:[%s11026_s23 + $0xca] sm:$0xff] }
  0x3d   : > { %9653 = vmatmul.mubr.msk.f32.vlgmr.msra.gmra.mxu1 %vm344_vm1, %v278_v39  ;;  %9801 = vmatpush3.msk.msra.mxu0 %vm441_vm0, %v11056_v10  ;;  %v11358_v10 = vld [vmem:[%s11026_s23 + $0xb2] sm:$0xff]  ;;  %v11375_v39 = vld [vmem:[%s11026_s23 + $0xc8] sm:$0xff]  ;;  %14684 = vst [vmem:[#allocation22_spill] sm:$0xff] %v11378_v40 }
  0x3e   : > { %9751 = vmatpush3.msk.msra.mxu1 %vm441_vm0, %v11051_v9  ;;  %9655 = vmatprep.mubr.msk.f32.mxu1 %vm344_vm1, %v11205_v41  ;;  %v11355_v9 = vld [vmem:[%s11026_s23 + $0xb0] sm:$0xff]  ;;  %14682 = vst [vmem:[#allocation20_spill] sm:$0xff] %v11358_v10 }
  0x3f   : > { %9705 = vmatprep.mubr.msk.f32.mxu0 %vm344_vm1, %v11208_v42  ;;  %9850 = vmatprep.subr.msk.mxu1 %vm441_vm0, %v11215_v43  ;;  %v11501_v42 = vld [vmem:[%s11026_s23 + $0x168] sm:$0xff] }
  0x40   : > { %9900 = vmatprep.subr.msk.mxu0 %vm441_vm0, %v11220_v44  ;;  %9706 = vmatmul.mubr.msk.f32.gmra.mxu0 %vm344_vm1, %v11230_v46  ;;  %v11484_v46 = vld [vmem:[%s11026_s23 + $0x152] sm:$0xff] }
  0x41   : > { %9656 = vmatmul.mubr.msk.f32.gmra.mxu1 %vm344_vm1, %v11227_v45  ;;  %9708 = vmatprep.mubr.msk.f32.mxu0 %vm344_vm1, %v11240_v48  ;;  %v11481_v48 = vld [vmem:[%s11026_s23 + $0x150] sm:$0xff]  ;;  %14695 = vst [vmem:[#allocation33_spill] sm:$0xff] %v11484_v46 }
  0x42   : > { %9658 = vmatprep.mubr.msk.f32.mxu1 %vm344_vm1, %v11237_v47 }
  0x44   : > { %9709 = vmatmul.mubr.msk.f32.gmra.mxu0 %vm344_vm1, %v11258_v50  ;;  %v11464_v50 = vld [vmem:[%s11026_s23 + $0x13a] sm:$0xff] }
  0x45   : > { %9659 = vmatmul.mubr.msk.f32.gmra.mxu1 %vm344_vm1, %v11255_v49  ;;  %9711 = vmatprep.mubr.msk.f32.mxu0 %vm344_vm1, %v11264_v52  ;;  %v11461_v52 = vld [vmem:[%s11026_s23 + $0x138] sm:$0xff]  ;;  %14693 = vst [vmem:[#allocation31_spill] sm:$0xff] %v11464_v50 }
  0x46   : > { %9661 = vmatprep.mubr.msk.f32.mxu1 %vm344_vm1, %v11261_v51 }
  0x48   : > { %9712 = vmatmul.mubr.msk.f32.gmra.mxu0 %vm344_vm1, %v11278_v54  ;;  %v11444_v54 = vld [vmem:[%s11026_s23 + $0x122] sm:$0xff] }
  0x49   : > { %9662 = vmatmul.mubr.msk.f32.gmra.mxu1 %vm344_vm1, %v11275_v53  ;;  %9714 = vmatprep.mubr.msk.f32.mxu0 %vm344_vm1, %v11284_v56  ;;  %v11441_v56 = vld [vmem:[%s11026_s23 + $0x120] sm:$0xff]  ;;  %14691 = vst [vmem:[#allocation29_spill] sm:$0xff] %v11444_v54 }
  0x4a   : > { %9664 = vmatprep.mubr.msk.f32.mxu1 %vm344_vm1, %v11281_v55 }
  0x4c   : > { %9715 = vmatmul.mubr.msk.f32.gmra.mxu0 %vm344_vm1, %v11298_v58  ;;  %v11424_v58 = vld [vmem:[%s11026_s23 + $0x10a] sm:$0xff] }
  0x4d   : > { %9665 = vmatmul.mubr.msk.f32.gmra.mxu1 %vm344_vm1, %v11295_v57  ;;  %9717 = vmatprep.mubr.msk.f32.mxu0 %vm344_vm1, %v11304_v60  ;;  %v11421_v60 = vld [vmem:[%s11026_s23 + $0x108] sm:$0xff]  ;;  %14689 = vst [vmem:[#allocation27_spill] sm:$0xff] %v11424_v58 }
  0x4e   : > { %9667 = vmatprep.mubr.msk.f32.mxu1 %vm344_vm1, %v11301_v59 }
  0x50   : > { %9718 = vmatmul.mubr.msk.f32.gmra.mxu0 %vm344_vm1, %v11318_v62  ;;  %v11404_v62 = vld [vmem:[%s11026_s23 + $0xf2] sm:$0xff] }
  0x51   : > { %9668 = vmatmul.mubr.msk.f32.gmra.mxu1 %vm344_vm1, %v11315_v61  ;;  %9720 = vmatprep.mubr.msk.f32.mxu0 %vm344_vm1, %v11324_v0  ;;  %v11401_v0 = vld [vmem:[%s11026_s23 + $0xf0] sm:$0xff]  ;;  %14687 = vst [vmem:[#allocation25_spill] sm:$0xff] %v11404_v62 }
  0x52   : > { %9670 = vmatprep.mubr.msk.f32.mxu1 %vm344_vm1, %v11321_v63 }
  0x54   : > { %9721 = vmatmul.mubr.msk.f32.gmra.mxu0 %vm344_vm1, %v11338_v2  ;;  %v11384_v2 = vld [vmem:[%s11026_s23 + $0xda] sm:$0xff] }
  0x55   : > { %9671 = vmatmul.mubr.msk.f32.gmra.mxu1 %vm344_vm1, %v11335_v1  ;;  %9723 = vmatprep.mubr.msk.f32.mxu0 %vm344_vm1, %v11344_v5  ;;  %v11381_v5 = vld [vmem:[%s11026_s23 + $0xd8] sm:$0xff]  ;;  %14685 = vst [vmem:[#allocation23_spill] sm:$0xff] %v11384_v2 }
  0x56   : > { %9673 = vmatprep.mubr.msk.f32.mxu1 %vm344_vm1, %v11341_v3 }
  0x58   : > { %9724 = vmatmul.mubr.msk.f32.gmra.mxu0 %vm344_vm1, %v11358_v10  ;;  %v11398_v10 = vld [vmem:[%s11026_s23 + $0xe2] sm:$0xff] }
  0x59   : > { %9674 = vmatmul.mubr.msk.f32.gmra.mxu1 %vm344_vm1, %v11355_v9  ;;  %9726 = vmatprep.mubr.msk.f32.mxu0 %vm344_vm1, %v11364_v38  ;;  %v11395_v38 = vld [vmem:[%s11026_s23 + $0xe0] sm:$0xff]  ;;  %14686 = vst [vmem:[#allocation24_spill] sm:$0xff] %v11398_v10 }
  0x5a   : > { %9676 = vmatprep.mubr.msk.f32.mxu1 %vm344_vm1, %v11361_v37 }
  0x5c   : > { %9727 = vmatmul.mubr.msk.f32.gmra.mxu0 %vm344_vm1, %v11378_v40  ;;  %v11418_v40 = vld [vmem:[%s11026_s23 + $0xfa] sm:$0xff] }
  0x5d   : > { %9677 = vmatmul.mubr.msk.f32.gmra.mxu1 %vm344_vm1, %v11375_v39  ;;  %9729 = vmatprep.mubr.msk.f32.mxu0 %vm344_vm1, %v11384_v2  ;;  %v11415_v2 = vld [vmem:[%s11026_s23 + $0xf8] sm:$0xff]  ;;  %14688 = vst [vmem:[#allocation26_spill] sm:$0xff] %v11418_v40 }
  0x5e   : > { %9679 = vmatprep.mubr.msk.f32.mxu1 %vm344_vm1, %v11381_v5 }
  0x60   : > { %9730 = vmatmul.mubr.msk.f32.gmra.mxu0 %vm344_vm1, %v11398_v10  ;;  %v11438_v10 = vld [vmem:[%s11026_s23 + $0x112] sm:$0xff] }
  0x61   : > { %9680 = vmatmul.mubr.msk.f32.gmra.mxu1 %vm344_vm1, %v11395_v38  ;;  %9732 = vmatprep.mubr.msk.f32.mxu0 %vm344_vm1, %v11404_v62  ;;  %v11435_v62 = vld [vmem:[%s11026_s23 + $0x110] sm:$0xff]  ;;  %14690 = vst [vmem:[#allocation28_spill] sm:$0xff] %v11438_v10 }
  0x62   : > { %9682 = vmatprep.mubr.msk.f32.mxu1 %vm344_vm1, %v11401_v0 }
  0x64   : > { %9733 = vmatmul.mubr.msk.f32.gmra.mxu0 %vm344_vm1, %v11418_v40  ;;  %v11458_v40 = vld [vmem:[%s11026_s23 + $0x12a] sm:$0xff] }
  0x65   : > { %9683 = vmatmul.mubr.msk.f32.gmra.mxu1 %vm344_vm1, %v11415_v2  ;;  %9735 = vmatprep.mubr.msk.f32.mxu0 %vm344_vm1, %v11424_v58  ;;  %v11455_v58 = vld [vmem:[%s11026_s23 + $0x128] sm:$0xff]  ;;  %14692 = vst [vmem:[#allocation30_spill] sm:$0xff] %v11458_v40 }
  0x66   : > { %9685 = vmatprep.mubr.msk.f32.mxu1 %vm344_vm1, %v11421_v60 }
  0x68   : > { %9736 = vmatmul.mubr.msk.f32.gmra.mxu0 %vm344_vm1, %v11438_v10  ;;  %v11478_v10 = vld [vmem:[%s11026_s23 + $0x142] sm:$0xff] }
  0x69   : > { %9686 = vmatmul.mubr.msk.f32.gmra.mxu1 %vm344_vm1, %v11435_v62  ;;  %9738 = vmatprep.mubr.msk.f32.mxu0 %vm344_vm1, %v11444_v54  ;;  %v11475_v54 = vld [vmem:[%s11026_s23 + $0x140] sm:$0xff]  ;;  %14694 = vst [vmem:[#allocation32_spill] sm:$0xff] %v11478_v10 }
  0x6a   : > { %9688 = vmatprep.mubr.msk.f32.mxu1 %vm344_vm1, %v11441_v56 }
  0x6c   : > { %9739 = vmatmul.mubr.msk.f32.gmra.mxu0 %vm344_vm1, %v11458_v40  ;;  %v11498_v40 = vld [vmem:[%s11026_s23 + $0x15a] sm:$0xff] }
  0x6d   : > { %9689 = vmatmul.mubr.msk.f32.gmra.mxu1 %vm344_vm1, %v11455_v58  ;;  %9741 = vmatprep.mubr.msk.f32.mxu0 %vm344_vm1, %v11464_v50  ;;  %v11495_v50 = vld [vmem:[%s11026_s23 + $0x158] sm:$0xff] }
  0x6e   : > { %9691 = vmatprep.mubr.msk.f32.mxu1 %vm344_vm1, %v11461_v52 }
  0x70   : > { %9742 = vmatmul.mubr.msk.f32.gmra.mxu0 %vm344_vm1, %v11478_v10  ;;  %v11518_v10 = vld [vmem:[%s11026_s23 + $0x172] sm:$0xff] }
  0x71   : > { %9692 = vmatmul.mubr.msk.f32.gmra.mxu1 %vm344_vm1, %v11475_v54  ;;  %9744 = vmatprep.mubr.msk.f32.mxu0 %vm344_vm1, %v11484_v46  ;;  %v11515_v46 = vld [vmem:[%s11026_s23 + $0x170] sm:$0xff]  ;;  %14697 = vst [vmem:[#allocation35_spill] sm:$0xff] %v11518_v10 }
  0x72   : > { %9694 = vmatprep.mubr.msk.f32.mxu1 %vm344_vm1, %v11481_v48 }
  0x74   : > { %9745 = vmatmul.mubr.msk.f32.gmra.mxu0 %vm344_vm1, %v11498_v40 }
  0x75   : > { %9695 = vmatmul.mubr.msk.f32.gmra.mxu1 %vm344_vm1, %v11495_v50  ;;  %9747 = vmatprep.mubr.msk.f32.mxu0 %vm344_vm1, %v11504_v36  ;;  %v11535_v36 = vld [vmem:[%s14567_s1 + $0x1c] sm:$0xf] }
  0x76   : > { %9697 = vmatprep.mubr.msk.f32.mxu1 %vm344_vm1, %v11501_v42 }
  0x78   : > { %9748 = vmatmul.mubr.msk.f32.gmra.mxu0 %vm344_vm1, %v11518_v10  ;;  %v11540_v10 = vld [vmem:[%s14567_s1 + $0x20] sm:$0xf] }
  0x79   : > { %9698 = vmatmul.mubr.msk.f32.gmra.mxu1 %vm344_vm1, %v11515_v46  ;;  %9802 = vmatprep.mubr.msk.f32.mxu0 %vm344_vm1, %v11040_v7  ;;  %v14698_v7 = vld [vmem:[#allocation6_spill] sm:$0xff] }
  0x7a   : > { %9752 = vmatprep.mubr.msk.f32.mxu1 %vm344_vm1, %v11205_v41 }
  0x7c   : > { %9803 = vmatmul.mubr.msk.f32.vlgmr.msra.gmra.mxu0 %vm344_vm1, %v11061_v11  ;;  %v11676_v11 = vld [vmem:[%s11026_s23 + $0x189] sm:$0xff] }
  0x7d   : > { %9753 = vmatmul.mubr.msk.f32.vlgmr.msra.gmra.mxu1 %vm344_vm1, %v11227_v45  ;;  %9901 = vmatpush3.msk.msra.mxu0 %vm441_vm0, %v11220_v44  ;;  %14699 = vst [vmem:[#allocation6_spill] sm:$0xff] %v11676_v11  ;;  %v14717_v44 = vld [vmem:[#allocation24_spill] sm:$0xff]  ;;  %v14718_v45 = vld [vmem:[#allocation25_spill] sm:$0xff] }
  0x7e   : > { %9851 = vmatpush3.msk.msra.mxu1 %vm441_vm0, %v11215_v43  ;;  %9755 = vmatprep.mubr.msk.f32.mxu1 %vm344_vm1, %v11237_v47 }
  0x7f   : > { %9805 = vmatprep.mubr.msk.f32.mxu0 %vm344_vm1, %v11071_v13  ;;  %9950 = vmatprep.subr.msk.mxu1 %vm441_vm0, %v11535_v36 }
  0x80   : > { %10000 = vmatprep.subr.msk.mxu0 %vm441_vm0, %v11540_v10  ;;  %9806 = vmatmul.mubr.msk.f32.gmra.mxu0 %vm344_vm1, %v11089_v15 }
  0x81   : > { %9756 = vmatmul.mubr.msk.f32.gmra.mxu1 %vm344_vm1, %v11255_v49  ;;  %9808 = vmatprep.mubr.msk.f32.mxu0 %vm344_vm1, %v11095_v17 }
  0x82   : > { %9758 = vmatprep.mubr.msk.f32.mxu1 %vm344_vm1, %v11261_v51 }
  0x84   : > { %9809 = vmatmul.mubr.msk.f32.gmra.mxu0 %vm344_vm1, %v11109_v19 }
  0x85   : > { %9759 = vmatmul.mubr.msk.f32.gmra.mxu1 %vm344_vm1, %v11275_v53  ;;  %9811 = vmatprep.mubr.msk.f32.mxu0 %vm344_vm1, %v11115_v21 }
  0x86   : > { %9761 = vmatprep.mubr.msk.f32.mxu1 %vm344_vm1, %v11281_v55 }
  0x88   : > { %9812 = vmatmul.mubr.msk.f32.gmra.mxu0 %vm344_vm1, %v11129_v23 }
  0x89   : > { %9762 = vmatmul.mubr.msk.f32.gmra.mxu1 %vm344_vm1, %v11295_v57  ;;  %9814 = vmatprep.mubr.msk.f32.mxu0 %vm344_vm1, %v11135_v25 }
  0x8a   : > { %9764 = vmatprep.mubr.msk.f32.mxu1 %vm344_vm1, %v11301_v59 }
  0x8c   : > { %9815 = vmatmul.mubr.msk.f32.gmra.mxu0 %vm344_vm1, %v11149_v27 }
  0x8d   : > { %9765 = vmatmul.mubr.msk.f32.gmra.mxu1 %vm344_vm1, %v11315_v61  ;;  %9817 = vmatprep.mubr.msk.f32.mxu0 %vm344_vm1, %v11155_v29  ;;  %v14709_v29 = vld [vmem:[#allocation16_spill] sm:$0xff] }
  0x8e   : > { %9767 = vmatprep.mubr.msk.f32.mxu1 %vm344_vm1, %v11321_v63 }
  0x90   : > { %9818 = vmatmul.mubr.msk.f32.gmra.mxu0 %vm344_vm1, %v11169_v31  ;;  %v14711_v31 = vld [vmem:[#allocation18_spill] sm:$0xff] }
  0x91   : > { %9768 = vmatmul.mubr.msk.f32.gmra.mxu1 %vm344_vm1, %v11335_v1  ;;  %9820 = vmatprep.mubr.msk.f32.mxu0 %vm344_vm1, %v11175_v33  ;;  %v14713_v33 = vld [vmem:[#allocation20_spill] sm:$0xff] }
  0x92   : > { %9770 = vmatprep.mubr.msk.f32.mxu1 %vm344_vm1, %v11341_v3 }
  0x94   : > { %9821 = vmatmul.mubr.msk.f32.gmra.mxu0 %vm344_vm1, %v11189_v35  ;;  %v14715_v35 = vld [vmem:[#allocation22_spill] sm:$0xff] }
  0x95   : > { %9771 = vmatmul.mubr.msk.f32.gmra.mxu1 %vm344_vm1, %v11355_v9  ;;  %9823 = vmatprep.mubr.msk.f32.mxu0 %vm344_vm1, %v11030_v4  ;;  %v11659_v4 = vld [vmem:[%s11026_s23 + $0x180] sm:$0xff] }
  0x96   : > { %9773 = vmatprep.mubr.msk.f32.mxu1 %vm344_vm1, %v11361_v37 }
  0x98   : > { %9824 = vmatmul.mubr.msk.f32.gmra.mxu0 %vm344_vm1, %v11037_v6  ;;  %v11662_v6 = vld [vmem:[%s11026_s23 + $0x181] sm:$0xff] }
  0x99   : > { %9774 = vmatmul.mubr.msk.f32.gmra.mxu1 %vm344_vm1, %v11375_v39  ;;  %9826 = vmatprep.mubr.msk.f32.mxu0 %vm344_vm1, %v11043_v8  ;;  %v11673_v8 = vld [vmem:[%s11026_s23 + $0x188] sm:$0xff] }
  0x9a   : > { %9776 = vmatprep.mubr.msk.f32.mxu1 %vm344_vm1, %v11381_v5 }
  0x9c   : > { %9827 = vmatmul.mubr.msk.f32.gmra.mxu0 %vm344_vm1, %v11064_v12  ;;  %v14700_v12 = vld [vmem:[#allocation7_spill] sm:$0xff] }
  0x9d   : > { %9777 = vmatmul.mubr.msk.f32.gmra.mxu1 %vm344_vm1, %v11395_v38  ;;  %9829 = vmatprep.mubr.msk.f32.mxu0 %vm344_vm1, %v11074_v14  ;;  %v14701_v14 = vld [vmem:[#allocation8_spill] sm:$0xff] }
  0x9e   : > { %9779 = vmatprep.mubr.msk.f32.mxu1 %vm344_vm1, %v11401_v0 }
  0xa0   : > { %9830 = vmatmul.mubr.msk.f32.gmra.mxu0 %vm344_vm1, %v11092_v16  ;;  %v14702_v16 = vld [vmem:[#allocation9_spill] sm:$0xff] }
  0xa1   : > { %9780 = vmatmul.mubr.msk.f32.gmra.mxu1 %vm344_vm1, %v11415_v2  ;;  %9832 = vmatprep.mubr.msk.f32.mxu0 %vm344_vm1, %v11098_v18  ;;  %v14703_v18 = vld [vmem:[#allocation10_spill] sm:$0xff] }
  0xa2   : > { %9782 = vmatprep.mubr.msk.f32.mxu1 %vm344_vm1, %v11421_v60 }
  0xa4   : > { %9833 = vmatmul.mubr.msk.f32.gmra.mxu0 %vm344_vm1, %v11112_v20  ;;  %v14704_v20 = vld [vmem:[#allocation11_spill] sm:$0xff] }
  0xa5   : > { %9783 = vmatmul.mubr.msk.f32.gmra.mxu1 %vm344_vm1, %v11435_v62  ;;  %9835 = vmatprep.mubr.msk.f32.mxu0 %vm344_vm1, %v11118_v22  ;;  %v14705_v22 = vld [vmem:[#allocation12_spill] sm:$0xff] }
  0xa6   : > { %9785 = vmatprep.mubr.msk.f32.mxu1 %vm344_vm1, %v11441_v56 }
  0xa8   : > { %9836 = vmatmul.mubr.msk.f32.gmra.mxu0 %vm344_vm1, %v11132_v24  ;;  %v14706_v24 = vld [vmem:[#allocation13_spill] sm:$0xff] }
  0xa9   : > { %9786 = vmatmul.mubr.msk.f32.gmra.mxu1 %vm344_vm1, %v11455_v58  ;;  %9838 = vmatprep.mubr.msk.f32.mxu0 %vm344_vm1, %v11138_v26  ;;  %v14707_v26 = vld [vmem:[#allocation14_spill] sm:$0xff] }
  0xaa   : > { %9788 = vmatprep.mubr.msk.f32.mxu1 %vm344_vm1, %v11461_v52 }
  0xac   : > { %9839 = vmatmul.mubr.msk.f32.gmra.mxu0 %vm344_vm1, %v11152_v28  ;;  %v14708_v28 = vld [vmem:[#allocation15_spill] sm:$0xff] }
  0xad   : > { %9789 = vmatmul.mubr.msk.f32.gmra.mxu1 %vm344_vm1, %v11475_v54  ;;  %9841 = vmatprep.mubr.msk.f32.mxu0 %vm344_vm1, %v11158_v30  ;;  %v14710_v30 = vld [vmem:[#allocation17_spill] sm:$0xff] }
  0xae   : > { %9791 = vmatprep.mubr.msk.f32.mxu1 %vm344_vm1, %v11481_v48 }
  0xb0   : > { %9842 = vmatmul.mubr.msk.f32.gmra.mxu0 %vm344_vm1, %v11172_v32  ;;  %v14712_v32 = vld [vmem:[#allocation19_spill] sm:$0xff] }
  0xb1   : > { %9792 = vmatmul.mubr.msk.f32.gmra.mxu1 %vm344_vm1, %v11495_v50  ;;  %9844 = vmatprep.mubr.msk.f32.mxu0 %vm344_vm1, %v11178_v34  ;;  %v14714_v34 = vld [vmem:[#allocation21_spill] sm:$0xff] }
  0xb2   : > { %9794 = vmatprep.mubr.msk.f32.mxu1 %vm344_vm1, %v11501_v42 }
  0xb4   : > { %9845 = vmatmul.mubr.msk.f32.gmra.mxu0 %vm344_vm1, %v14698_v7 }
  0xb5   : > { %9795 = vmatmul.mubr.msk.f32.gmra.mxu1 %vm344_vm1, %v11515_v46  ;;  %9847 = vmatprep.mubr.msk.f32.mxu0 %vm344_vm1, %v11662_v6 }
  0xb6   : > { %9797 = vmatprep.mubr.msk.f32.mxu1 %vm344_vm1, %v11659_v4 }
  0xb8   : > { %9848 = vmatmul.mubr.msk.f32.gmra.mxu0 %vm344_vm1, %v11676_v11 }
  0xb9   : > { %9798 = vmatmul.mubr.msk.f32.gmra.mxu1 %vm344_vm1, %v11673_v8  ;;  %9902 = vmatprep.mubr.msk.f32.mxu0 %vm344_vm1, %v11237_v47 }
  0xba   : > { %9852 = vmatprep.mubr.msk.f32.mxu1 %vm344_vm1, %v14700_v12 }
  0xbc   : > { %9903 = vmatmul.mubr.msk.f32.vlgmr.msra.gmra.mxu0 %vm344_vm1, %v11255_v49 }
  0xbd   : > { %9853 = vmatmul.mubr.msk.f32.vlgmr.msra.gmra.mxu1 %vm344_vm1, %v14701_v14  ;;  %10001 = vmatpush3.msk.msra.mxu0 %vm441_vm0, %v11540_v10 }
  0xbe   : > { %9951 = vmatpush3.msk.msra.mxu1 %vm441_vm0, %v11535_v36  ;;  %9855 = vmatprep.mubr.msk.f32.mxu1 %vm344_vm1, %v14702_v16  ;;  %v14716_v36 = vld [vmem:[#allocation23_spill] sm:$0xff] }
  0xbf   : > { %9905 = vmatprep.mubr.msk.f32.mxu0 %vm344_vm1, %v11261_v51 }
  0xc0   : > { %9906 = vmatmul.mubr.msk.f32.gmra.mxu0 %vm344_vm1, %v11275_v53 }
  0xc1   : > { %9856 = vmatmul.mubr.msk.f32.gmra.mxu1 %vm344_vm1, %v14703_v18  ;;  %9908 = vmatprep.mubr.msk.f32.mxu0 %vm344_vm1, %v11281_v55  ;;  %v14720_v55 = vld [vmem:[#allocation26_spill] sm:$0xff] }
  0xc2   : > { %9858 = vmatprep.mubr.msk.f32.mxu1 %vm344_vm1, %v14704_v20 }
  0xc4   : > { %9909 = vmatmul.mubr.msk.f32.gmra.mxu0 %vm344_vm1, %v11295_v57  ;;  %v14721_v57 = vld [vmem:[#allocation27_spill] sm:$0xff] }
  0xc5   : > { %9859 = vmatmul.mubr.msk.f32.gmra.mxu1 %vm344_vm1, %v14705_v22  ;;  %9911 = vmatprep.mubr.msk.f32.mxu0 %vm344_vm1, %v11301_v59 }
  0xc6   : > { %9861 = vmatprep.mubr.msk.f32.mxu1 %vm344_vm1, %v14706_v24 }
  0xc8   : > { %9912 = vmatmul.mubr.msk.f32.gmra.mxu0 %vm344_vm1, %v11315_v61 }
  0xc9   : > { %9862 = vmatmul.mubr.msk.f32.gmra.mxu1 %vm344_vm1, %v14707_v26  ;;  %9914 = vmatprep.mubr.msk.f32.mxu0 %vm344_vm1, %v11321_v63 }
  0xca   : > { %9864 = vmatprep.mubr.msk.f32.mxu1 %vm344_vm1, %v14708_v28 }
  0xcc   : > { %9915 = vmatmul.mubr.msk.f32.gmra.mxu0 %vm344_vm1, %v11335_v1 }
  0xcd   : > { %9865 = vmatmul.mubr.msk.f32.gmra.mxu1 %vm344_vm1, %v14709_v29  ;;  %9917 = vmatprep.mubr.msk.f32.mxu0 %vm344_vm1, %v11341_v3 }
  0xce   : > { %9867 = vmatprep.mubr.msk.f32.mxu1 %vm344_vm1, %v14710_v30 }
  0xd0   : > { %9918 = vmatmul.mubr.msk.f32.gmra.mxu0 %vm344_vm1, %v11355_v9 }
  0xd1   : > { %9868 = vmatmul.mubr.msk.f32.gmra.mxu1 %vm344_vm1, %v14711_v31  ;;  %9920 = vmatprep.mubr.msk.f32.mxu0 %vm344_vm1, %v11361_v37 }
  0xd2   : > { %9870 = vmatprep.mubr.msk.f32.mxu1 %vm344_vm1, %v14712_v32 }
  0xd4   : > { %9921 = vmatmul.mubr.msk.f32.gmra.mxu0 %vm344_vm1, %v11375_v39 }
  0xd5   : > { %9871 = vmatmul.mubr.msk.f32.gmra.mxu1 %vm344_vm1, %v14713_v33  ;;  %9923 = vmatprep.mubr.msk.f32.mxu0 %vm344_vm1, %v11381_v5  ;;  %v14726_v5 = vld [vmem:[#allocation30_spill] sm:$0xff] }
  0xd6   : > { %9873 = vmatprep.mubr.msk.f32.mxu1 %vm344_vm1, %v14714_v34 }
  0xd8   : > { %9924 = vmatmul.mubr.msk.f32.gmra.mxu0 %vm344_vm1, %v11395_v38  ;;  %v14729_v38 = vld [vmem:[#allocation32_spill] sm:$0xff] }
  0xd9   : > { %9874 = vmatmul.mubr.msk.f32.gmra.mxu1 %vm344_vm1, %v14715_v35  ;;  %9926 = vmatprep.mubr.msk.f32.mxu0 %vm344_vm1, %v11401_v0  ;;  %v14723_v0 = vld [vmem:[#allocation28_spill] sm:$0xff] }
  0xda   : > { %9876 = vmatprep.mubr.msk.f32.mxu1 %vm344_vm1, %v14716_v36 }
  0xdc   : > { %v11754_v41 = vpop.f32.mrf.mxu0  ;;  %9927 = vmatmul.mubr.msk.f32.gmra.mxu0 %vm344_vm1, %v11415_v2 }
  0xdd   : > { %v11756_v43 = vpop.f32.mrf.mxu1  ;;  %9877 = vmatmul.mubr.msk.f32.gmra.mxu1 %vm344_vm1, %v14717_v44  ;;  %9929 = vmatprep.mubr.msk.f32.mxu0 %vm344_vm1, %v11421_v60 }
  0xde   : > { %9879 = vmatprep.mubr.msk.f32.mxu1 %vm344_vm1, %v14718_v45  ;;  %v11766_v47 = vpop.f32.mrf.mxu0 }
  0xdf   : > { %v11768_v49 = vpop.f32.mrf.mxu1 }
  0xe0   : > { %14719 = vst [vmem:[#allocation7_spill] sm:$0xff] %v11768_v49  ;;  %v11770_v51 = vpop.f32.mrf.mxu0  ;;  %9930 = vmatmul.mubr.msk.f32.gmra.mxu0 %vm344_vm1, %v11435_v62  ;;  %v14724_v62 = vld [vmem:[#allocation29_spill] sm:$0xff]  ;;  %v14736_v49 = vld [vmem:[#allocation35_spill] sm:$0xff] }
  0xe1   : > { %v11772_v53 = vpop.f32.mrf.mxu1  ;;  %9880 = vmatmul.mubr.msk.f32.gmra.mxu1 %vm344_vm1, %v14720_v55  ;;  %9932 = vmatprep.mubr.msk.f32.mxu0 %vm344_vm1, %v11441_v56 }
  0xe2   : > { %9882 = vmatprep.mubr.msk.f32.mxu1 %vm344_vm1, %v14721_v57  ;;  %v11782_v59 = vpop.f32.mrf.mxu0 }
  0xe3   : > { %v11784_v60 = vpop.f32.mrf.mxu1 }
  0xe4   : > { %14722 = vst [vmem:[#allocation8_spill] sm:$0xff] %v11784_v60  ;;  %v11786_v61 = vpop.f32.mrf.mxu0  ;;  %9933 = vmatmul.mubr.msk.f32.gmra.mxu0 %vm344_vm1, %v11455_v58  ;;  %v14727_v58 = vld [vmem:[#allocation31_spill] sm:$0xff] }
  0xe5   : > { %v11788_v63 = vpop.f32.mrf.mxu1  ;;  %9883 = vmatmul.mubr.msk.f32.gmra.mxu1 %vm344_vm1, %v14723_v0  ;;  %9935 = vmatprep.mubr.msk.f32.mxu0 %vm344_vm1, %v11461_v52 }
  0xe6   : > { %9885 = vmatprep.mubr.msk.f32.mxu1 %vm344_vm1, %v14724_v62  ;;  %v11798_v56 = vpop.f32.mrf.mxu0 }
  0xe7   : > { %v11800_v1 = vpop.f32.mrf.mxu1 }
  0xe8   : > { %14725 = vst [vmem:[#allocation9_spill] sm:$0xff] %v11800_v1  ;;  %v11802_v2 = vpop.f32.mrf.mxu0  ;;  %9936 = vmatmul.mubr.msk.f32.gmra.mxu0 %vm344_vm1, %v11475_v54  ;;  %v14730_v54 = vld [vmem:[#allocation33_spill] sm:$0xff] }
  0xe9   : > { %v11804_v3 = vpop.f32.mrf.mxu1  ;;  %9886 = vmatmul.mubr.msk.f32.gmra.mxu1 %vm344_vm1, %v14726_v5  ;;  %9938 = vmatprep.mubr.msk.f32.mxu0 %vm344_vm1, %v11481_v48 }
  0xea   : > { %9888 = vmatprep.mubr.msk.f32.mxu1 %vm344_vm1, %v14727_v58  ;;  %v11814_v52 = vpop.f32.mrf.mxu0 }
  0xeb   : > { %v11816_v9 = vpop.f32.mrf.mxu1 }
  0xec   : > { %14728 = vst [vmem:[#allocation10_spill] sm:$0xff] %v11816_v9  ;;  %v11818_v10 = vpop.f32.mrf.mxu0  ;;  %9939 = vmatmul.mubr.msk.f32.gmra.mxu0 %vm344_vm1, %v11495_v50  ;;  %v14732_v50 = vld [vmem:[#allocation34_spill] sm:$0xff]  ;;  %v8468_v9 = vld [vmem:[%s11026_s23 + $0x198] sm:$0xff] }
  0xed   : > { %v11820_v37 = vpop.f32.mrf.mxu1  ;;  %9889 = vmatmul.mubr.msk.f32.gmra.mxu1 %vm344_vm1, %v14729_v38  ;;  %9941 = vmatprep.mubr.msk.f32.mxu0 %vm344_vm1, %v11501_v42 }
  0xee   : > { %9891 = vmatprep.mubr.msk.f32.mxu1 %vm344_vm1, %v14730_v54  ;;  %v11830_v48 = vpop.f32.mrf.mxu0 }
  0xef   : > { %v11832_v39 = vpop.f32.mrf.mxu1 }
  0xf0   : > { %14731 = vst [vmem:[#allocation11_spill] sm:$0xff] %v11832_v39  ;;  %v11834_v7 = vpop.f32.mrf.mxu0  ;;  %9942 = vmatmul.mubr.msk.f32.gmra.mxu0 %vm344_vm1, %v11515_v46  ;;  %v11851_v39 = vld [vmem:[%s11026_s23 + $0x182] sm:$0xff]  ;;  %v11866_v46 = vld [vmem:[%s11026_s23 + $0x18a] sm:$0xff] }
  0xf1   : > { %v11836_v12 = vpop.f32.mrf.mxu1  ;;  %9892 = vmatmul.mubr.msk.f32.gmra.mxu1 %vm344_vm1, %v11498_v40  ;;  %9944 = vmatprep.mubr.msk.f32.mxu0 %vm344_vm1, %v11659_v4  ;;  %14734 = vst [vmem:[#allocation13_spill] sm:$0xff] %v11851_v39  ;;  %14737 = vst [vmem:[#allocation15_spill] sm:$0xff] %v11866_v46  ;;  %v8469_v4 = vld [vmem:[%s11026_s23 + $0x1a0] sm:$0xff] }
  0xf2   : > { %9894 = vmatprep.mubr.msk.f32.mxu1 %vm344_vm1, %v14732_v50  ;;  %v11846_v42 = vpop.f32.mrf.mxu0 }
  0xf3   : > { %v11848_v14 = vpop.f32.mrf.mxu1 }
  0xf4   : > { %14733 = vst [vmem:[#allocation12_spill] sm:$0xff] %v11848_v14  ;;  %v11854_v1 = vpop.f32.mrf.mxu0  ;;  %9945 = vmatmul.mubr.msk.f32.gmra.mxu0 %vm344_vm1, %v11673_v8 }
  0xf5   : > { %v11856_v60 = vpop.f32.mrf.mxu1  ;;  %9895 = vmatmul.mubr.msk.f32.gmra.mxu1 %vm344_vm1, %v14736_v49  ;;  %9947 = vmatprep.mubr.msk.f32.mxu0 %vm344_vm1, %v8468_v9 }
  0xf6   : > { %14735 = vst [vmem:[#allocation14_spill] sm:$0xff] %v11856_v60  ;;  %9897 = vmatprep.mubr.msk.f32.mxu1 %vm344_vm1, %v11851_v39  ;;  %v11869_v50 = vpop.f32.mrf.mxu0 }
  0xf7   : > { %v11871_v14 = vpop.f32.mrf.mxu1 }
  0xf8   : > { %14738 = vst [vmem:[#allocation16_spill] sm:$0xff] %v11871_v14  ;;  %v11873_v11 = vpop.f32.mrf.mxu0  ;;  %9948 = vmatmul.mubr.msk.f32.gmra.mxu0 %vm344_vm1, %v8469_v4 }
  0xf9   : > { %v11875_v60 = vpop.f32.mrf.mxu1  ;;  %9898 = vmatmul.mubr.msk.f32.gmra.mxu1 %vm344_vm1, %v11866_v46  ;;  %10002 = vmatprep.mubr.msk.f32.mxu0 %vm344_vm1, %v14702_v16 }
  0xfa   : > { %14739 = vst [vmem:[#allocation17_spill] sm:$0xff] %v11875_v60  ;;  %9952 = vmatprep.mubr.msk.f32.mxu1 %vm344_vm1, %v11071_v13  ;;  %v11884_v8 = vpop.f32.mrf.mxu0 }
  0xfb   : > { %v11886_v49 = vpop.f32.mrf.mxu1 }
  0xfc   : > { %14740 = vst [vmem:[#allocation18_spill] sm:$0xff] %v11886_v49  ;;  %v9704_v14 = vpop.f32.mrf.mxu0  ;;  %10003 = vmatmul.mubr.msk.f32.vlgmr.msra.gmra.mxu0 %vm344_vm1, %v14703_v18 }
  0xfd   : > { %v9654_v9 = vpop.f32.mrf.mxu1  ;;  %9953 = vmatmul.mubr.msk.f32.vlgmr.msra.gmra.mxu1 %vm344_vm1, %v11089_v15  ;;  %10005 = vmatprep.mubr.msk.f32.mxu0 %vm344_vm1, %v14704_v20 }
  0xfe   : > { %v841_v4 = vadd.f32 %v9654_v9, %v11754_v41  ;;  %9955 = vmatprep.mubr.msk.f32.mxu1 %vm344_vm1, %v11095_v17  ;;  %v1193_v16 = vpop.f32.mrf.mxu0  ;;  %v8514_v9 = vld [vmem:[%s11026_s23 + $0xa9] sm:$0xff] }
  0xff   : > { %v835_v13 = vpop.f32.mrf.mxu1 }
 0x100   : > { %v11897_v60 = vadd.f32 %v9704_v14, %v841_v4  ;;  %v836_v49 = vadd.f32 %v835_v13, %v11766_v47  ;;  %v9707_v39 = vpop.f32.mrf.mxu0  ;;  %10006 = vmatmul.mubr.msk.f32.gmra.mxu0 %vm344_vm1, %v14705_v22 }
 0x101   : > { %v9657_v46 = vpop.f32.mrf.mxu1  ;;  %9956 = vmatmul.mubr.msk.f32.gmra.mxu1 %vm344_vm1, %v11109_v19  ;;  %10008 = vmatprep.mubr.msk.f32.mxu0 %vm344_vm1, %v14706_v24 }
 0x102   : > { %v11904_v15 = vadd.f32 %v1193_v16, %v836_v49  ;;  %v851_v17 = vadd.f32 %v9657_v46, %v11770_v51  ;;  %9958 = vmatprep.mubr.msk.f32.mxu1 %vm344_vm1, %v11115_v21  ;;  %v1203_v20 = vpop.f32.mrf.mxu0  ;;  %v8515_v16 = vld [vmem:[%s11026_s23 + $0xb1] sm:$0xff] }
 0x103   : > { %v845_v18 = vpop.f32.mrf.mxu1 }
 0x104   : > { %v11911_v41 = vadd.f32 %v9707_v39, %v851_v17  ;;  %v846_v19 = vadd.f32 %v845_v18, %v11782_v59  ;;  %v9710_v14 = vpop.f32.mrf.mxu0  ;;  %10009 = vmatmul.mubr.msk.f32.gmra.mxu0 %vm344_vm1, %v14707_v26  ;;  %v8512_v59 = vld [vmem:[%s11026_s23 + $0x91] sm:$0xff]  ;;  %v8516_v18 = vld [vmem:[%s11026_s23 + $0xc1] sm:$0xff] }
 0x105   : > { %v9660_v47 = vpop.f32.mrf.mxu1  ;;  %9959 = vmatmul.mubr.msk.f32.gmra.mxu1 %vm344_vm1, %v11129_v23  ;;  %10011 = vmatprep.mubr.msk.f32.mxu0 %vm344_vm1, %v14708_v28 }
 0x106   : > { %v11918_v22 = vadd.f32 %v1203_v20, %v846_v19  ;;  %v861_v21 = vadd.f32 %v9660_v47, %v11786_v61  ;;  %9961 = vmatprep.mubr.msk.f32.mxu1 %vm344_vm1, %v11135_v25  ;;  %v1213_v51 = vpop.f32.mrf.mxu0  ;;  %v8513_v61 = vld [vmem:[%s11026_s23 + $0x99] sm:$0xff] }
 0x107   : > { %v855_v24 = vpop.f32.mrf.mxu1 }
 0x108   : > { %v11926_v39 = vadd.f32 %v9710_v14, %v861_v21  ;;  %v856_v23 = vadd.f32 %v855_v24, %v11798_v56  ;;  %v9713_v46 = vpop.f32.mrf.mxu0  ;;  %10012 = vmatmul.mubr.msk.f32.gmra.mxu0 %vm344_vm1, %v14709_v29  ;;  %v8517_v14 = vld [vmem:[%s11026_s23 + $0xc9] sm:$0xff]  ;;  %v8518_v24 = vld [vmem:[%s11026_s23 + $0xd9] sm:$0xff] }
 0x109   : > { %v9663_v26 = vpop.f32.mrf.mxu1  ;;  %9962 = vmatmul.mubr.msk.f32.gmra.mxu1 %vm344_vm1, %v11149_v27  ;;  %10014 = vmatprep.mubr.msk.f32.mxu0 %vm344_vm1, %v14710_v30 }
 0x10a   : > { %v11933_v25 = vadd.f32 %v1213_v51, %v856_v23  ;;  %v871_v28 = vadd.f32 %v9663_v26, %v11802_v2  ;;  %9964 = vmatprep.mubr.msk.f32.mxu1 %vm344_vm1, %v8512_v59  ;;  %v1223_v49 = vpop.f32.mrf.mxu0  ;;  %v8519_v26 = vld [vmem:[%s11026_s23 + $0xe1] sm:$0xff] }
 0x10b   : > { %v865_v56 = vpop.f32.mrf.mxu1 }
 0x10c   : > { %v11941_v4 = vadd.f32 %v9713_v46, %v871_v28  ;;  %v866_v27 = vadd.f32 %v865_v56, %v11814_v52  ;;  %v9716_v13 = vpop.f32.mrf.mxu0  ;;  %10015 = vmatmul.mubr.msk.f32.gmra.mxu0 %vm344_vm1, %v14711_v31  ;;  %v8520_v28 = vld [vmem:[%s11026_s23 + $0xf1] sm:$0xff] }
 0x10d   : > { %v9666_v29 = vpop.f32.mrf.mxu1  ;;  %9965 = vmatmul.mubr.msk.f32.gmra.mxu1 %vm344_vm1, %v8513_v61  ;;  %10017 = vmatprep.mubr.msk.f32.mxu0 %vm344_vm1, %v14712_v32 }
 0x10e   : > { %v11947_v2 = vadd.f32 %v1223_v49, %v866_v27  ;;  %v881_v30 = vadd.f32 %v9666_v29, %v11818_v10  ;;  %9967 = vmatprep.mubr.msk.f32.mxu1 %vm344_vm1, %v8514_v9  ;;  %v1233_v52 = vpop.f32.mrf.mxu0  ;;  %v8521_v9 = vld [vmem:[%s11026_s23 + $0xf9] sm:$0xff]  ;;  %v8522_v29 = vld [vmem:[%s11026_s23 + $0x109] sm:$0xff] }
 0x10f   : > { %v875_v17 = vpop.f32.mrf.mxu1 }
 0x110   : > { %v11955_v20 = vadd.f32 %v9716_v13, %v881_v30  ;;  %v876_v19 = vadd.f32 %v875_v17, %v11830_v48  ;;  %v9719_v47 = vpop.f32.mrf.mxu0  ;;  %10018 = vmatmul.mubr.msk.f32.gmra.mxu0 %vm344_vm1, %v14713_v33  ;;  %v8523_v17 = vld [vmem:[%s11026_s23 + $0x111] sm:$0xff] }
 0x111   : > { %v9669_v31 = vpop.f32.mrf.mxu1  ;;  %9968 = vmatmul.mubr.msk.f32.gmra.mxu1 %vm344_vm1, %v8515_v16  ;;  %10020 = vmatprep.mubr.msk.f32.mxu0 %vm344_vm1, %v14714_v34 }
 0x112   : > { %v11961_v10 = vadd.f32 %v1233_v52, %v876_v19  ;;  %v891_v32 = vadd.f32 %v9669_v31, %v11834_v7  ;;  %9970 = vmatprep.mubr.msk.f32.mxu1 %vm344_vm1, %v8516_v18  ;;  %v1243_v48 = vpop.f32.mrf.mxu0  ;;  %v8524_v18 = vld [vmem:[%s11026_s23 + $0x121] sm:$0xff] }
 0x113   : > { %v885_v21 = vpop.f32.mrf.mxu1 }
 0x114   : > { %v11969_v51 = vadd.f32 %v9719_v47, %v891_v32  ;;  %v886_v59 = vadd.f32 %v885_v21, %v11846_v42  ;;  %v9722_v23 = vpop.f32.mrf.mxu0  ;;  %10021 = vmatmul.mubr.msk.f32.gmra.mxu0 %vm344_vm1, %v14715_v35 }
 0x115   : > { %v9672_v33 = vpop.f32.mrf.mxu1  ;;  %9971 = vmatmul.mubr.msk.f32.gmra.mxu1 %vm344_vm1, %v8517_v14  ;;  %10023 = vmatprep.mubr.msk.f32.mxu0 %vm344_vm1, %v14716_v36  ;;  %v8526_v14 = vld [vmem:[%s11026_s23 + $0x139] sm:$0xff] }
 0x116   : > { %v11975_v7 = vadd.f32 %v1243_v48, %v886_v59  ;;  %v901_v34 = vadd.f32 %v9672_v33, %v11854_v1  ;;  %9973 = vmatprep.mubr.msk.f32.mxu1 %vm344_vm1, %v8518_v24  ;;  %v1253_v42 = vpop.f32.mrf.mxu0  ;;  %v8528_v33 = vld [vmem:[%s11026_s23 + $0x151] sm:$0xff] }
 0x117   : > { %v895_v46 = vpop.f32.mrf.mxu1 }
 0x118   : > { %v11983_v61 = vadd.f32 %v9722_v23, %v901_v34  ;;  %v896_v56 = vadd.f32 %v895_v46, %v11869_v50  ;;  %v9725_v49 = vpop.f32.mrf.mxu0  ;;  %10024 = vmatmul.mubr.msk.f32.gmra.mxu0 %vm344_vm1, %v14717_v44 }
 0x119   : > { %v9675_v35 = vpop.f32.mrf.mxu1  ;;  %9974 = vmatmul.mubr.msk.f32.gmra.mxu1 %vm344_vm1, %v8519_v26  ;;  %10026 = vmatprep.mubr.msk.f32.mxu0 %vm344_vm1, %v14718_v45 }
 0x11a   : > { %v11989_v1 = vadd.f32 %v1253_v42, %v896_v56  ;;  %v911_v36 = vadd.f32 %v9675_v35, %v11873_v11  ;;  %9976 = vmatprep.mubr.msk.f32.mxu1 %vm344_vm1, %v8520_v28  ;;  %v1263_v50 = vpop.f32.mrf.mxu0  ;;  %v8530_v42 = vld [vmem:[%s11026_s23 + $0x169] sm:$0xff] }
 0x11b   : > { %v905_v27 = vpop.f32.mrf.mxu1  ;;  %v8596_v28 = vld [vmem:[%s11026_s23 + $0x16a] sm:$0xff] }
 0x11c   : > { %v11997_v13 = vadd.f32 %v9725_v49, %v911_v36  ;;  %v906_v30 = vadd.f32 %v905_v27, %v11884_v8  ;;  %v9728_v16 = vpop.f32.mrf.mxu0  ;;  %10027 = vmatmul.mubr.msk.f32.gmra.mxu0 %vm344_vm1, %v14720_v55  ;;  %v8597_v49 = vld [vmem:[%s11026_s23 + $0x172] sm:$0xff] }
 0x11d   : > { %v9678_v44 = vpop.f32.mrf.mxu1  ;;  %9977 = vmatmul.mubr.msk.f32.gmra.mxu1 %vm344_vm1, %v8521_v9  ;;  %10029 = vmatprep.mubr.msk.f32.mxu0 %vm344_vm1, %v14721_v57  ;;  %v8525_v57 = vld [vmem:[%s11026_s23 + $0x129] sm:$0xff] }
 0x11e   : > { %v12003_v11 = vadd.f32 %v1263_v50, %v906_v30  ;;  %v921_v45 = vadd.f32 %v9678_v44, %v11756_v43  ;;  %9979 = vmatprep.mubr.msk.f32.mxu1 %vm344_vm1, %v8522_v29  ;;  %v12012_v52 = vpop.f32.mrf.mxu0  ;;  %v14741_v30 = vld [vmem:[#allocation13_spill] sm:$0xff] }
 0x11f   : > { %v12010_v8 = vpop.f32.mrf.mxu1 }
 0x120   : > { %v12015_v19 = vadd.f32 %v9728_v16, %v921_v45  ;;  %v9731_v31 = vpop.f32.mrf.mxu0  ;;  %10030 = vmatmul.mubr.msk.f32.gmra.mxu0 %vm344_vm1, %v14723_v0  ;;  %v8527_v0 = vld [vmem:[%s11026_s23 + $0x141] sm:$0xff]  ;;  %v8534_v45 = vld [vmem:[%s11026_s23 + $0x199] sm:$0xff] }
 0x121   : > { %v9681_v55 = vpop.f32.mrf.mxu1  ;;  %9980 = vmatmul.mubr.msk.f32.gmra.mxu1 %vm344_vm1, %v8523_v17  ;;  %10032 = vmatprep.mubr.msk.f32.mxu0 %vm344_vm1, %v14724_v62  ;;  %v8600_v17 = vld [vmem:[%s11026_s23 + $0x19a] sm:$0xff] }
 0x122   : > { %v931_v43 = vadd.f32 %v9681_v55, %v11772_v53  ;;  %9982 = vmatprep.mubr.msk.f32.mxu1 %vm344_vm1, %v8524_v18  ;;  %v12027_v32 = vpop.f32.mrf.mxu0 }
 0x123   : > { %v12025_v47 = vpop.f32.mrf.mxu1 }
 0x124   : > { %v12030_v21 = vadd.f32 %v9731_v31, %v931_v43  ;;  %v9734_v24 = vpop.f32.mrf.mxu0  ;;  %10033 = vmatmul.mubr.msk.f32.gmra.mxu0 %vm344_vm1, %v14726_v5  ;;  %v14742_v31 = vld [vmem:[#allocation6_spill] sm:$0xff] }
 0x125   : > { %v9684_v48 = vpop.f32.mrf.mxu1  ;;  %9983 = vmatmul.mubr.msk.f32.gmra.mxu1 %vm344_vm1, %v8525_v57  ;;  %10035 = vmatprep.mubr.msk.f32.mxu0 %vm344_vm1, %v14727_v58  ;;  %v8529_v58 = vld [vmem:[%s11026_s23 + $0x159] sm:$0xff]  ;;  %v14744_v43 = vld [vmem:[#allocation14_spill] sm:$0xff] }
 0x126   : > { %v941_v53 = vadd.f32 %v9684_v48, %v11788_v63  ;;  %9985 = vmatprep.mubr.msk.f32.mxu1 %vm344_vm1, %v8526_v14  ;;  %v12042_v59 = vpop.f32.mrf.mxu0  ;;  %v8535_v14 = vld [vmem:[%s11026_s23 + $0x1a1] sm:$0xff] }
 0x127   : > { %v12040_v62 = vpop.f32.mrf.mxu1  ;;  %v8601_v48 = vld [vmem:[%s11026_s23 + $0x1a2] sm:$0xff] }
 0x128   : > { %v12045_v23 = vadd.f32 %v9734_v24, %v941_v53  ;;  %v9737_v5 = vpop.f32.mrf.mxu0  ;;  %10036 = vmatmul.mubr.msk.f32.gmra.mxu0 %vm344_vm1, %v14729_v38 }
 0x129   : > { %v9687_v34 = vpop.f32.mrf.mxu1  ;;  %9986 = vmatmul.mubr.msk.f32.gmra.mxu1 %vm344_vm1, %v8527_v0  ;;  %10038 = vmatprep.mubr.msk.f32.mxu0 %vm344_vm1, %v14730_v54  ;;  %v8531_v54 = vld [vmem:[%s11026_s23 + $0x171] sm:$0xff]  ;;  %s14450_s23 = scalar_lea.vmem [#allocation3], %s8137_s21 }
 0x12a   : > { %v951_v63 = vadd.f32 %v9687_v34, %v11804_v3  ;;  %9988 = vmatprep.mubr.msk.f32.mxu1 %vm344_vm1, %v8528_v33  ;;  %v12057_v46 = vpop.f32.mrf.mxu0  ;;  %s8071_s9 = sshll.u32 %s14450_s23, 4  ;;  %s14519_s9 = int_to_ptr.vmem [resolvable:$true] %s8071_s9 }
 0x12b   : > { %v12055_v26 = vpop.f32.mrf.mxu1  ;;  %s10852_s16 = scalar_lea.vmem %s14519_s9, 4096  ;;  %p10859_p0 = scmp.lt.s32.totalorder %s14519_s9, %s10857_s18 }
 0x12c   : > { %v12061_v56 = vadd.f32 %v9737_v5, %v951_v63  ;;  %v9740_v38 = vpop.f32.mrf.mxu0  ;;  %10039 = vmatmul.mubr.msk.f32.gmra.mxu0 %vm344_vm1, %v11498_v40  ;;  %v8637_v40 = vld [vmem:[%s14569_s3 + $0x8] sm:$0xff]  ;;  %p10853_p11 = scmp.ne.s32.totalorder %s14519_s9, %s10852_s16  ;;  %p10860_p1 = scmp.lt.s32.totalorder %s10858_s19, %s10852_s16 }
 0x12d   : > { %v9690_v35 = vpop.f32.mrf.mxu1  ;;  %9989 = vmatmul.mubr.msk.f32.gmra.mxu1 %vm344_vm1, %v8529_v58  ;;  %10041 = vmatprep.mubr.msk.f32.mxu0 %vm344_vm1, %v8596_v28  ;;  %v14745_v5 = vld [vmem:[#allocation17_spill] sm:$0xff] }
 0x12e   : > { %v961_v3 = vadd.f32 %v9690_v35, %v11820_v37  ;;  %9991 = vmatprep.mubr.msk.f32.mxu1 %vm344_vm1, %v8530_v42  ;;  %v12073_v9 = vpop.f32.mrf.mxu0  ;;  %10050 = vmatprep.subr.mxu1 %v8637_v40  ;;  %p10854_p12 = pnand %p10853_p11, %p10996_p5  ;;  %p10861_p2 = por %p10860_p1, %p10859_p0 }
 0x12f   : > { %v12071_v36 = vpop.f32.mrf.mxu1  ;;  %10051 = vmatpush3.msra.mxu1 %v8637_v40 }
 0x130   : > { %v12075_v27 = vadd.f32 %v9740_v38, %v961_v3  ;;  %v9743_v37 = vpop.f32.mrf.mxu0  ;;  %10042 = vmatmul.mubr.msk.f32.gmra.mxu0 %vm344_vm1, %v8597_v49  ;;  %p10855_p13 = pneg %p10854_p12 }
 0x131   : > { %v9693_v50 = vpop.f32.mrf.mxu1  ;;  %9992 = vmatmul.mubr.msk.f32.gmra.mxu1 %vm344_vm1, %v8531_v54  ;;  %10044 = vmatprep.mubr.msk.f32.mxu0 %vm344_vm1, %v14741_v30 }
 0x132   : > { %v971_v29 = vadd.f32 %v9693_v50, %v11836_v12  ;;  %9994 = vmatprep.mubr.msk.f32.mxu1 %vm344_vm1, %v11662_v6  ;;  %v12089_v16 = vpop.f32.mrf.mxu0  ;;  %v14743_v6 = vld [vmem:[#allocation15_spill] sm:$0xff]  ;;  %p10862_p3 = pnand %p10861_p2, %p10855_p13 }
 0x133   : > { %v12087_v44 = vpop.f32.mrf.mxu1 }
 0x134   : > { %v12093_v18 = vadd.f32 %v9743_v37, %v971_v29  ;;  %v9746_v12 = vpop.f32.mrf.mxu0  ;;  %10045 = vmatmul.mubr.msk.f32.gmra.mxu0 %vm344_vm1, %v14743_v6 }
 0x135   : > { %v9696_v55 = vpop.f32.mrf.mxu1  ;;  %9995 = vmatmul.mubr.msk.f32.gmra.mxu1 %vm344_vm1, %v14742_v31  ;;  %10047 = vmatprep.mubr.msk.f32.mxu0 %vm344_vm1, %v8600_v17 }
 0x136   : > { %v981_v57 = vadd.f32 %v9696_v55, %v14744_v43  ;;  %9997 = vmatprep.mubr.msk.f32.mxu1 %vm344_vm1, %v8534_v45  ;;  %v12106_v53 = vpop.f32.mrf.mxu0 }
 0x137   : > { %v12104_v24 = vpop.f32.mrf.mxu1 }
 0x138   : > { %v12108_v0 = vadd.f32 %v9746_v12, %v981_v57  ;;  %v9749_v34 = vpop.f32.mrf.mxu0  ;;  %10048 = vmatmul.mubr.msk.f32.gmra.mxu0 %vm344_vm1, %v8601_v48 }
 0x139   : > { %v9699_v33 = vpop.f32.mrf.mxu1  ;;  %9998 = vmatmul.mubr.msk.f32.gmra.mxu1 %vm344_vm1, %v8535_v14 }
 0x13a   : > { %v991_v63 = vadd.f32 %v9699_v33, %v14745_v5  ;;  %v12115_v42 = vpop.f32.mrf.mxu0 }
 0x13b   : > { %v12113_v58 = vpop.f32.mrf.mxu1 }
 0x13c   : > { %v12117_v28 = vadd.f32 %v9749_v34, %v991_v63  ;;  %v9804_v38 = vpop.f32.mrf.mxu0 }
 0x13d   : > { %v9754_v35 = vpop.f32.mrf.mxu1 }
 0x13e   : > { %v1744_v3 = vadd.f32 %v9754_v35, %v11897_v60  ;;  %v12122_v49 = vpop.f32.mrf.mxu0 }
 0x13f   : > { %v12120_v54 = vpop.f32.mrf.mxu1 }
 0x140   : > { %v12124_v40 = vadd.f32 %v9804_v38, %v1744_v3  ;;  %v9807_v37 = vpop.f32.mrf.mxu0 }
 0x141   : > { %v9757_v50 = vpop.f32.mrf.mxu1 }
 0x142   : > { %14746 = vst [vmem:[#allocation19_spill] sm:$0xff] %v12124_v40  ;;  %v1746_v29 = vadd.f32 %v9757_v50, %v11911_v41  ;;  %v12129_v45 = vpop.f32.mrf.mxu0 }
 0x143   : > { %v12127_v30 = vpop.f32.mrf.mxu1 }
 0x144   : > { %v12131_v17 = vadd.f32 %v9807_v37, %v1746_v29  ;;  %v9810_v12 = vpop.f32.mrf.mxu0 }
 0x145   : > { %v9760_v55 = vpop.f32.mrf.mxu1 }
 0x146   : > { %14747 = vst [vmem:[#allocation20_spill] sm:$0xff] %v12131_v17  ;;  %v1748_v60 = vadd.f32 %v9760_v55, %v11926_v39  ;;  %v12136_v6 = vpop.f32.mrf.mxu0 }
 0x147   : > { %v12134_v31 = vpop.f32.mrf.mxu1 }
 0x148   : > { %v12138_v43 = vadd.f32 %v9810_v12, %v1748_v60  ;;  %v9813_v14 = vpop.f32.mrf.mxu0 }
 0x149   : > { %v9763_v57 = vpop.f32.mrf.mxu1 }
 0x14a   : > { %14748 = vst [vmem:[#allocation21_spill] sm:$0xff] %v12138_v43  ;;  %v1750_v41 = vadd.f32 %v9763_v57, %v11941_v4  ;;  %v12143_v33 = vpop.f32.mrf.mxu0 }
 0x14b   : > { %v12141_v48 = vpop.f32.mrf.mxu1 }
 0x14c   : > { %v12145_v34 = vadd.f32 %v9813_v14, %v1750_v41  ;;  %v9816_v63 = vpop.f32.mrf.mxu0 }
 0x14d   : > { %v9766_v5 = vpop.f32.mrf.mxu1 }
 0x14e   : > { %14749 = vst [vmem:[#allocation22_spill] sm:$0xff] %v12145_v34  ;;  %v1752_v39 = vadd.f32 %v9766_v5, %v11955_v20  ;;  %v12150_v38 = vpop.f32.mrf.mxu0 }
 0x14f   : > { %v12148_v35 = vpop.f32.mrf.mxu1 }
 0x150   : > { %v12152_v3 = vadd.f32 %v9816_v63, %v1752_v39  ;;  %v9819_v37 = vpop.f32.mrf.mxu0 }
 0x151   : > { %v9769_v50 = vpop.f32.mrf.mxu1 }
 0x152   : > { %14750 = vst [vmem:[#allocation23_spill] sm:$0xff] %v12152_v3  ;;  %v1754_v4 = vadd.f32 %v9769_v50, %v11969_v51  ;;  %v12157_v55 = vpop.f32.mrf.mxu0 }
 0x153   : > { %v12155_v29 = vpop.f32.mrf.mxu1 }
 0x154   : > { %v12159_v12 = vadd.f32 %v9819_v37, %v1754_v4  ;;  %v9822_v57 = vpop.f32.mrf.mxu0 }
 0x155   : > { %v9772_v60 = vpop.f32.mrf.mxu1 }
 0x156   : > { %14751 = vst [vmem:[#allocation24_spill] sm:$0xff] %v12159_v12  ;;  %v1756_v20 = vadd.f32 %v9772_v60, %v11983_v61  ;;  %v12164_v41 = vpop.f32.mrf.mxu0 }
 0x157   : > { %v12162_v14 = vpop.f32.mrf.mxu1 }
 0x158   : > { %v12166_v5 = vadd.f32 %v9822_v57, %v1756_v20  ;;  %v9825_v39 = vpop.f32.mrf.mxu0 }
 0x159   : > { %v9775_v63 = vpop.f32.mrf.mxu1 }
 0x15a   : > { %14752 = vst [vmem:[#allocation25_spill] sm:$0xff] %v12166_v5  ;;  %v1758_v51 = vadd.f32 %v9775_v63, %v11997_v13  ;;  %v12171_v3 = vpop.f32.mrf.mxu0 }
 0x15b   : > { %v12169_v50 = vpop.f32.mrf.mxu1 }
 0x15c   : > { %v12173_v37 = vadd.f32 %v9825_v39, %v1758_v51  ;;  %v9828_v12 = vpop.f32.mrf.mxu0  ;;  %v10914_v51 = vmov 0.0  }
 0x15d   : > { %v9778_v4 = vpop.f32.mrf.mxu1  ;;  %3963 = vst.msk [vmem:[#allocation2 + $0x20] sm:$0xff] %vm3957_vm2, %v10914_v51  ;;  %3958 = vst.msk [vmem:[#allocation2] sm:$0xff] %vm3957_vm2, %v10914_v51 }
 0x15e   : > { %14753 = vst [vmem:[#allocation26_spill] sm:$0xff] %v12173_v37  ;;  %v1760_v61 = vadd.f32 %v9778_v4, %v12015_v19  ;;  %v12178_v34 = vpop.f32.mrf.mxu0  ;;  %3959 = vst.msk [vmem:[#allocation2 + $0x8] sm:$0xff] %vm3957_vm2, %v10914_v51 }
 0x15f   : > { %v12176_v60 = vpop.f32.mrf.mxu1  ;;  %14754 = vst [vmem:[#allocation27_spill] sm:$0xff] %v12178_v34  ;;  %3962 = vst.msk [vmem:[#allocation2 + $0x18] sm:$0xff] %vm3957_vm2, %v10914_v51  ;;  %v14819_v34 = vld [vmem:[#allocation12_spill] sm:$0xff] }
 0x160   : > { %v12180_v57 = vadd.f32 %v9828_v12, %v1760_v61  ;;  %v9831_v5 = vpop.f32.mrf.mxu0  ;;  %3965 = vst.msk [vmem:[#allocation2 + $0x30] sm:$0xff] %vm3957_vm2, %v10914_v51  ;;  %3966 = vst.msk [vmem:[#allocation2 + $0x38] sm:$0xff] %vm3957_vm2, %v10914_v51 }
 0x161   : > { %v9781_v20 = vpop.f32.mrf.mxu1  ;;  %3968 = vst.msk [vmem:[#allocation2 + $0x48] sm:$0xff] %vm3957_vm2, %v10914_v51  ;;  %3969 = vst.msk [vmem:[#allocation2 + $0x50] sm:$0xff] %vm3957_vm2, %v10914_v51 }
 0x162   : > { %14755 = vst [vmem:[#allocation28_spill] sm:$0xff] %v12180_v57  ;;  %v1762_v13 = vadd.f32 %v9781_v20, %v12030_v21  ;;  %v12185_v43 = vpop.f32.mrf.mxu0  ;;  %3971 = vst.msk [vmem:[#allocation2 + $0x60] sm:$0xff] %vm3957_vm2, %v10914_v51 }
 0x163   : > { %v12183_v63 = vpop.f32.mrf.mxu1  ;;  %14756 = vst [vmem:[#allocation29_spill] sm:$0xff] %v12185_v43  ;;  %3972 = vst.msk [vmem:[#allocation2 + $0x68] sm:$0xff] %vm3957_vm2, %v10914_v51 }
 0x164   : > { %v12187_v39 = vadd.f32 %v9831_v5, %v1762_v13  ;;  %3974 = vst.msk [vmem:[#allocation2 + $0x78] sm:$0xff] %vm3957_vm2, %v10914_v51  ;;  %3975 = vst.msk [vmem:[#allocation2 + $0x80] sm:$0xff] %vm3957_vm2, %v10914_v51  ;;  %v9834_v21 = vpop.f32.mrf.mxu0 }
 0x165   : > { %3977 = vst.msk [vmem:[#allocation2 + $0x90] sm:$0xff] %vm3957_vm2, %v10914_v51  ;;  %3978 = vst.msk [vmem:[#allocation2 + $0x98] sm:$0xff] %vm3957_vm2, %v10914_v51  ;;  %v9784_v19 = vpop.f32.mrf.mxu1 }
 0x166   : > { %14757 = vst [vmem:[#allocation30_spill] sm:$0xff] %v12187_v39  ;;  %3980 = vst.msk [vmem:[#allocation2 + $0xa8] sm:$0xff] %vm3957_vm2, %v10914_v51  ;;  %v1764_v12 = vadd.f32 %v9784_v19, %v12045_v23  ;;  %v12246_v4 = vpop.f32.mrf.mxu0 }
 0x167   : > { %3981 = vst.msk [vmem:[#allocation2 + $0xb0] sm:$0xff] %vm3957_vm2, %v10914_v51  ;;  %3983 = vst.msk [vmem:[#allocation2 + $0xc0] sm:$0xff] %vm3957_vm2, %v10914_v51  ;;  %v12244_v5 = vpop.f32.mrf.mxu1 }
 0x168   : > { %3984 = vst.msk [vmem:[#allocation2 + $0xc8] sm:$0xff] %vm3957_vm2, %v10914_v51  ;;  %3986 = vst.msk [vmem:[#allocation2 + $0xd8] sm:$0xff] %vm3957_vm2, %v10914_v51  ;;  %v12248_v61 = vadd.f32 %v9834_v21, %v1764_v12  ;;  %v9837_v13 = vpop.f32.mrf.mxu0  ;;  %v4078_v21 = vld [vmem:[%s14569_s3] sm:$0xff] }
 0x169   : > { %3987 = vst.msk [vmem:[#allocation2 + $0xe0] sm:$0xff] %vm3957_vm2, %v10914_v51  ;;  %3989 = vst.msk [vmem:[#allocation2 + $0xf0] sm:$0xff] %vm3957_vm2, %v10914_v51  ;;  %v9787_v20 = vpop.f32.mrf.mxu1  ;;  %10100 = vmatprep.subr.mxu0 %v4078_v21 }
 0x16a   : > { %3990 = vst.msk [vmem:[#allocation2 + $0xf8] sm:$0xff] %vm3957_vm2, %v10914_v51  ;;  %3992 = vst.msk [vmem:[#allocation2 + $0x108] sm:$0xff] %vm3957_vm2, %v10914_v51  ;;  %v1766_v39 = vadd.f32 %v9787_v20, %v12061_v56  ;;  %v12253_v37 = vpop.f32.mrf.mxu0  ;;  %v4079_v56 = vld [vmem:[#allocation2 + $0x1] sm:$0xff]  ;;  %10101 = vmatpush3.msra.mxu0 %v4078_v21 }
 0x16b   : > { %3993 = vst.msk [vmem:[#allocation2 + $0x110] sm:$0xff] %vm3957_vm2, %v10914_v51  ;;  %3995 = vst.msk [vmem:[#allocation2 + $0x120] sm:$0xff] %vm3957_vm2, %v10914_v51  ;;  %v12251_v57 = vpop.f32.mrf.mxu1  ;;  %v4046_v20 = vld [vmem:[#allocation2] sm:$0xff]  ;;  %10052 = vmatprep.mubr.msk.f32.mxu1 %vm3957_vm2, %v4079_v56 }
 0x16c   : > { %3996 = vst.msk [vmem:[#allocation2 + $0x128] sm:$0xff] %vm3957_vm2, %v10914_v51  ;;  %3998 = vst.msk [vmem:[#allocation2 + $0x138] sm:$0xff] %vm3957_vm2, %v10914_v51  ;;  %v12255_v17 = vadd.f32 %v9837_v13, %v1766_v39  ;;  %10102 = vmatprep.mubr.msk.f32.mxu0 %vm3957_vm2, %v4046_v20 }
 0x16d   : > { %3999 = vst.msk [vmem:[#allocation2 + $0x140] sm:$0xff] %vm3957_vm2, %v10914_v51  ;;  %4001 = vst.msk [vmem:[#allocation2 + $0x150] sm:$0xff] %vm3957_vm2, %v10914_v51  ;;  %v9790_v40 = vpop.f32.mrf.mxu1 }
 0x16e   : > { %4002 = vst.msk [vmem:[#allocation2 + $0x158] sm:$0xff] %vm3957_vm2, %v10914_v51  ;;  %4004 = vst.msk [vmem:[#allocation2 + $0x168] sm:$0xff] %vm3957_vm2, %v10914_v51  ;;  %v1768_v23 = vadd.f32 %v9790_v40, %v12075_v27  ;;  %v4047_v27 = vld [vmem:[#allocation2 + $0x8] sm:$0xff] }
 0x16f   : > { %4005 = vst.msk [vmem:[#allocation2 + $0x170] sm:$0xff] %vm3957_vm2, %v10914_v51  ;;  %4007 = vst.msk [vmem:[#allocation2 + $0x180] sm:$0xff] %vm3957_vm2, %v10914_v51  ;;  %v12258_v19 = vpop.f32.mrf.mxu1  ;;  %10103 = vmatmul.mubr.msk.f32.vlgmr.msra.gmra.mxu0 %vm3957_vm2, %v4047_v27 }
 0x170   : > { %4008 = vst.msk [vmem:[#allocation2 + $0x188] sm:$0xff] %vm3957_vm2, %v10914_v51  ;;  %4010 = vst.msk [vmem:[#allocation2 + $0x198] sm:$0xff] %vm3957_vm2, %v10914_v51 }
 0x171   : > { %4011 = vst.msk [vmem:[#allocation2 + $0x1a0] sm:$0xff] %vm3957_vm2, %v10914_v51  ;;  %14758 = vst [vmem:[#allocation31_spill] sm:$0xff] %v12246_v4 }
 0x172   : > { %3964 = vst.msk [vmem:[#allocation2 + $0x28] sm:$0x3] %vm3960_vm3, %v10914_v51  ;;  %3961 = vst.msk [vmem:[#allocation2 + $0x10] sm:$0x3] %vm3960_vm3, %v10914_v51 }
 0x173   : > { %3967 = vst.msk [vmem:[#allocation2 + $0x40] sm:$0x3] %vm3960_vm3, %v10914_v51  ;;  %3970 = vst.msk [vmem:[#allocation2 + $0x58] sm:$0x3] %vm3960_vm3, %v10914_v51 }
 0x174   : > { %3973 = vst.msk [vmem:[#allocation2 + $0x70] sm:$0x3] %vm3960_vm3, %v10914_v51  ;;  %3976 = vst.msk [vmem:[#allocation2 + $0x88] sm:$0x3] %vm3960_vm3, %v10914_v51 }
 0x175   : > { %3979 = vst.msk [vmem:[#allocation2 + $0xa0] sm:$0x3] %vm3960_vm3, %v10914_v51  ;;  %3982 = vst.msk [vmem:[#allocation2 + $0xb8] sm:$0x3] %vm3960_vm3, %v10914_v51 }
 0x176   : > { %3985 = vst.msk [vmem:[#allocation2 + $0xd0] sm:$0x3] %vm3960_vm3, %v10914_v51  ;;  %3988 = vst.msk [vmem:[#allocation2 + $0xe8] sm:$0x3] %vm3960_vm3, %v10914_v51 }
 0x177   : > { %3991 = vst.msk [vmem:[#allocation2 + $0x100] sm:$0x3] %vm3960_vm3, %v10914_v51  ;;  %3994 = vst.msk [vmem:[#allocation2 + $0x118] sm:$0x3] %vm3960_vm3, %v10914_v51 }
 0x178   : > { %3997 = vst.msk [vmem:[#allocation2 + $0x130] sm:$0x3] %vm3960_vm3, %v10914_v51  ;;  %4000 = vst.msk [vmem:[#allocation2 + $0x148] sm:$0x3] %vm3960_vm3, %v10914_v51 }
 0x179   : > { %4003 = vst.msk [vmem:[#allocation2 + $0x160] sm:$0x3] %vm3960_vm3, %v10914_v51  ;;  %4006 = vst.msk [vmem:[#allocation2 + $0x178] sm:$0x3] %vm3960_vm3, %v10914_v51  ;;  %v4080_v13 = vld [vmem:[#allocation2 + $0x9] sm:$0xff] }
 0x17a   : > { %4009 = vst.msk [vmem:[#allocation2 + $0x190] sm:$0x3] %vm3960_vm3, %v10914_v51  ;;  %4012 = vst.msk [vmem:[#allocation2 + $0x1a8] sm:$0x3] %vm3960_vm3, %v10914_v51  ;;  %v9840_v51 = vpop.f32.mrf.mxu0  ;;  %10053 = vmatmul.mubr.msk.f32.vlgmr.msra.gmra.mxu1 %vm3957_vm2, %v4080_v13 }
 0x17b   : > { %14759 = vst [vmem:[#allocation32_spill] sm:$0xff] %v12248_v61  ;;  %14760 = vst [vmem:[#allocation33_spill] sm:$0xff] %v12253_v37  ;;  %v12265_v12 = vadd.f32 %v9840_v51, %v1768_v23  ;;  %v9793_v61 = vpop.f32.mrf.mxu1 }
 0x17c   : > { %14761 = vst [vmem:[#allocation34_spill] sm:$0xff] %v12258_v19  ;;  %v12260_v43 = vpop.f32.mrf.mxu0  ;;  %v1770_v40 = vadd.f32 %v9793_v61, %v12093_v18 }
 0x17d   : > { %14762 = vst [vmem:[#allocation35_spill] sm:$0xff] %v12260_v43  ;;  %v12271_v43 = vpop.f32.mrf.mxu1 }
 0x17e   : > { %v9843_v39 = vpop.f32.mrf.mxu0  ;;  %14763 = vst [vmem:[#allocation13_spill] sm:$0xff] %v12271_v43 }
 0x17f   : > { %v12276_v23 = vadd.f32 %v9843_v39, %v1770_v40  ;;  %v9796_v37 = vpop.f32.mrf.mxu1 }
 0x180   : > { %v12273_v51 = vpop.f32.mrf.mxu0  ;;  %v1772_v21 = vadd.f32 %v9796_v37, %v12108_v0 }
 0x181   : > { %14764 = vst [vmem:[#allocation6_spill] sm:$0xff] %v12273_v51  ;;  %v12279_v56 = vpop.f32.mrf.mxu1 }
 0x182   : > { %v9846_v4 = vpop.f32.mrf.mxu0  ;;  %14765 = vst [vmem:[#allocation15_spill] sm:$0xff] %v12279_v56 }
 0x183   : > { %v12283_v18 = vadd.f32 %v9846_v4, %v1772_v21  ;;  %v9799_v61 = vpop.f32.mrf.mxu1 }
 0x184   : > { %v12281_v19 = vpop.f32.mrf.mxu0  ;;  %v1774_v13 = vadd.f32 %v9799_v61, %v12117_v28 }
 0x185   : > { %14766 = vst [vmem:[#allocation14_spill] sm:$0xff] %v12281_v19  ;;  %v12286_v43 = vpop.f32.mrf.mxu1 }
 0x186   : > { %v9849_v20 = vpop.f32.mrf.mxu0  ;;  %14767 = vst [vmem:[#allocation17_spill] sm:$0xff] %v12286_v43  ;;  %v14816_v43 = vld [vmem:[#allocation9_spill] sm:$0xff] }
 0x187   : > { %v12290_v39 = vadd.f32 %v9849_v20, %v1774_v13  ;;  %v12292_v27 = vpop.f32.mrf.mxu1 }
 0x188   : > { %v12288_v51 = vpop.f32.mrf.mxu0  ;;  %14770 = vst [vmem:[#allocation38_spill] sm:$0xff] %v12292_v27 }
 0x189   : > { %14768 = vst [vmem:[#allocation36_spill] sm:$0xff] %v12288_v51  ;;  %14769 = vst [vmem:[#allocation37_spill] sm:$0xff] %v12290_v39  ;;  %v12296_v0 = vpop.f32.mrf.mxu1 }
 0x18a   : > { %v12294_v40 = vpop.f32.mrf.mxu0  ;;  %14772 = vst [vmem:[#allocation40_spill] sm:$0xff] %v12296_v0 }
 0x18b   : > { %14771 = vst [vmem:[#allocation39_spill] sm:$0xff] %v12294_v40  ;;  %v12300_v4 = vpop.f32.mrf.mxu1 }
 0x18c   : > { %v12298_v37 = vpop.f32.mrf.mxu0  ;;  %14774 = vst [vmem:[#allocation42_spill] sm:$0xff] %v12300_v4 }
 0x18d   : > { %14773 = vst [vmem:[#allocation41_spill] sm:$0xff] %v12298_v37  ;;  %v12304_v19 = vpop.f32.mrf.mxu1 }
 0x18e   : > { %v12302_v21 = vpop.f32.mrf.mxu0  ;;  %14776 = vst [vmem:[#allocation44_spill] sm:$0xff] %v12304_v19 }
 0x18f   : > { %14775 = vst [vmem:[#allocation43_spill] sm:$0xff] %v12302_v21  ;;  %v12308_v61 = vpop.f32.mrf.mxu1 }
 0x190   : > { %v12306_v28 = vpop.f32.mrf.mxu0  ;;  %14778 = vst [vmem:[#allocation46_spill] sm:$0xff] %v12308_v61 }
 0x191   : > { %14777 = vst [vmem:[#allocation45_spill] sm:$0xff] %v12306_v28  ;;  %v12312_v13 = vpop.f32.mrf.mxu1 }
 0x192   : > { %v12310_v20 = vpop.f32.mrf.mxu0  ;;  %14780 = vst [vmem:[#allocation48_spill] sm:$0xff] %v12312_v13 }
 0x193   : > { %14779 = vst [vmem:[#allocation47_spill] sm:$0xff] %v12310_v20  ;;  %v12316_v40 = vpop.f32.mrf.mxu1 }
 0x194   : > { %v12314_v51 = vpop.f32.mrf.mxu0  ;;  %14782 = vst [vmem:[#allocation50_spill] sm:$0xff] %v12316_v40 }
 0x195   : > { %14781 = vst [vmem:[#allocation49_spill] sm:$0xff] %v12314_v51  ;;  %v12320_v37 = vpop.f32.mrf.mxu1 }
 0x196   : > { %v12318_v39 = vpop.f32.mrf.mxu0  ;;  %14784 = vst [vmem:[#allocation52_spill] sm:$0xff] %v12320_v37 }
 0x197   : > { %14783 = vst [vmem:[#allocation51_spill] sm:$0xff] %v12318_v39  ;;  %v12324_v21 = vpop.f32.mrf.mxu1 }
 0x198   : > { %v12322_v4 = vpop.f32.mrf.mxu0  ;;  %14786 = vst [vmem:[#allocation54_spill] sm:$0xff] %v12324_v21 }
 0x199   : > { %14785 = vst [vmem:[#allocation53_spill] sm:$0xff] %v12322_v4  ;;  %v12328_v28 = vpop.f32.mrf.mxu1 }
 0x19a   : > { %v12326_v19 = vpop.f32.mrf.mxu0  ;;  %14788 = vst [vmem:[#allocation56_spill] sm:$0xff] %v12328_v28 }
 0x19b   : > { %14787 = vst [vmem:[#allocation55_spill] sm:$0xff] %v12326_v19  ;;  %v12332_v20 = vpop.f32.mrf.mxu1 }
 0x19c   : > { %v12330_v61 = vpop.f32.mrf.mxu0  ;;  %14790 = vst [vmem:[#allocation58_spill] sm:$0xff] %v12332_v20 }
 0x19d   : > { %14789 = vst [vmem:[#allocation57_spill] sm:$0xff] %v12330_v61  ;;  %v12336_v51 = vpop.f32.mrf.mxu1 }
 0x19e   : > { %v12334_v13 = vpop.f32.mrf.mxu0  ;;  %14792 = vst [vmem:[#allocation60_spill] sm:$0xff] %v12336_v51 }
 0x19f   : > { %14791 = vst [vmem:[#allocation59_spill] sm:$0xff] %v12334_v13  ;;  %v12340_v39 = vpop.f32.mrf.mxu1 }
 0x1a0   : > { %v12338_v40 = vpop.f32.mrf.mxu0  ;;  %14794 = vst [vmem:[#allocation62_spill] sm:$0xff] %v12340_v39 }
 0x1a1   : > { %14793 = vst [vmem:[#allocation61_spill] sm:$0xff] %v12338_v40  ;;  %v12344_v4 = vpop.f32.mrf.mxu1 }
 0x1a2   : > { %v12342_v37 = vpop.f32.mrf.mxu0  ;;  %14796 = vst [vmem:[#allocation64_spill] sm:$0xff] %v12344_v4 }
 0x1a3   : > { %14795 = vst [vmem:[#allocation63_spill] sm:$0xff] %v12342_v37  ;;  %v12348_v19 = vpop.f32.mrf.mxu1  ;;  %v8702_v37 = vld [vmem:[%s14569_s3 + $0x10] sm:$0xff] }
 0x1a4   : > { %v12346_v21 = vpop.f32.mrf.mxu0  ;;  %14798 = vst [vmem:[#allocation66_spill] sm:$0xff] %v12348_v19  ;;  %10150 = vmatprep.subr.mxu1 %v8702_v37 }
 0x1a5   : > { %14797 = vst [vmem:[#allocation65_spill] sm:$0xff] %v12346_v21  ;;  %v12352_v61 = vpop.f32.mrf.mxu1  ;;  %10151 = vmatpush3.msra.mxu1 %v8702_v37 }
 0x1a6   : > { %v12350_v28 = vpop.f32.mrf.mxu0  ;;  %14800 = vst [vmem:[#allocation68_spill] sm:$0xff] %v12352_v61 }
 0x1a7   : > { %14799 = vst [vmem:[#allocation67_spill] sm:$0xff] %v12350_v28  ;;  %v12356_v13 = vpop.f32.mrf.mxu1 }
 0x1a8   : > { %v12354_v20 = vpop.f32.mrf.mxu0  ;;  %14802 = vst [vmem:[#allocation70_spill] sm:$0xff] %v12356_v13 }
 0x1a9   : > { %14801 = vst [vmem:[#allocation69_spill] sm:$0xff] %v12354_v20  ;;  %v12363_v40 = vpop.f32.mrf.mxu1 }
 0x1aa   : > { %v12358_v51 = vpop.f32.mrf.mxu0  ;;  %14804 = vst [vmem:[#allocation72_spill] sm:$0xff] %v12363_v40 }
 0x1ab   : > { %14803 = vst [vmem:[#allocation71_spill] sm:$0xff] %v12358_v51  ;;  %v12367_v19 = vpop.f32.mrf.mxu1 }
 0x1ac   : > { %v12365_v21 = vpop.f32.mrf.mxu0  ;;  %14806 = vst [vmem:[#allocation74_spill] sm:$0xff] %v12367_v19  ;;  %v14815_v19 = vld [vmem:[#allocation8_spill] sm:$0xff] }
 0x1ad   : > { %14805 = vst [vmem:[#allocation73_spill] sm:$0xff] %v12365_v21  ;;  %v12371_v61 = vpop.f32.mrf.mxu1  ;;  %v14814_v21 = vld [vmem:[#allocation7_spill] sm:$0xff] }
 0x1ae   : > { %v12369_v28 = vpop.f32.mrf.mxu0  ;;  %14808 = vst [vmem:[#allocation76_spill] sm:$0xff] %v12371_v61  ;;  %v916_v37 = vadd.f32 %v12010_v8, %v14814_v21  ;;  %v936_v61 = vadd.f32 %v12040_v62, %v14816_v43  ;;  %v966_v8 = vadd.f32 %v12087_v44, %v14819_v34  ;;  %v1743_v34 = vadd.f32 %v12120_v54, %v11904_v15 }
 0x1af   : > { %14807 = vst [vmem:[#allocation75_spill] sm:$0xff] %v12369_v28  ;;  %v12375_v13 = vpop.f32.mrf.mxu1  ;;  %v926_v28 = vadd.f32 %v12025_v47, %v14815_v19  ;;  %v1747_v15 = vadd.f32 %v12134_v31, %v11933_v25  ;;  %v1757_v25 = vadd.f32 %v12169_v50, %v12003_v11 }
 0x1b0   : > { %v12373_v20 = vpop.f32.mrf.mxu0  ;;  %14810 = vst [vmem:[#allocation78_spill] sm:$0xff] %v12375_v13  ;;  %v14817_v13 = vld [vmem:[#allocation10_spill] sm:$0xff]  ;;  %v1368_v62 = vadd.f32 %v12012_v52, %v916_v37  ;;  %v2133_v31 = vadd.f32 %v12122_v49, %v1743_v34 }
 0x1b1   : > { %14809 = vst [vmem:[#allocation77_spill] sm:$0xff] %v12373_v20  ;;  %v12379_v4 = vpop.f32.mrf.mxu1  ;;  %v14833_v34 = vld [vmem:[#allocation42_spill] sm:$0xff] }
 0x1b2   : > { %v12377_v51 = vpop.f32.mrf.mxu0  ;;  %14812 = vst [vmem:[#allocation80_spill] sm:$0xff] %v12379_v4 }
 0x1b3   : > { %14811 = vst [vmem:[#allocation79_spill] sm:$0xff] %v12377_v51  ;;  %v9887_v40 = vpop.f32.mrf.mxu1  ;;  %v946_v51 = vadd.f32 %v12055_v26, %v14817_v13  ;;  %v1372_v26 = vadd.f32 %v12042_v59, %v936_v61  ;;  %v14820_v13 = vld [vmem:[#allocation16_spill] sm:$0xff]  ;;  %v1378_v59 = vadd.f32 %v12089_v16, %v966_v8  ;;  %v1753_v16 = vadd.f32 %v12155_v29, %v11975_v7  ;;  %v14822_v61 = vld [vmem:[#allocation27_spill] sm:$0xff] }
 0x1b4   : > { %v12381_v39 = vpop.f32.mrf.mxu0  ;;  %v2546_v20 = vadd.f32 %v9887_v40, %v12255_v17  ;;  %v1370_v17 = vadd.f32 %v12027_v32, %v926_v28 }
 0x1b5   : > { %14813 = vst [vmem:[#allocation81_spill] sm:$0xff] %v12381_v39  ;;  %v12392_v27 = vpop.f32.mrf.mxu1  ;;  %v14818_v39 = vld [vmem:[#allocation11_spill] sm:$0xff]  ;;  %v1374_v40 = vadd.f32 %v12057_v46, %v946_v51  ;;  %v1745_v46 = vadd.f32 %v12127_v30, %v11918_v22  ;;  %v8768_v30 = vld [vmem:[%s14569_s3 + $0x20] sm:$0xff]  ;;  %v1755_v51 = vadd.f32 %v12162_v14, %v11989_v1  ;;  %v1763_v14 = vadd.f32 %v12244_v5, %v1372_v26 }
 0x1b6   : > { %v9937_v0 = vpop.f32.mrf.mxu0  ;;  %v956_v56 = vadd.f32 %v12071_v36, %v14818_v39  ;;  %v976_v36 = vadd.f32 %v12104_v24, %v14820_v13  ;;  %v14821_v39 = vld [vmem:[#allocation18_spill] sm:$0xff]  ;;  %v8735_v24 = vld [vmem:[%s14569_s3 + $0x18] sm:$0xff]  ;;  %10250 = vmatprep.subr.mxu1 %v8768_v30  ;;  %v1761_v11 = vadd.f32 %v12183_v63, %v1370_v17  ;;  %v14838_v30 = vld [vmem:[#allocation48_spill] sm:$0xff] }
 0x1b7   : > { %v12400_v21 = vadd.f32 %v9937_v0, %v2546_v20  ;;  %v9890_v47 = vpop.f32.mrf.mxu1  ;;  %v986_v44 = vadd.f32 %v12113_v58, %v14821_v39  ;;  %v1749_v58 = vadd.f32 %v12141_v48, %v11947_v2  ;;  %10200 = vmatprep.subr.mxu0 %v8735_v24  ;;  %v1759_v48 = vadd.f32 %v12176_v60, %v1368_v62  ;;  %v14829_v17 = vld [vmem:[#allocation38_spill] sm:$0xff] }
 0x1b8   : > { %v12394_v4 = vpop.f32.mrf.mxu0  ;;  %v2548_v43 = vadd.f32 %v9890_v47, %v12265_v12  ;;  %v1376_v32 = vadd.f32 %v12073_v9, %v956_v56  ;;  %v1751_v9 = vadd.f32 %v12148_v35, %v11961_v10  ;;  %10201 = vmatpush3.msra.mxu0 %v8735_v24  ;;  %v1380_v10 = vadd.f32 %v12106_v53, %v976_v36  ;;  %v14831_v36 = vld [vmem:[#allocation40_spill] sm:$0xff] }
 0x1b9   : > { %v12413_v0 = vpop.f32.mrf.mxu1  ;;  %v1382_v7 = vadd.f32 %v12115_v42, %v986_v44  ;;  %v2135_v1 = vadd.f32 %v12129_v45, %v1745_v46  ;;  %v2137_v53 = vadd.f32 %v12136_v6, %v1747_v15  ;;  %v2139_v42 = vadd.f32 %v12143_v33, %v1749_v58  ;;  %v14823_v6 = vld [vmem:[#allocation34_spill] sm:$0xff]  ;;  %v14824_v33 = vld [vmem:[#allocation13_spill] sm:$0xff]  ;;  %v14832_v44 = vld [vmem:[#allocation20_spill] sm:$0xff] }
 0x1ba   : > { %v9940_v19 = vpop.f32.mrf.mxu0  ;;  %v2141_v49 = vadd.f32 %v12150_v38, %v1751_v9  ;;  %v2143_v60 = vadd.f32 %v12157_v55, %v1753_v16  ;;  %v2145_v28 = vadd.f32 %v12164_v41, %v1755_v51  ;;  %v2147_v45 = vadd.f32 %v12171_v3, %v1757_v25  ;;  %v14825_v38 = vld [vmem:[#allocation15_spill] sm:$0xff]  ;;  %v14826_v41 = vld [vmem:[#allocation29_spill] sm:$0xff] }
 0x1bb   : > { %v12421_v12 = vadd.f32 %v9940_v19, %v2548_v43  ;;  %v9893_v54 = vpop.f32.mrf.mxu1  ;;  %v1765_v63 = vadd.f32 %v12251_v57, %v1374_v40  ;;  %v12464_v20 = vadd.f32 %v14822_v61, %v1759_v48  ;;  %v1767_v37 = vadd.f32 %v14823_v6, %v1376_v32  ;;  %v14827_v3 = vld [vmem:[#allocation31_spill] sm:$0xff]  ;;  %v14830_v40 = vld [vmem:[#allocation17_spill] sm:$0xff]  ;;  %v14846_v6 = vld [vmem:[#allocation52_spill] sm:$0xff] }
 0x1bc   : > { %v12415_v52 = vpop.f32.mrf.mxu0  ;;  %v2550_v2 = vadd.f32 %v9893_v54, %v12276_v23  ;;  %v1769_v8 = vadd.f32 %v14824_v33, %v1378_v59  ;;  %v1771_v47 = vadd.f32 %v14825_v38, %v1380_v10  ;;  %v12474_v62 = vadd.f32 %v14826_v41, %v1761_v11  ;;  %v14834_v59 = vld [vmem:[#allocation44_spill] sm:$0xff]  ;;  %v14835_v58 = vld [vmem:[#allocation33_spill] sm:$0xff]  ;;  %v14837_v54 = vld [vmem:[#allocation46_spill] sm:$0xff] }
 0x1bd   : > { %v12446_v35 = vpop.f32.mrf.mxu1  ;;  %v12477_v57 = vadd.f32 %v14827_v3, %v1763_v14  ;;  %v1773_v13 = vadd.f32 %v14830_v40, %v1382_v7  ;;  %v2523_v39 = vadd.f32 %v14831_v36, %v2133_v31  ;;  %v2526_v32 = vadd.f32 %v14833_v34, %v14832_v44  ;;  %v14836_v16 = vld [vmem:[#allocation21_spill] sm:$0xff]  ;;  %v14840_v10 = vld [vmem:[#allocation35_spill] sm:$0xff]  ;;  %v14841_v31 = vld [vmem:[#allocation6_spill] sm:$0xff] }
 0x1be   : > { %v9943_v22 = vpop.f32.mrf.mxu0  ;;  %v2525_v46 = vadd.f32 %v14834_v59, %v2135_v1  ;;  %v12489_v9 = vadd.f32 %v14835_v58, %v1765_v63  ;;  %v2527_v51 = vadd.f32 %v14838_v30, %v2137_v53  ;;  %v14839_v25 = vld [vmem:[#allocation37_spill] sm:$0xff]  ;;  %v12496_v7 = vadd.f32 %v14840_v10, %v1767_v37  ;;  %v14842_v11 = vld [vmem:[#allocation14_spill] sm:$0xff]  ;;  %v14845_v61 = vld [vmem:[#allocation39_spill] sm:$0xff] }
 0x1bf   : > { %v12453_v50 = vadd.f32 %v9943_v22, %v2550_v2  ;;  %v9896_v23 = vpop.f32.mrf.mxu1  ;;  %v2528_v22 = vadd.f32 %v14837_v54, %v14836_v16  ;;  %v12499_v48 = vadd.f32 %v14841_v31, %v1769_v8  ;;  %v12502_v1 = vadd.f32 %v14842_v11, %v1771_v47  ;;  %v14843_v14 = vld [vmem:[#allocation22_spill] sm:$0xff]  ;;  %v14847_v38 = vld [vmem:[#allocation23_spill] sm:$0xff]  ;;  %v14849_v8 = vld [vmem:[#allocation36_spill] sm:$0xff] }
 0x1c0   : > { %v12448_v29 = vpop.f32.mrf.mxu0  ;;  %v2552_v5 = vadd.f32 %v9896_v23, %v12283_v18  ;;  %v14828_v18 = vld [vmem:[#allocation19_spill] sm:$0xff]  ;;  %v14844_v23 = vld [vmem:[#allocation50_spill] sm:$0xff]  ;;  %v2529_v33 = vadd.f32 %v14846_v6, %v2139_v42  ;;  %v14850_v47 = vld [vmem:[#allocation41_spill] sm:$0xff] }
 0x1c1   : > { %v12469_v55 = vpop.f32.mrf.mxu1  ;;  %v2524_v26 = vadd.f32 %v14829_v17, %v14828_v18  ;;  %v14848_v37 = vld [vmem:[#allocation54_spill] sm:$0xff]  ;;  %v12517_v18 = vadd.f32 %v14849_v8, %v1773_v13  ;;  %v2914_v17 = vadd.f32 %v14850_v47, %v2523_v39  ;;  %v14851_v40 = vld [vmem:[#allocation43_spill] sm:$0xff]  ;;  %v14852_v44 = vld [vmem:[#allocation45_spill] sm:$0xff] }
 0x1c2   : > { %v9946_v56 = vpop.f32.mrf.mxu0  ;;  %v2532_v41 = vadd.f32 %v14848_v37, %v14847_v38  ;;  %v2917_v36 = vadd.f32 %v14851_v40, %v2526_v32  ;;  %v2916_v34 = vadd.f32 %v14852_v44, %v2525_v46  ;;  %v14853_v58 = vld [vmem:[#allocation47_spill] sm:$0xff]  ;;  %v14854_v16 = vld [vmem:[#allocation49_spill] sm:$0xff]  ;;  %v14855_v54 = vld [vmem:[#allocation56_spill] sm:$0xff] }
 0x1c3   : > { %v12481_v43 = vadd.f32 %v9946_v56, %v2552_v5  ;;  %v9899_v24 = vpop.f32.mrf.mxu1  ;;  %v2530_v56 = vadd.f32 %v14844_v23, %v14843_v14  ;;  %v2915_v53 = vadd.f32 %v14845_v61, %v2524_v26  ;;  %v2919_v26 = vadd.f32 %v14853_v58, %v2528_v22  ;;  %v14857_v10 = vld [vmem:[#allocation24_spill] sm:$0xff]  ;;  %v14858_v13 = vld [vmem:[#allocation58_spill] sm:$0xff]  ;;  %v14860_v14 = vld [vmem:[#allocation25_spill] sm:$0xff] }
 0x1c4   : > { %v12471_v19 = vpop.f32.mrf.mxu0  ;;  %v2554_v2 = vadd.f32 %v9899_v24, %v14839_v25  ;;  %v2918_v42 = vadd.f32 %v14854_v16, %v2527_v51  ;;  %v2531_v30 = vadd.f32 %v14855_v54, %v2141_v49  ;;  %v2534_v31 = vadd.f32 %v14858_v13, %v14857_v10  ;;  %v14859_v11 = vld [vmem:[#allocation60_spill] sm:$0xff]  ;;  %v14861_v32 = vld [vmem:[#allocation62_spill] sm:$0xff]  ;;  %v14862_v61 = vld [vmem:[#allocation53_spill] sm:$0xff] }
 0x1c5   : > { %v12506_v63 = vpop.f32.mrf.mxu1  ;;  %v2533_v39 = vadd.f32 %v14859_v11, %v2143_v60  ;;  %v2536_v23 = vadd.f32 %v14861_v32, %v14860_v14  ;;  %v12534_v46 = vld [vmem:[%s14568_s2] ss:$0 sm:$0xff]  ;;  %v12537_v49 = vadd.f32 %v14862_v61, %v2529_v33  ;;  %v14865_v8 = vld [vmem:[#allocation26_spill] sm:$0xff]  ;;  %v14870_v13 = vld [vmem:[#allocation57_spill] sm:$0xff] }
 0x1c6   : > { %v9949_v15 = vpop.f32.mrf.mxu0  ;;  %v14864_v37 = vld [vmem:[#allocation64_spill] sm:$0xff]  ;;  %v14866_v47 = vld [vmem:[#allocation66_spill] sm:$0xff]  ;;  %v12549_v33 = vadd.f32 %v14870_v13, %v2531_v30  ;;  %v14872_v11 = vld [vmem:[#allocation61_spill] sm:$0xff] }
 0x1c7   : > { %v12514_v3 = vadd.f32 %v9949_v15, %v2554_v2  ;;  %v9954_v59 = vpop.f32.mrf.mxu1  ;;  %v14856_v15 = vld [vmem:[#allocation51_spill] sm:$0xff]  ;;  %v2535_v60 = vadd.f32 %v14864_v37, %v2145_v28  ;;  %v2538_v40 = vadd.f32 %v14866_v47, %v14865_v8  ;;  %v14867_v44 = vld [vmem:[#allocation68_spill] sm:$0xff]  ;;  %v14869_v16 = vld [vmem:[#allocation70_spill] sm:$0xff]  ;;  %v12558_v14 = vadd.f32 %v14872_v11, %v2533_v39 }
 0x1c8   : > { %v12508_v5 = vpop.f32.mrf.mxu0  ;;  %v3305_v25 = vadd.f32 %v9954_v59, %v2915_v53  ;;  %v2921_v2 = vadd.f32 %v14856_v15, %v2530_v56  ;;  %v14863_v53 = vld [vmem:[#allocation55_spill] sm:$0xff]  ;;  %v2537_v59 = vadd.f32 %v14867_v44, %v2147_v45  ;;  %v14868_v58 = vld [vmem:[#allocation28_spill] sm:$0xff] }
 0x1c9   : > { %v3145_v22 = vpop.f32.mrf.mxu1  ;;  %v12540_v56 = vadd.f32 %v14863_v53, %v2532_v41  ;;  %v2540_v54 = vadd.f32 %v14869_v16, %v14868_v58  ;;  %v14873_v45 = vld [vmem:[#allocation63_spill] sm:$0xff] }
 0x1ca   : > { %v10004_v24 = vpop.f32.mrf.mxu0  ;;  %v3304_v38 = vadd.f32 %v3145_v22, %v2914_v17  ;;  %v12561_v32 = vadd.f32 %v14873_v45, %v2536_v23  ;;  %v14874_v22 = vld [vmem:[#allocation72_spill] sm:$0xff]  ;;  %v14876_v39 = vld [vmem:[#allocation67_spill] sm:$0xff]  ;;  %v14877_v23 = vld [vmem:[#allocation69_spill] sm:$0xff] }
 0x1cb   : > { %v3695_v6 = vadd.f32 %v10004_v24, %v3305_v25  ;;  %v9957_v15 = vpop.f32.mrf.mxu1  ;;  %v14871_v25 = vld [vmem:[#allocation59_spill] sm:$0xff]  ;;  %v2539_v61 = vadd.f32 %v14874_v22, %v12464_v20  ;;  %v12573_v8 = vadd.f32 %v14876_v39, %v2538_v40  ;;  %v12576_v47 = vadd.f32 %v14877_v23, %v2537_v59  ;;  %v14880_v40 = vld [vmem:[#allocation30_spill] sm:$0xff]  ;;  %v14882_v59 = vld [vmem:[#allocation76_spill] sm:$0xff] }
 0x1cc   : > { %v3535_v51 = vpop.f32.mrf.mxu0  ;;  %v3307_v17 = vadd.f32 %v9957_v15, %v2917_v36  ;;  %v12555_v28 = vadd.f32 %v14871_v25, %v2534_v31  ;;  %v14875_v31 = vld [vmem:[#allocation65_spill] sm:$0xff]  ;;  %v14878_v44 = vld [vmem:[#allocation71_spill] sm:$0xff]  ;;  %v2541_v11 = vadd.f32 %v14882_v59, %v12474_v62 }
 0x1cd   : > { %v12552_v41 = vadd.f32 %v12534_v46, %v3695_v6  ;;  %v3694_v24 = vadd.f32 %v3535_v51, %v3304_v38  ;;  %v3155_v53 = vpop.f32.mrf.mxu1  ;;  %v12570_v38 = vadd.f32 %v14875_v31, %v2535_v60  ;;  %v12579_v20 = vadd.f32 %v14878_v44, %v2540_v54  ;;  %v14879_v60 = vld [vmem:[#allocation73_spill] sm:$0xff]  ;;  %v14885_v31 = vld [vmem:[#allocation80_spill] sm:$0xff] }
 0x1ce   : > { %v10007_v10 = vpop.f32.mrf.mxu0  ;;  %v3306_v51 = vadd.f32 %v3155_v53, %v2916_v34  ;;  %v2543_v39 = vadd.f32 %v14885_v31, %v12477_v57 }
 0x1cf   : > { %v3766_v37 = vsub.f32 0.0, %v12552_v41  ;;  %v12567_v6 = vadd.f32 %v12534_v46, %v3694_v24  ;;  %v3697_v36 = vadd.f32 %v10007_v10, %v3307_v17  ;;  %v9960_v58 = vpop.f32.mrf.mxu1  ;;  %v12586_v24 = vadd.f32 %v14879_v60, %v2539_v61  ;;  %v14881_v17 = vld [vmem:[#allocation74_spill] sm:$0xff] }
 0x1d0   : > { %v3545_v30 = vpop.f32.mrf.mxu0  ;;  %v2542_v25 = vadd.f32 %v14881_v17, %v14880_v40  ;;  %v3309_v54 = vadd.f32 %v9960_v58, %v2919_v26 }
 0x1d1   : > { %v3799_v15 = vmul.f32 1.442695, %v3766_v37  ;;  %v3765_v13 = vsub.f32 0.0, %v12567_v6  ;;  %v12583_v10 = vadd.f32 %v12534_v46, %v3697_v36  ;;  %v3696_v34 = vadd.f32 %v3545_v30, %v3306_v51  ;;  %v3165_v45 = vpop.f32.mrf.mxu1  ;;  %v14883_v30 = vld [vmem:[#allocation32_spill] sm:$0xff]  ;;  %v14884_v51 = vld [vmem:[#allocation78_spill] sm:$0xff] }
 0x1d2   : > { %v10010_v16 = vpop.f32.mrf.mxu0  ;;  %v2544_v61 = vadd.f32 %v14884_v51, %v14883_v30  ;;  %v3308_v44 = vadd.f32 %v3165_v45, %v2918_v42 }
 0x1d3   : > { %10595 = vpow2.f32 %v3799_v15  ;;  %v3797_v53 = vmul.f32 1.442695, %v3765_v13  ;;  %v3768_v37 = vsub.f32 0.0, %v12583_v10  ;;  %v12594_v36 = vadd.f32 %v12534_v46, %v3696_v34  ;;  %v9963_v60 = vpop.f32.mrf.mxu1  ;;  %v14886_v13 = vld [vmem:[#allocation75_spill] sm:$0xff]  ;;  %v14887_v34 = vld [vmem:[#allocation77_spill] sm:$0xff] }
 0x1d4   : > { %v3555_v22 = vpop.f32.mrf.mxu0  ;;  %v3699_v23 = vadd.f32 %v10010_v16, %v3309_v54  ;;  %v3311_v15 = vadd.f32 %v9963_v60, %v2921_v2  ;;  %v12602_v40 = vadd.f32 %v14886_v13, %v2542_v25  ;;  %v12605_v17 = vadd.f32 %v14887_v34, %v2541_v11  ;;  %v14889_v2 = vld [vmem:[#allocation81_spill] sm:$0xff] }
 0x1d5   : > { %10597 = vpow2.f32 %v3797_v53  ;;  %v3803_v26 = vmul.f32 1.442695, %v3768_v37  ;;  %v3767_v58 = vsub.f32 0.0, %v12594_v36  ;;  %v3698_v30 = vadd.f32 %v3555_v22, %v3308_v44  ;;  %v3175_v57 = vpop.f32.mrf.mxu1  ;;  %v14888_v53 = vld [vmem:[#allocation79_spill] sm:$0xff] }
 0x1d6   : > { %v10013_v62 = vpop.f32.mrf.mxu0  ;;  %v12608_v59 = vadd.f32 %v12534_v46, %v3699_v23  ;;  %v3310_v45 = vadd.f32 %v3175_v57, %v12537_v49  ;;  %v12612_v37 = vadd.f32 %v14888_v53, %v2544_v61  ;;  %v12615_v25 = vadd.f32 %v14889_v2, %v2543_v39 }
 0x1d7   : > { %10599 = vpow2.f32 %v3803_v26  ;;  %v3801_v42 = vmul.f32 1.442695, %v3767_v58  ;;  %v3701_v54 = vadd.f32 %v10013_v62, %v3311_v15  ;;  %v12619_v51 = vadd.f32 %v12534_v46, %v3698_v30  ;;  %v9966_v31 = vpop.f32.mrf.mxu1 }
 0x1d8   : > { %v3565_v16 = vpop.f32.mrf.mxu0  ;;  %v3770_v11 = vsub.f32 0.0, %v12608_v59  ;;  %v3313_v49 = vadd.f32 %v9966_v31, %v12540_v56  ;;  %v2545_v61 = vadd.f32 %v12392_v27, %v12489_v9  ;;  %v2547_v39 = vadd.f32 %v12413_v0, %v12496_v7 }
 0x1d9   : > { %10601 = vpow2.f32 %v3801_v42  ;;  %v12622_v23 = vadd.f32 %v12534_v46, %v3701_v54  ;;  %v3700_v44 = vadd.f32 %v3565_v16, %v3310_v45  ;;  %v3769_v62 = vsub.f32 0.0, %v12619_v51  ;;  %v3185_v26 = vpop.f32.mrf.mxu1 }
 0x1da   : > { %v10016_v22 = vpop.f32.mrf.mxu0  ;;  %v3807_v60 = vmul.f32 1.442695, %v3770_v11  ;;  %v3312_v30 = vadd.f32 %v3185_v26, %v12549_v33  ;;  %v2549_v56 = vadd.f32 %v12446_v35, %v12499_v48  ;;  %v2551_v27 = vadd.f32 %v12469_v55, %v12502_v1 }
 0x1db   : > { %v3772_v15 = vsub.f32 0.0, %v12622_v23  ;;  %v12632_v13 = vadd.f32 %v12534_v46, %v3700_v44  ;;  %v3703_v34 = vadd.f32 %v10016_v22, %v3313_v49  ;;  %v3805_v0 = vmul.f32 1.442695, %v3769_v62  ;;  %v9969_v9 = vpop.f32.mrf.mxu1 }
 0x1dc   : > { %v3575_v58 = vpop.f32.mrf.mxu0  ;;  %10603 = vpow2.f32 %v3807_v60  ;;  %v12644_v45 = vadd.f32 %v12394_v4, %v2545_v61  ;;  %v12647_v33 = vadd.f32 %v12415_v52, %v2547_v39  ;;  %v3315_v35 = vadd.f32 %v9969_v9, %v12555_v28 }
 0x1dd   : > { %v3811_v57 = vmul.f32 1.442695, %v3772_v15  ;;  %v3771_v16 = vsub.f32 0.0, %v12632_v13  ;;  %v12641_v42 = vadd.f32 %v12534_v46, %v3703_v34  ;;  %v3702_v54 = vadd.f32 %v3575_v58, %v3312_v30  ;;  %v3195_v55 = vpop.f32.mrf.mxu1 }
 0x1de   : > { %v10019_v7 = vpop.f32.mrf.mxu0  ;;  %10605 = vpow2.f32 %v3805_v0  ;;  %v12655_v31 = vadd.f32 %v12448_v29, %v2549_v56  ;;  %v12658_v4 = vadd.f32 %v12471_v19, %v2551_v27  ;;  %v3314_v22 = vadd.f32 %v3195_v55, %v12558_v14 }
 0x1df   : > { %10607 = vpow2.f32 %v3811_v57  ;;  %v3809_v1 = vmul.f32 1.442695, %v3771_v16  ;;  %v3774_v53 = vsub.f32 0.0, %v12641_v42  ;;  %v12652_v2 = vadd.f32 %v12534_v46, %v3702_v54  ;;  %v9972_v28 = vpop.f32.mrf.mxu1 }
 0x1e0   : > { %v3585_v48 = vpop.f32.mrf.mxu0  ;;  %v10596_v11 = vpop.eup %10595  ;;  %v3705_v52 = vadd.f32 %v10019_v7, %v3315_v35  ;;  %v2553_v62 = vadd.f32 %v12506_v63, %v12517_v18  ;;  %v3317_v19 = vadd.f32 %v9972_v28, %v12561_v32 }
 0x1e1   : > { %v3862_v49 = vadd.f32 1.0, %v10596_v11  ;;  %10609 = vpow2.f32 %v3809_v1  ;;  %v3815_v61 = vmul.f32 1.442695, %v3774_v53  ;;  %v3773_v39 = vsub.f32 0.0, %v12652_v2  ;;  %v3205_v58 = vpop.f32.mrf.mxu1 }
 0x1e2   : > { %v10022_v44 = vpop.f32.mrf.mxu0  ;;  %v10598_v60 = vpop.eup %10597  ;;  %v12665_v29 = vadd.f32 %v12534_v46, %v3705_v52  ;;  %v3704_v26 = vadd.f32 %v3585_v48, %v3314_v22  ;;  %v3316_v30 = vadd.f32 %v3205_v58, %v12570_v38 }
 0x1e3   : > { %10611 = vrcp.f32 %v3862_v49  ;;  %v3861_v14 = vadd.f32 1.0, %v10598_v60  ;;  %v3813_v34 = vmul.f32 1.442695, %v3773_v39  ;;  %v3707_v63 = vadd.f32 %v10022_v44, %v3317_v19  ;;  %v9975_v18 = vpop.f32.mrf.mxu1 }
 0x1e4   : > { %v3595_v15 = vpop.f32.mrf.mxu0  ;;  %v10600_v56 = vpop.eup %10599  ;;  %10613 = vpow2.f32 %v3815_v61  ;;  %v3776_v27 = vsub.f32 0.0, %v12665_v29  ;;  %v12671_v0 = vadd.f32 %v12534_v46, %v3704_v26  ;;  %v3319_v57 = vadd.f32 %v9975_v18, %v12573_v8 }
 0x1e5   : > { %10615 = vrcp.f32 %v3861_v14  ;;  %v3864_v7 = vadd.f32 1.0, %v10600_v56  ;;  %v3706_v32 = vadd.f32 %v3595_v15, %v3316_v30  ;;  %v12676_v35 = vadd.f32 %v12534_v46, %v3707_v63  ;;  %v3215_v55 = vpop.f32.mrf.mxu1 }
 0x1e6   : > { %v10025_v9 = vpop.f32.mrf.mxu0  ;;  %v10602_v16 = vpop.eup %10601  ;;  %10617 = vpow2.f32 %v3813_v34  ;;  %v3819_v54 = vmul.f32 1.442695, %v3776_v27  ;;  %v3775_v38 = vsub.f32 0.0, %v12671_v0  ;;  %v3318_v22 = vadd.f32 %v3215_v55, %v12576_v47 }
 0x1e7   : > { %10619 = vrcp.f32 %v3864_v7  ;;  %v3863_v1 = vadd.f32 1.0, %v10602_v16  ;;  %v12679_v53 = vadd.f32 %v12534_v46, %v3706_v32  ;;  %v3709_v11 = vadd.f32 %v10025_v9, %v3319_v57  ;;  %v9978_v28 = vpop.f32.mrf.mxu1 }
 0x1e8   : > { %v3605_v48 = vpop.f32.mrf.mxu0  ;;  %10621 = vpow2.f32 %v3819_v54  ;;  %v3817_v52 = vmul.f32 1.442695, %v3775_v38  ;;  %v3778_v8 = vsub.f32 0.0, %v12676_v35  ;;  %v3321_v60 = vadd.f32 %v9978_v28, %v12579_v20 }
 0x1e9   : > { %v10604_v49 = vpop.eup %10603  ;;  %10623 = vrcp.f32 %v3863_v1  ;;  %v3777_v61 = vsub.f32 0.0, %v12679_v53  ;;  %v12685_v39 = vadd.f32 %v12534_v46, %v3709_v11  ;;  %v3708_v58 = vadd.f32 %v3605_v48, %v3318_v22  ;;  %v3225_v15 = vpop.f32.mrf.mxu1 }
 0x1ea   : > { %v10028_v44 = vpop.f32.mrf.mxu0  ;;  %v3866_v26 = vadd.f32 1.0, %v10604_v49  ;;  %10625 = vpow2.f32 %v3817_v52  ;;  %v3823_v19 = vmul.f32 1.442695, %v3778_v8  ;;  %v12689_v47 = vadd.f32 %v12508_v5, %v2553_v62 }
 0x1eb   : > { %v10606_v34 = vpop.eup %10605  ;;  %v3780_v30 = vsub.f32 0.0, %v12685_v39  ;;  %v3711_v56 = vadd.f32 %v10028_v44, %v3321_v60  ;;  %v3320_v27 = vadd.f32 %v3225_v15, %v12586_v24  ;;  %v3821_v9 = vmul.f32 1.442695, %v3777_v61  ;;  %v9981_v7 = vpop.f32.mrf.mxu1 }
 0x1ec   : > { %v3615_v14 = vpop.f32.mrf.mxu0  ;;  %v10608_v63 = vpop.eup %10607  ;;  %10627 = vrcp.f32 %v3866_v26  ;;  %v3865_v18 = vadd.f32 1.0, %v10606_v34  ;;  %v12694_v20 = vadd.f32 %v12534_v46, %v3708_v58  ;;  %v3323_v38 = vadd.f32 %v9981_v7, %v12602_v40 }
 0x1ed   : > { %v3868_v57 = vadd.f32 1.0, %v10608_v63  ;;  %10629 = vpow2.f32 %v3823_v19  ;;  %v3827_v16 = vmul.f32 1.442695, %v3780_v30  ;;  %v12697_v5 = vadd.f32 %v12534_v46, %v3711_v56  ;;  %v3235_v55 = vpop.f32.mrf.mxu1 }
 0x1ee   : > { %v10031_v32 = vpop.f32.mrf.mxu0  ;;  %v10610_v62 = vpop.eup %10609  ;;  %10631 = vrcp.f32 %v3865_v18  ;;  %v3779_v54 = vsub.f32 0.0, %v12694_v20  ;;  %v3710_v24 = vadd.f32 %v3615_v14, %v3320_v27  ;;  %v3322_v52 = vadd.f32 %v3235_v55, %v12605_v17 }
 0x1ef   : > { %10633 = vrcp.f32 %v3868_v57  ;;  %v3867_v1 = vadd.f32 1.0, %v10610_v62  ;;  %v3782_v11 = vsub.f32 0.0, %v12697_v5  ;;  %v3713_v44 = vadd.f32 %v10031_v32, %v3323_v38  ;;  %v9984_v49 = vpop.f32.mrf.mxu1 }
 0x1f0   : > { %v3625_v48 = vpop.f32.mrf.mxu0  ;;  %v10612_v8 = vpop.eup %10611  ;;  %10635 = vpow2.f32 %v3821_v9  ;;  %v3825_v22 = vmul.f32 1.442695, %v3779_v54  ;;  %v12704_v28 = vadd.f32 %v12534_v46, %v3710_v24  ;;  %v3325_v63 = vadd.f32 %v9984_v49, %v12612_v37 }
 0x1f1   : > { %v10614_v60 = vpop.eup %10613  ;;  %v3926_v40 = vmul.f32 %v10612_v8, %v12552_v41  ;;  %10637 = vrcp.f32 %v3867_v1  ;;  %v3831_v26 = vmul.f32 1.442695, %v3782_v11  ;;  %v3712_v19 = vadd.f32 %v3625_v48, %v3322_v52  ;;  %v3245_v34 = vpop.f32.mrf.mxu1 }
 0x1f2   : > { %v10034_v61 = vpop.f32.mrf.mxu0  ;;  %v10616_v58 = vpop.eup %10615  ;;  %v3870_v15 = vadd.f32 1.0, %v10614_v60  ;;  %10639 = vpow2.f32 %v3827_v16  ;;  %v3781_v17 = vsub.f32 0.0, %v12704_v28  ;;  %v12709_v14 = vadd.f32 %v12534_v46, %v3713_v44 }
 0x1f3   : > { %v10618_v56 = vpop.eup %10617  ;;  %4015 = vst.msk [vmem:[#allocation2 + $0x21] sm:$0xff] %vm3957_vm2, %v3926_v40  ;;  %v3925_v27 = vmul.f32 %v10616_v58, %v12567_v6  ;;  %10641 = vpow2.f32 %v3825_v22  ;;  %v12714_v41 = vadd.f32 %v12534_v46, %v3712_v19  ;;  %v9987_v57 = vpop.f32.mrf.mxu1  ;;  %v3715_v24 = vadd.f32 %v10034_v61, %v3325_v63 }
 0x1f4   : > { %v3635_v30 = vpop.f32.mrf.mxu0  ;;  %v10620_v18 = vpop.eup %10619  ;;  %10643 = vrcp.f32 %v3870_v15  ;;  %v3869_v9 = vadd.f32 1.0, %v10618_v56  ;;  %v3829_v7 = vmul.f32 1.442695, %v3781_v17  ;;  %v3784_v32 = vsub.f32 0.0, %v12709_v14 }
 0x1f5   : > { %v10622_v62 = vpop.eup %10621  ;;  %4014 = vst.msk [vmem:[#allocation2 + $0x19] sm:$0xff] %vm3957_vm2, %v3925_v27  ;;  %v3928_v54 = vmul.f32 %v10620_v18, %v12583_v10  ;;  %10645 = vpow2.f32 %v3831_v26  ;;  %v3783_v6 = vsub.f32 0.0, %v12714_v41  ;;  %v3324_v48 = vadd.f32 %v3245_v34, %v12615_v25  ;;  %v3255_v1 = vpop.f32.mrf.mxu1 }
 0x1f6   : > { %v10037_v16 = vpop.f32.mrf.mxu0  ;;  %v10624_v38 = vpop.eup %10623  ;;  %10647 = vrcp.f32 %v3869_v9  ;;  %v3872_v37 = vadd.f32 1.0, %v10622_v62  ;;  %v3835_v55 = vmul.f32 1.442695, %v3784_v32  ;;  %v12725_v10 = vadd.f32 %v12534_v46, %v3715_v24 }
 0x1f7   : > { %v10626_v52 = vpop.eup %10625  ;;  %4017 = vst.msk [vmem:[#allocation2 + $0x39] sm:$0xff] %vm3957_vm2, %v3928_v54  ;;  %v3927_v8 = vmul.f32 %v10624_v38, %v12594_v36  ;;  %10649 = vpow2.f32 %v3829_v7  ;;  %v3833_v22 = vmul.f32 1.442695, %v3783_v6  ;;  %v3714_v49 = vadd.f32 %v3635_v30, %v3324_v48  ;;  %v9990_v60 = vpop.f32.mrf.mxu1 }
 0x1f8   : > { %v3645_v11 = vpop.f32.mrf.mxu0  ;;  %10651 = vrcp.f32 %v3872_v37  ;;  %v3871_v44 = vadd.f32 1.0, %v10626_v52  ;;  %v3327_v61 = vadd.f32 %v9987_v57, %v12400_v21  ;;  %v3786_v26 = vsub.f32 0.0, %v12725_v10 }
 0x1f9   : > { %v10628_v25 = vpop.eup %10627  ;;  %4016 = vst.msk [vmem:[#allocation2 + $0x31] sm:$0xff] %vm3957_vm2, %v3927_v8  ;;  %10653 = vpow2.f32 %v3835_v55  ;;  %v3326_v36 = vadd.f32 %v3255_v1, %v12644_v45  ;;  %v3329_v19 = vadd.f32 %v9990_v60, %v12421_v12  ;;  %v12734_v17 = vadd.f32 %v12534_v46, %v3714_v49  ;;  %v3265_v34 = vpop.f32.mrf.mxu1  ;;  %v12762_v55 = vld [vmem:[%s14569_s3 + $0x28] sm:$0xff] }
 0x1fa   : > { %v10040_v40 = vpop.f32.mrf.mxu0  ;;  %v10630_v58 = vpop.eup %10629  ;;  %v3930_v15 = vmul.f32 %v10628_v25, %v12608_v59  ;;  %10655 = vrcp.f32 %v3871_v44  ;;  %v3717_v21 = vadd.f32 %v10037_v16, %v3327_v61  ;;  %v3839_v63 = vmul.f32 1.442695, %v3786_v26  ;;  %v12757_v37 = vld [vmem:[#allocation2 + $0x21] sm:$0xff]  ;;  %10300 = vmatprep.subr.mxu0 %v12762_v55 }
 0x1fb   : > { %v10632_v56 = vpop.eup %10631  ;;  %v3874_v27 = vadd.f32 1.0, %v10630_v58  ;;  %10657 = vpow2.f32 %v3833_v22  ;;  %v3716_v18 = vadd.f32 %v3645_v11, %v3326_v36  ;;  %v3785_v45 = vsub.f32 0.0, %v12734_v17  ;;  %v9993_v32 = vpop.f32.mrf.mxu1 }
 0x1fc   : > { %v3655_v30 = vpop.f32.mrf.mxu0  ;;  %v10634_v9 = vpop.eup %10633  ;;  %4019 = vst.msk [vmem:[#allocation2 + $0x51] sm:$0xff] %vm3957_vm2, %v3930_v15  ;;  %v3929_v12 = vmul.f32 %v10632_v56, %v12619_v51  ;;  %v12740_v59 = vadd.f32 %v12534_v46, %v3717_v21  ;;  %v3719_v7 = vadd.f32 %v10040_v40, %v3329_v19  ;;  %v12742_v16 = vld [vmem:[#allocation2 + $0x19] sm:$0xff]  ;;  %v3328_v38 = vadd.f32 %v3265_v34, %v12647_v33 }
 0x1fd   : > { %v12744_v62 = vld [vmem:[#allocation2 + $0x18] sm:$0xff]  ;;  %v12746_v54 = vld [vmem:[#allocation2 + $0x20] sm:$0xff]  ;;  %v10636_v6 = vpop.eup %10635  ;;  %v3932_v24 = vmul.f32 %v10634_v9, %v12622_v23  ;;  %10659 = vrcp.f32 %v3874_v27  ;;  %v12750_v51 = vadd.f32 %v12534_v46, %v3716_v18  ;;  %10055 = vmatprep.mubr.msk.f32.mxu1 %vm3957_vm2, %v12742_v16  ;;  %v3837_v1 = vmul.f32 1.442695, %v3785_v45  ;;  %v3275_v11 = vpop.f32.mrf.mxu1 }
 0x1fe   : > { %v10043_v57 = vpop.f32.mrf.mxu0  ;;  %10105 = vmatprep.mubr.msk.f32.mxu0 %vm3957_vm2, %v12744_v62  ;;  %v10638_v23 = vpop.eup %10637  ;;  %4018 = vst.msk [vmem:[#allocation2 + $0x49] sm:$0xff] %vm3957_vm2, %v3929_v12  ;;  %v3873_v48 = vadd.f32 1.0, %v10636_v6  ;;  %10661 = vpow2.f32 %v3839_v63  ;;  %v3788_v33 = vsub.f32 0.0, %v12740_v59  ;;  %10056 = vmatmul.mubr.msk.f32.gmra.mxu1 %vm3957_vm2, %v12757_v37  ;;  %v12774_v49 = vadd.f32 %v12534_v46, %v3719_v7 }
 0x1ff   : > { %10106 = vmatmul.mubr.msk.f32.gmra.mxu0 %vm3957_vm2, %v12746_v54  ;;  %v10640_v8 = vpop.eup %10639  ;;  %4021 = vst.msk [vmem:[#allocation2 + $0x69] sm:$0xff] %vm3957_vm2, %v3932_v24  ;;  %v3931_v22 = vmul.f32 %v10638_v23, %v12632_v13  ;;  %v3787_v44 = vsub.f32 0.0, %v12750_v51  ;;  %v3718_v61 = vadd.f32 %v3655_v30, %v3328_v38  ;;  %v3331_v26 = vadd.f32 %v9993_v32, %v12453_v50  ;;  %v9996_v36 = vpop.f32.mrf.mxu1  ;;  %v12790_v50 = vld [vmem:[#allocation2 + $0x39] sm:$0xff] }
 0x200   : > { %v3665_v52 = vpop.f32.mrf.mxu0  ;;  %v10642_v60 = vpop.eup %10641  ;;  %10663 = vrcp.f32 %v3873_v48  ;;  %v3876_v40 = vadd.f32 1.0, %v10640_v8  ;;  %v3843_v25 = vmul.f32 1.442695, %v3788_v33  ;;  %v12778_v58 = vld [vmem:[#allocation2 + $0x31] sm:$0xff]  ;;  %v3790_v56 = vsub.f32 0.0, %v12774_v49 }
 0x201   : > { %v12780_v15 = vld [vmem:[#allocation2 + $0x30] sm:$0xff]  ;;  %v12782_v13 = vld [vmem:[#allocation2 + $0x38] sm:$0xff]  ;;  %v10644_v21 = vpop.eup %10643  ;;  %4020 = vst.msk [vmem:[#allocation2 + $0x61] sm:$0xff] %vm3957_vm2, %v3931_v22  ;;  %v3875_v34 = vadd.f32 1.0, %v10642_v60  ;;  %10665 = vpow2.f32 %v3837_v1  ;;  %v3841_v30 = vmul.f32 1.442695, %v3787_v44  ;;  %10058 = vmatprep.mubr.msk.f32.mxu1 %vm3957_vm2, %v12778_v58  ;;  %v12794_v18 = vadd.f32 %v12534_v46, %v3718_v61  ;;  %v3285_v12 = vpop.f32.mrf.mxu1 }
 0x202   : > { %v10046_v19 = vpop.f32.mrf.mxu0  ;;  %10108 = vmatprep.mubr.msk.f32.mxu0 %vm3957_vm2, %v12780_v15  ;;  %v10646_v27 = vpop.eup %10645  ;;  %v3934_v63 = vmul.f32 %v10644_v21, %v12641_v42  ;;  %10667 = vrcp.f32 %v3876_v40  ;;  %v3721_v9 = vadd.f32 %v10043_v57, %v3331_v26  ;;  %10059 = vmatmul.mubr.msk.f32.gmra.mxu1 %vm3957_vm2, %v12790_v50  ;;  %v3847_v32 = vmul.f32 1.442695, %v3790_v56 }
 0x203   : > { %10109 = vmatmul.mubr.msk.f32.gmra.mxu0 %vm3957_vm2, %v12782_v13  ;;  %v10648_v45 = vpop.eup %10647  ;;  %10669 = vrcp.f32 %v3875_v34  ;;  %v3878_v7 = vadd.f32 1.0, %v10646_v27  ;;  %v3330_v6 = vadd.f32 %v3275_v11, %v12655_v31  ;;  %v3789_v57 = vsub.f32 0.0, %v12794_v18  ;;  %v9999_v48 = vpop.f32.mrf.mxu1 }
 0x204   : > { %v10650_v24 = vpop.eup %10649  ;;  %4023 = vst.msk [vmem:[#allocation2 + $0x81] sm:$0xff] %vm3957_vm2, %v3934_v63  ;;  %v3933_v42 = vmul.f32 %v10648_v45, %v12652_v2  ;;  %10671 = vpow2.f32 %v3843_v25  ;;  %v12805_v38 = vadd.f32 %v12534_v46, %v3721_v9  ;;  %v3675_v23 = vpop.f32.mrf.mxu0  ;;  %v3333_v22 = vadd.f32 %v9996_v36, %v12481_v43 }
 0x205   : > { %v10652_v1 = vpop.eup %10651  ;;  %10673 = vrcp.f32 %v3878_v7  ;;  %v3877_v33 = vadd.f32 1.0, %v10650_v24  ;;  %v3720_v8 = vadd.f32 %v3665_v52, %v3330_v6  ;;  %v12808_v31 = vld [vmem:[#allocation2 + $0x49] sm:$0xff]  ;;  %v3845_v60 = vmul.f32 1.442695, %v3789_v57  ;;  %v12821_v52 = vld [vmem:[#allocation2 + $0x51] sm:$0xff]  ;;  %v3295_v21 = vpop.f32.mrf.mxu1 }
 0x206   : > { %v12810_v11 = vld [vmem:[#allocation2 + $0x48] sm:$0xff]  ;;  %v12812_v44 = vld [vmem:[#allocation2 + $0x50] sm:$0xff]  ;;  %v10654_v2 = vpop.eup %10653  ;;  %4022 = vst.msk [vmem:[#allocation2 + $0x79] sm:$0xff] %vm3957_vm2, %v3933_v42  ;;  %v3936_v61 = vmul.f32 %v10652_v1, %v12665_v29  ;;  %10675 = vpow2.f32 %v3841_v30  ;;  %v3792_v40 = vsub.f32 0.0, %v12805_v38  ;;  %10061 = vmatprep.mubr.msk.f32.mxu1 %vm3957_vm2, %v12808_v31  ;;  %v10049_v43 = vpop.f32.mrf.mxu0  ;;  %v3723_v29 = vadd.f32 %v10046_v19, %v3333_v22 }
 0x207   : > { %14890 = vst [vmem:[#allocation7_spill] sm:$0xff] %v12810_v11  ;;  %14891 = vst [vmem:[#allocation8_spill] sm:$0xff] %v12812_v44  ;;  %10111 = vmatprep.mubr.msk.f32.mxu0 %vm3957_vm2, %v12810_v11  ;;  %v10656_v25 = vpop.eup %10655  ;;  %10677 = vrcp.f32 %v3877_v33  ;;  %v3880_v26 = vadd.f32 1.0, %v10654_v2  ;;  %v12824_v36 = vadd.f32 %v12534_v46, %v3720_v8  ;;  %10062 = vmatmul.mubr.msk.f32.gmra.mxu1 %vm3957_vm2, %v12821_v52  ;;  %v12850_v42 = vld [vmem:[#allocation2 + $0x69] sm:$0xff] }
 0x208   : > { %10112 = vmatmul.mubr.msk.f32.gmra.mxu0 %vm3957_vm2, %v12812_v44  ;;  %v10658_v34 = vpop.eup %10657  ;;  %4025 = vst.msk [vmem:[#allocation2 + $0x99] sm:$0xff] %vm3957_vm2, %v3936_v61  ;;  %v3935_v30 = vmul.f32 %v10656_v25, %v12671_v0  ;;  %10679 = vpow2.f32 %v3847_v32  ;;  %v3851_v56 = vmul.f32 1.442695, %v3792_v40  ;;  %v3332_v27 = vadd.f32 %v3285_v12, %v12658_v4  ;;  %v12833_v63 = vld [vmem:[#allocation2 + $0x61] sm:$0xff]  ;;  %v3685_v24 = vpop.f32.mrf.mxu0 }
 0x209   : > { %v12835_v9 = vld [vmem:[#allocation2 + $0x60] sm:$0xff]  ;;  %v12837_v19 = vld [vmem:[#allocation2 + $0x68] sm:$0xff]  ;;  %10681 = vrcp.f32 %v3880_v26  ;;  %v3879_v45 = vadd.f32 1.0, %v10658_v34  ;;  %v3791_v7 = vsub.f32 0.0, %v12824_v36  ;;  %v12841_v6 = vadd.f32 %v12534_v46, %v3723_v29  ;;  %10064 = vmatprep.mubr.msk.f32.mxu1 %vm3957_vm2, %v12833_v63 }
 0x20a   : > { %14892 = vst [vmem:[#allocation9_spill] sm:$0xff] %v12835_v9  ;;  %14893 = vst [vmem:[#allocation10_spill] sm:$0xff] %v12837_v19  ;;  %10114 = vmatprep.mubr.msk.f32.mxu0 %vm3957_vm2, %v12835_v9  ;;  %v10660_v4 = vpop.eup %10659  ;;  %10683 = vpow2.f32 %v3845_v60  ;;  %v3722_v0 = vadd.f32 %v3675_v23, %v3332_v27  ;;  %v3335_v12 = vadd.f32 %v9999_v48, %v12514_v3 }
 0x20b   : > { %4024 = vst.msk [vmem:[#allocation2 + $0x91] sm:$0xff] %vm3957_vm2, %v3935_v30  ;;  %v3334_v32 = vadd.f32 %v3295_v21, %v12689_v47  ;;  %v10662_v57 = vpop.eup %10661  ;;  %v3938_v1 = vmul.f32 %v10660_v4, %v12676_v35  ;;  %10685 = vrcp.f32 %v3879_v45  ;;  %v3849_v33 = vmul.f32 1.442695, %v3791_v7  ;;  %10065 = vmatmul.mubr.msk.f32.gmra.mxu1 %vm3957_vm2, %v12850_v42  ;;  %v12877_v29 = vld [vmem:[#allocation2 + $0x81] sm:$0xff] }
 0x20c   : > { %v3794_v8 = vsub.f32 0.0, %v12841_v6  ;;  %10115 = vmatmul.mubr.msk.f32.gmra.mxu0 %vm3957_vm2, %v12837_v19  ;;  %v3882_v23 = vadd.f32 1.0, %v10662_v57  ;;  %10687 = vpow2.f32 %v3851_v56  ;;  %v12859_v3 = vadd.f32 %v12534_v46, %v3722_v0 }
 0x20d   : > { %v3725_v47 = vadd.f32 %v10049_v43, %v3335_v12  ;;  %v10664_v48 = vpop.eup %10663  ;;  %4027 = vst.msk [vmem:[#allocation2 + $0xb1] sm:$0xff] %vm3957_vm2, %v3938_v1  ;;  %10689 = vpow2.f32 %v3849_v33  ;;  %v3724_v22 = vadd.f32 %v3685_v24, %v3334_v32  ;;  %v12862_v2 = vld [vmem:[#allocation2 + $0x79] sm:$0xff] }
 0x20e   : > { %v3855_v35 = vmul.f32 1.442695, %v3794_v8  ;;  %v12864_v61 = vld [vmem:[#allocation2 + $0x78] sm:$0xff]  ;;  %v12866_v60 = vld [vmem:[#allocation2 + $0x80] sm:$0xff]  ;;  %v10666_v40 = vpop.eup %10665  ;;  %v3937_v25 = vmul.f32 %v10664_v48, %v12679_v53  ;;  %10691 = vrcp.f32 %v3882_v23  ;;  %v3793_v26 = vsub.f32 0.0, %v12859_v3  ;;  %10067 = vmatprep.mubr.msk.f32.mxu1 %vm3957_vm2, %v12862_v2 }
 0x20f   : > { %14894 = vst [vmem:[#allocation11_spill] sm:$0xff] %v12864_v61  ;;  %14895 = vst [vmem:[#allocation12_spill] sm:$0xff] %v12866_v60  ;;  %v12871_v43 = vadd.f32 %v12534_v46, %v3725_v47  ;;  %10117 = vmatprep.mubr.msk.f32.mxu0 %vm3957_vm2, %v12864_v61  ;;  %v10668_v21 = vpop.eup %10667  ;;  %v3881_v34 = vadd.f32 1.0, %v10666_v40  ;;  %v12880_v30 = vadd.f32 %v12534_v46, %v3724_v22  ;;  %10068 = vmatmul.mubr.msk.f32.gmra.mxu1 %vm3957_vm2, %v12877_v29 }
 0x210   : > { %10693 = vpow2.f32 %v3855_v35  ;;  %10118 = vmatmul.mubr.msk.f32.gmra.mxu0 %vm3957_vm2, %v12866_v60  ;;  %v10670_v53 = vpop.eup %10669  ;;  %4026 = vst.msk [vmem:[#allocation2 + $0xa9] sm:$0xff] %vm3957_vm2, %v3937_v25  ;;  %v3940_v56 = vmul.f32 %v10668_v21, %v12685_v39  ;;  %v3853_v27 = vmul.f32 1.442695, %v3793_v26 }
 0x211   : > { %v3796_v45 = vsub.f32 0.0, %v12871_v43  ;;  %v10672_v7 = vpop.eup %10671  ;;  %v3939_v4 = vmul.f32 %v10670_v53, %v12694_v20  ;;  %10695 = vrcp.f32 %v3881_v34  ;;  %v3795_v46 = vsub.f32 0.0, %v12880_v30  ;;  %v12902_v20 = vld [vmem:[#allocation2 + $0x99] sm:$0xff] }
 0x212   : > { %v12891_v0 = vld [vmem:[#allocation2 + $0x91] sm:$0xff]  ;;  %v10674_v24 = vpop.eup %10673  ;;  %4029 = vst.msk [vmem:[#allocation2 + $0xc9] sm:$0xff] %vm3957_vm2, %v3940_v56  ;;  %v3884_v57 = vadd.f32 1.0, %v10672_v7  ;;  %10697 = vpow2.f32 %v3853_v27 }
 0x213   : > { %v12893_v12 = vld [vmem:[#allocation2 + $0x90] sm:$0xff]  ;;  %v12895_v32 = vld [vmem:[#allocation2 + $0x98] sm:$0xff]  ;;  %v3859_v39 = vmul.f32 1.442695, %v3796_v45  ;;  %10070 = vmatprep.mubr.msk.f32.mxu1 %vm3957_vm2, %v12891_v0  ;;  %v10676_v1 = vpop.eup %10675  ;;  %4028 = vst.msk [vmem:[#allocation2 + $0xc1] sm:$0xff] %vm3957_vm2, %v3939_v4  ;;  %v3942_v33 = vmul.f32 %v10674_v24, %v12697_v5 }
 0x214   : > { %14896 = vst [vmem:[#allocation16_spill] sm:$0xff] %v12893_v12  ;;  %14897 = vst [vmem:[#allocation18_spill] sm:$0xff] %v12895_v32  ;;  %10120 = vmatprep.mubr.msk.f32.mxu0 %vm3957_vm2, %v12893_v12  ;;  %v3857_v8 = vmul.f32 1.442695, %v3795_v46  ;;  %10071 = vmatmul.mubr.msk.f32.gmra.mxu1 %vm3957_vm2, %v12902_v20  ;;  %v10678_v23 = vpop.eup %10677  ;;  %10699 = vrcp.f32 %v3884_v57  ;;  %v3883_v47 = vadd.f32 1.0, %v10676_v1 }
 0x215   : > { %10121 = vmatmul.mubr.msk.f32.gmra.mxu0 %vm3957_vm2, %v12895_v32  ;;  %v10680_v48 = vpop.eup %10679  ;;  %4031 = vst.msk [vmem:[#allocation2 + $0xe1] sm:$0xff] %vm3957_vm2, %v3942_v33  ;;  %v3941_v35 = vmul.f32 %v10678_v23, %v12704_v28  ;;  %10701 = vpow2.f32 %v3859_v39  ;;  %v12924_v28 = vld [vmem:[#allocation2 + $0xb1] sm:$0xff] }
 0x216   : > { %v10682_v22 = vpop.eup %10681  ;;  %10703 = vrcp.f32 %v3883_v47  ;;  %v3886_v40 = vadd.f32 1.0, %v10680_v48 }
 0x217   : > { %v10684_v5 = vpop.eup %10683  ;;  %4030 = vst.msk [vmem:[#allocation2 + $0xd9] sm:$0xff] %vm3957_vm2, %v3941_v35  ;;  %v3944_v25 = vmul.f32 %v10682_v22, %v12709_v14  ;;  %10705 = vpow2.f32 %v3857_v8  ;;  %v12914_v26 = vld [vmem:[#allocation2 + $0xa9] sm:$0xff] }
 0x218   : > { %v12916_v21 = vld [vmem:[#allocation2 + $0xa8] sm:$0xff]  ;;  %v12918_v34 = vld [vmem:[#allocation2 + $0xb0] sm:$0xff]  ;;  %v10686_v53 = vpop.eup %10685  ;;  %10707 = vrcp.f32 %v3886_v40  ;;  %v3885_v56 = vadd.f32 1.0, %v10684_v5  ;;  %10073 = vmatprep.mubr.msk.f32.mxu1 %vm3957_vm2, %v12914_v26 }
 0x219   : > { %14898 = vst [vmem:[#allocation27_spill] sm:$0xff] %v12916_v21  ;;  %14899 = vst [vmem:[#allocation34_spill] sm:$0xff] %v12918_v34  ;;  %10123 = vmatprep.mubr.msk.f32.mxu0 %vm3957_vm2, %v12916_v21  ;;  %v10688_v27 = vpop.eup %10687  ;;  %v3943_v14 = vmul.f32 %v10686_v53, %v12714_v41  ;;  %10074 = vmatmul.mubr.msk.f32.gmra.mxu1 %vm3957_vm2, %v12924_v28  ;;  %v12944_v33 = vld [vmem:[#allocation2 + $0xc9] sm:$0xff] }
 0x21a   : > { %4033 = vst.msk [vmem:[#allocation2 + $0xf9] sm:$0xff] %vm3957_vm2, %v3944_v25  ;;  %10124 = vmatmul.mubr.msk.f32.gmra.mxu0 %vm3957_vm2, %v12918_v34  ;;  %v10690_v45 = vpop.eup %10689  ;;  %10709 = vrcp.f32 %v3885_v56  ;;  %v3888_v7 = vadd.f32 1.0, %v10688_v27  ;;  %v12932_v4 = vld [vmem:[#allocation2 + $0xc1] sm:$0xff] }
 0x21b   : > { %v12934_v46 = vld [vmem:[#allocation2 + $0xc0] sm:$0xff]  ;;  %v12936_v24 = vld [vmem:[#allocation2 + $0xc8] sm:$0xff]  ;;  %v10692_v57 = vpop.eup %10691  ;;  %4032 = vst.msk [vmem:[#allocation2 + $0xf1] sm:$0xff] %vm3957_vm2, %v3943_v14  ;;  %v3887_v39 = vadd.f32 1.0, %v10690_v45  ;;  %10076 = vmatprep.mubr.msk.f32.mxu1 %vm3957_vm2, %v12932_v4 }
 0x21c   : > { %14900 = vst [vmem:[#allocation13_spill] sm:$0xff] %v12934_v46  ;;  %14901 = vst [vmem:[#allocation15_spill] sm:$0xff] %v12936_v24  ;;  %10126 = vmatprep.mubr.msk.f32.mxu0 %vm3957_vm2, %v12934_v46  ;;  %v3946_v1 = vmul.f32 %v10692_v57, %v12725_v10  ;;  %10711 = vrcp.f32 %v3888_v7  ;;  %v12962_v5 = vld [vmem:[#allocation2 + $0xe1] sm:$0xff] }
 0x21d   : > { %v10694_v41 = vpop.eup %10693  ;;  %10713 = vrcp.f32 %v3887_v39  ;;  %10077 = vmatmul.mubr.msk.f32.gmra.mxu1 %vm3957_vm2, %v12944_v33 }
 0x21e   : > { %v3890_v8 = vadd.f32 1.0, %v10694_v41  ;;  %10127 = vmatmul.mubr.msk.f32.gmra.mxu0 %vm3957_vm2, %v12936_v24  ;;  %v10696_v23 = vpop.eup %10695  ;;  %4035 = vst.msk [vmem:[#allocation2 + $0x111] sm:$0xff] %vm3957_vm2, %v3946_v1  ;;  %v12951_v47 = vld [vmem:[#allocation2 + $0xd9] sm:$0xff] }
 0x21f   : > { %v12953_v48 = vld [vmem:[#allocation2 + $0xd8] sm:$0xff]  ;;  %v12955_v35 = vld [vmem:[#allocation2 + $0xe0] sm:$0xff]  ;;  %v10698_v10 = vpop.eup %10697  ;;  %v3945_v22 = vmul.f32 %v10696_v23, %v12734_v17  ;;  %10079 = vmatprep.mubr.msk.f32.mxu1 %vm3957_vm2, %v12951_v47 }
 0x220   : > { %14902 = vst [vmem:[#allocation29_spill] sm:$0xff] %v12953_v48  ;;  %14903 = vst [vmem:[#allocation31_spill] sm:$0xff] %v12955_v35  ;;  %10715 = vrcp.f32 %v3890_v8  ;;  %10129 = vmatprep.mubr.msk.f32.mxu0 %vm3957_vm2, %v12953_v48  ;;  %v3889_v40 = vadd.f32 1.0, %v10698_v10 }
 0x221   : > { %v10700_v25 = vpop.eup %10699  ;;  %4034 = vst.msk [vmem:[#allocation2 + $0x109] sm:$0xff] %vm3957_vm2, %v3945_v22  ;;  %10080 = vmatmul.mubr.msk.f32.gmra.mxu1 %vm3957_vm2, %v12962_v5  ;;  %v12982_v39 = vld [vmem:[#allocation2 + $0xf9] sm:$0xff] }
 0x222   : > { %10130 = vmatmul.mubr.msk.f32.gmra.mxu0 %vm3957_vm2, %v12955_v35  ;;  %v10702_v17 = vpop.eup %10701  ;;  %v3948_v53 = vmul.f32 %v10700_v25, %v12740_v59  ;;  %10717 = vrcp.f32 %v3889_v40  ;;  %v12970_v56 = vld [vmem:[#allocation2 + $0xf1] sm:$0xff] }
 0x223   : > { %v12972_v27 = vld [vmem:[#allocation2 + $0xf0] sm:$0xff]  ;;  %v12974_v14 = vld [vmem:[#allocation2 + $0xf8] sm:$0xff]  ;;  %v10704_v45 = vpop.eup %10703  ;;  %v3892_v7 = vadd.f32 1.0, %v10702_v17  ;;  %10082 = vmatprep.mubr.msk.f32.mxu1 %vm3957_vm2, %v12970_v56 }
 0x224   : > { %14904 = vst [vmem:[#allocation19_spill] sm:$0xff] %v12972_v27  ;;  %14905 = vst [vmem:[#allocation38_spill] sm:$0xff] %v12974_v14  ;;  %10132 = vmatprep.mubr.msk.f32.mxu0 %vm3957_vm2, %v12972_v27  ;;  %v10706_v57 = vpop.eup %10705  ;;  %v3947_v59 = vmul.f32 %v10704_v45, %v12750_v51 }
 0x225   : > { %4037 = vst.msk [vmem:[#allocation2 + $0x129] sm:$0xff] %vm3957_vm2, %v3948_v53  ;;  %v10708_v41 = vpop.eup %10707  ;;  %10719 = vrcp.f32 %v3892_v7  ;;  %v3891_v1 = vadd.f32 1.0, %v10706_v57  ;;  %10083 = vmatmul.mubr.msk.f32.gmra.mxu1 %vm3957_vm2, %v12982_v39 }
 0x226   : > { %10133 = vmatmul.mubr.msk.f32.gmra.mxu0 %vm3957_vm2, %v12974_v14  ;;  %4036 = vst.msk [vmem:[#allocation2 + $0x121] sm:$0xff] %vm3957_vm2, %v3947_v59  ;;  %v3950_v8 = vmul.f32 %v10708_v41, %v12774_v49  ;;  %v13002_v49 = vld [vmem:[#allocation2 + $0x111] sm:$0xff] }
 0x227   : > { %v10710_v23 = vpop.eup %10709  ;;  %10721 = vrcp.f32 %v3891_v1 }
 0x228   : > { %4039 = vst.msk [vmem:[#allocation2 + $0x141] sm:$0xff] %vm3957_vm2, %v3950_v8  ;;  %v3949_v51 = vmul.f32 %v10710_v23, %v12794_v18  ;;  %v12992_v10 = vld [vmem:[#allocation2 + $0x109] sm:$0xff] }
 0x229   : > { %v12994_v22 = vld [vmem:[#allocation2 + $0x108] sm:$0xff]  ;;  %v12996_v40 = vld [vmem:[#allocation2 + $0x110] sm:$0xff]  ;;  %v10712_v25 = vpop.eup %10711  ;;  %10085 = vmatprep.mubr.msk.f32.mxu1 %vm3957_vm2, %v12992_v10 }
 0x22a   : > { %14906 = vst [vmem:[#allocation17_spill] sm:$0xff] %v12994_v22  ;;  %14907 = vst [vmem:[#allocation40_spill] sm:$0xff] %v12996_v40  ;;  %10135 = vmatprep.mubr.msk.f32.mxu0 %vm3957_vm2, %v12994_v22  ;;  %v10714_v17 = vpop.eup %10713  ;;  %v3952_v18 = vmul.f32 %v10712_v25, %v12805_v38  ;;  %10086 = vmatmul.mubr.msk.f32.gmra.mxu1 %vm3957_vm2, %v13002_v49 }
 0x22b   : > { %4038 = vst.msk [vmem:[#allocation2 + $0x139] sm:$0xff] %vm3957_vm2, %v3949_v51  ;;  %10136 = vmatmul.mubr.msk.f32.gmra.mxu0 %vm3957_vm2, %v12996_v40  ;;  %v3951_v53 = vmul.f32 %v10714_v17, %v12824_v36 }
 0x22c   : > { %4041 = vst.msk [vmem:[#allocation2 + $0x159] sm:$0xff] %vm3957_vm2, %v3952_v18  ;;  %v13024_v36 = vld [vmem:[#allocation2 + $0x129] sm:$0xff] }
 0x22d   : > { %v10716_v45 = vpop.eup %10715  ;;  %4040 = vst.msk [vmem:[#allocation2 + $0x151] sm:$0xff] %vm3957_vm2, %v3951_v53  ;;  %v13014_v57 = vld [vmem:[#allocation2 + $0x121] sm:$0xff] }
 0x22e   : > { %v3954_v7 = vmul.f32 %v10716_v45, %v12841_v6  ;;  %v13016_v59 = vld [vmem:[#allocation2 + $0x120] sm:$0xff]  ;;  %v13018_v38 = vld [vmem:[#allocation2 + $0x128] sm:$0xff]  ;;  %10088 = vmatprep.mubr.msk.f32.mxu1 %vm3957_vm2, %v13014_v57 }
 0x22f   : > { %14908 = vst [vmem:[#allocation20_spill] sm:$0xff] %v13016_v59  ;;  %14909 = vst [vmem:[#allocation42_spill] sm:$0xff] %v13018_v38  ;;  %10138 = vmatprep.mubr.msk.f32.mxu0 %vm3957_vm2, %v13016_v59  ;;  %v10718_v41 = vpop.eup %10717  ;;  %10089 = vmatmul.mubr.msk.f32.gmra.mxu1 %vm3957_vm2, %v13024_v36  ;;  %v13043_v25 = vld [vmem:[#allocation2 + $0x141] sm:$0xff] }
 0x230   : > { %4043 = vst.msk [vmem:[#allocation2 + $0x171] sm:$0xff] %vm3957_vm2, %v3954_v7  ;;  %10139 = vmatmul.mubr.msk.f32.gmra.mxu0 %vm3957_vm2, %v13018_v38  ;;  %v3953_v6 = vmul.f32 %v10718_v41, %v12859_v3  ;;  %v4755_v41 = vld [vmem:[#allocation2 + $0x2] sm:$0xff] }
 0x232   : > { %v13032_v1 = vld [vmem:[#allocation2 + $0x139] sm:$0xff]  ;;  %v10720_v51 = vpop.eup %10719  ;;  %4042 = vst.msk [vmem:[#allocation2 + $0x169] sm:$0xff] %vm3957_vm2, %v3953_v6 }
 0x233   : > { %v13034_v8 = vld [vmem:[#allocation2 + $0x138] sm:$0xff]  ;;  %v13036_v23 = vld [vmem:[#allocation2 + $0x140] sm:$0xff]  ;;  %10091 = vmatprep.mubr.msk.f32.mxu1 %vm3957_vm2, %v13032_v1  ;;  %v3956_v17 = vmul.f32 %v10720_v51, %v12871_v43 }
 0x234   : > { %14910 = vst [vmem:[#allocation44_spill] sm:$0xff] %v13034_v8  ;;  %14911 = vst [vmem:[#allocation33_spill] sm:$0xff] %v13036_v23  ;;  %10141 = vmatprep.mubr.msk.f32.mxu0 %vm3957_vm2, %v13034_v8  ;;  %10092 = vmatmul.mubr.msk.f32.gmra.mxu1 %vm3957_vm2, %v13043_v25  ;;  %v10722_v3 = vpop.eup %10721  ;;  %v13050_v18 = vld [vmem:[#allocation2 + $0x151] sm:$0xff]  ;;  %v13062_v43 = vld [vmem:[#allocation2 + $0x159] sm:$0xff] }
 0x235   : > { %10142 = vmatmul.mubr.msk.f32.gmra.mxu0 %vm3957_vm2, %v13036_v23  ;;  %v13052_v53 = vld [vmem:[#allocation2 + $0x150] sm:$0xff]  ;;  %v13054_v45 = vld [vmem:[#allocation2 + $0x158] sm:$0xff]  ;;  %4045 = vst.msk [vmem:[#allocation2 + $0x189] sm:$0xff] %vm3957_vm2, %v3956_v17  ;;  %v3955_v7 = vmul.f32 %v10722_v3, %v12880_v30  ;;  %10094 = vmatprep.mubr.msk.f32.mxu1 %vm3957_vm2, %v13050_v18  ;;  %14914 = vst [vmem:[#allocation48_spill] sm:$0xff] %v13062_v43 }
 0x236   : > { %14912 = vst [vmem:[#allocation21_spill] sm:$0xff] %v13052_v53  ;;  %14913 = vst [vmem:[#allocation46_spill] sm:$0xff] %v13054_v45  ;;  %10144 = vmatprep.mubr.msk.f32.mxu0 %vm3957_vm2, %v13052_v53  ;;  %v4756_v3 = vld [vmem:[#allocation2 + $0xa] sm:$0xff] }
 0x237   : > { %4044 = vst.msk [vmem:[#allocation2 + $0x181] sm:$0xff] %vm3957_vm2, %v3955_v7  ;;  %v13079_v17 = vld [vmem:[#allocation2 + $0x171] sm:$0xff] }
 0x238   : > { %10095 = vmatmul.mubr.msk.f32.gmra.mxu1 %vm3957_vm2, %v13062_v43  ;;  %14917 = vst [vmem:[#allocation6_spill] sm:$0xff] %v13079_v17  ;;  %v10104_v43 = vpop.f32.mrf.mxu0 }
 0x239   : > { %10145 = vmatmul.mubr.msk.f32.gmra.mxu0 %vm3957_vm2, %v13054_v45  ;;  %v13069_v6 = vld [vmem:[#allocation2 + $0x169] sm:$0xff] }
 0x23a   : > { %14915 = vst [vmem:[#allocation37_spill] sm:$0xff] %v13069_v6  ;;  %v13071_v30 = vld [vmem:[#allocation2 + $0x168] sm:$0xff]  ;;  %v13073_v51 = vld [vmem:[#allocation2 + $0x170] sm:$0xff]  ;;  %10097 = vmatprep.mubr.msk.f32.mxu1 %vm3957_vm2, %v13069_v6  ;;  %v10054_v7 = vpop.f32.mrf.mxu1  ;;  %v13091_v6 = vld [vmem:[#allocation2 + $0x1a] sm:$0xff] }
 0x23b   : > { %14916 = vst [vmem:[#allocation35_spill] sm:$0xff] %v13071_v30  ;;  %10147 = vmatprep.mubr.msk.f32.mxu0 %vm3957_vm2, %v13071_v30 }
 0x23c   : > { %10098 = vmatmul.mubr.msk.f32.gmra.mxu1 %vm3957_vm2, %v13079_v17  ;;  %v13096_v17 = vld [vmem:[%s14569_s3 + $0x30] sm:$0xff] }
 0x23d   : > { %10148 = vmatmul.mubr.msk.f32.gmra.mxu0 %vm3957_vm2, %v13073_v51  ;;  %10152 = vmatprep.mubr.msk.f32.mxu1 %vm3957_vm2, %v4755_v41  ;;  %v13103_v41 = vadd.f32 %v10104_v43, %v10054_v7  ;;  %v13121_v43 = vld [vmem:[#allocation2 + $0x32] sm:$0xff]  ;;  %v13133_v7 = vld [vmem:[#allocation2 + $0x4a] sm:$0xff] }
 0x23e   : > { %10202 = vmatprep.mubr.msk.f32.mxu0 %vm3957_vm2, %v12744_v62  ;;  %v13101_v62 = vld [vmem:[%s14569_s3 + $0x38] sm:$0xff] }
 0x23f   : > { %14918 = vst [vmem:[#allocation14_spill] sm:$0xff] %v13103_v41  ;;  %v13145_v41 = vld [vmem:[#allocation2 + $0x62] sm:$0xff] }
 0x240   : > { %10153 = vmatmul.mubr.msk.f32.vlgmr.msra.gmra.mxu1 %vm3957_vm2, %v4756_v3  ;;  %v10851_v3 = vld [vmem:[%s14569_s3 + $0x20] sm:$0xff] }
 0x241   : > { %10203 = vmatmul.mubr.msk.f32.vlgmr.msra.gmra.mxu0 %vm3957_vm2, %v12746_v54  ;;  %10251 = vmatpush3.msra.mxu1 %v10851_v3  ;;  %v13113_v54 = vld [vmem:[#allocation2 + $0x22] sm:$0xff]  ;;  %v13139_v3 = vld [vmem:[#allocation2 + $0x52] sm:$0xff] }
 0x242   : > { %10155 = vmatprep.mubr.msk.f32.mxu1 %vm3957_vm2, %v13091_v6  ;;  %10205 = vmatprep.mubr.msk.f32.mxu0 %vm3957_vm2, %v12780_v15 }
 0x243   : > { %10301 = vmatpush3.msra.mxu0 %v12762_v55  ;;  %10350 = vmatprep.subr.mxu1 %v13096_v17  ;;  %v13127_v55 = vld [vmem:[#allocation2 + $0x3a] sm:$0xff] }
 0x244   : > { %10400 = vmatprep.subr.mxu0 %v13101_v62  ;;  %10156 = vmatmul.mubr.msk.f32.gmra.mxu1 %vm3957_vm2, %v13113_v54 }
 0x245   : > { %10206 = vmatmul.mubr.msk.f32.gmra.mxu0 %vm3957_vm2, %v12782_v13  ;;  %10158 = vmatprep.mubr.msk.f32.mxu1 %vm3957_vm2, %v13121_v43 }
 0x246   : > { %10208 = vmatprep.mubr.msk.f32.mxu0 %vm3957_vm2, %v12810_v11  ;;  %v13279_v11 = vld [vmem:[#allocation2 + $0x180] sm:$0xff] }
 0x247   : > { %14919 = vst [vmem:[#allocation22_spill] sm:$0xff] %v13279_v11 }
 0x248   : > { %10159 = vmatmul.mubr.msk.f32.gmra.mxu1 %vm3957_vm2, %v13127_v55 }
 0x249   : > { %10209 = vmatmul.mubr.msk.f32.gmra.mxu0 %vm3957_vm2, %v12812_v44  ;;  %10161 = vmatprep.mubr.msk.f32.mxu1 %vm3957_vm2, %v13133_v7  ;;  %v13151_v44 = vld [vmem:[#allocation2 + $0x6a] sm:$0xff] }
 0x24a   : > { %10211 = vmatprep.mubr.msk.f32.mxu0 %vm3957_vm2, %v12835_v9  ;;  %v13157_v9 = vld [vmem:[#allocation2 + $0x7a] sm:$0xff] }
 0x24c   : > { %10162 = vmatmul.mubr.msk.f32.gmra.mxu1 %vm3957_vm2, %v13139_v3 }
 0x24d   : > { %10212 = vmatmul.mubr.msk.f32.gmra.mxu0 %vm3957_vm2, %v12837_v19  ;;  %10164 = vmatprep.mubr.msk.f32.mxu1 %vm3957_vm2, %v13145_v41  ;;  %v13163_v19 = vld [vmem:[#allocation2 + $0x82] sm:$0xff] }
 0x24e   : > { %10214 = vmatprep.mubr.msk.f32.mxu0 %vm3957_vm2, %v12864_v61  ;;  %v13169_v61 = vld [vmem:[#allocation2 + $0x92] sm:$0xff] }
 0x250   : > { %10165 = vmatmul.mubr.msk.f32.gmra.mxu1 %vm3957_vm2, %v13151_v44 }
 0x251   : > { %10215 = vmatmul.mubr.msk.f32.gmra.mxu0 %vm3957_vm2, %v12866_v60  ;;  %10167 = vmatprep.mubr.msk.f32.mxu1 %vm3957_vm2, %v13157_v9  ;;  %v13175_v60 = vld [vmem:[#allocation2 + $0x9a] sm:$0xff] }
 0x252   : > { %10217 = vmatprep.mubr.msk.f32.mxu0 %vm3957_vm2, %v12893_v12  ;;  %v13181_v12 = vld [vmem:[#allocation2 + $0xaa] sm:$0xff] }
 0x254   : > { %10168 = vmatmul.mubr.msk.f32.gmra.mxu1 %vm3957_vm2, %v13163_v19 }
 0x255   : > { %10218 = vmatmul.mubr.msk.f32.gmra.mxu0 %vm3957_vm2, %v12895_v32  ;;  %10170 = vmatprep.mubr.msk.f32.mxu1 %vm3957_vm2, %v13169_v61  ;;  %v13187_v32 = vld [vmem:[#allocation2 + $0xb2] sm:$0xff] }
 0x256   : > { %10220 = vmatprep.mubr.msk.f32.mxu0 %vm3957_vm2, %v12916_v21  ;;  %v13193_v21 = vld [vmem:[#allocation2 + $0xc2] sm:$0xff] }
 0x258   : > { %10171 = vmatmul.mubr.msk.f32.gmra.mxu1 %vm3957_vm2, %v13175_v60 }
 0x259   : > { %10221 = vmatmul.mubr.msk.f32.gmra.mxu0 %vm3957_vm2, %v12918_v34  ;;  %10173 = vmatprep.mubr.msk.f32.mxu1 %vm3957_vm2, %v13181_v12  ;;  %v13199_v34 = vld [vmem:[#allocation2 + $0xca] sm:$0xff] }
 0x25a   : > { %10223 = vmatprep.mubr.msk.f32.mxu0 %vm3957_vm2, %v12934_v46  ;;  %v13205_v46 = vld [vmem:[#allocation2 + $0xda] sm:$0xff] }
 0x25c   : > { %10174 = vmatmul.mubr.msk.f32.gmra.mxu1 %vm3957_vm2, %v13187_v32 }
 0x25d   : > { %10224 = vmatmul.mubr.msk.f32.gmra.mxu0 %vm3957_vm2, %v12936_v24  ;;  %10176 = vmatprep.mubr.msk.f32.mxu1 %vm3957_vm2, %v13193_v21  ;;  %v13211_v24 = vld [vmem:[#allocation2 + $0xe2] sm:$0xff] }
 0x25e   : > { %10226 = vmatprep.mubr.msk.f32.mxu0 %vm3957_vm2, %v12953_v48  ;;  %v13217_v48 = vld [vmem:[#allocation2 + $0xf2] sm:$0xff] }
 0x260   : > { %10177 = vmatmul.mubr.msk.f32.gmra.mxu1 %vm3957_vm2, %v13199_v34 }
 0x261   : > { %10227 = vmatmul.mubr.msk.f32.gmra.mxu0 %vm3957_vm2, %v12955_v35  ;;  %10179 = vmatprep.mubr.msk.f32.mxu1 %vm3957_vm2, %v13205_v46  ;;  %v13223_v35 = vld [vmem:[#allocation2 + $0xfa] sm:$0xff] }
 0x262   : > { %10229 = vmatprep.mubr.msk.f32.mxu0 %vm3957_vm2, %v12972_v27  ;;  %v13229_v27 = vld [vmem:[#allocation2 + $0x10a] sm:$0xff] }
 0x264   : > { %10180 = vmatmul.mubr.msk.f32.gmra.mxu1 %vm3957_vm2, %v13211_v24 }
 0x265   : > { %10230 = vmatmul.mubr.msk.f32.gmra.mxu0 %vm3957_vm2, %v12974_v14  ;;  %10182 = vmatprep.mubr.msk.f32.mxu1 %vm3957_vm2, %v13217_v48  ;;  %v13235_v14 = vld [vmem:[#allocation2 + $0x112] sm:$0xff] }
 0x266   : > { %10232 = vmatprep.mubr.msk.f32.mxu0 %vm3957_vm2, %v12994_v22  ;;  %v13241_v22 = vld [vmem:[#allocation2 + $0x122] sm:$0xff] }
 0x268   : > { %10183 = vmatmul.mubr.msk.f32.gmra.mxu1 %vm3957_vm2, %v13223_v35 }
 0x269   : > { %10233 = vmatmul.mubr.msk.f32.gmra.mxu0 %vm3957_vm2, %v12996_v40  ;;  %10185 = vmatprep.mubr.msk.f32.mxu1 %vm3957_vm2, %v13229_v27  ;;  %v13247_v40 = vld [vmem:[#allocation2 + $0x12a] sm:$0xff] }
 0x26a   : > { %10235 = vmatprep.mubr.msk.f32.mxu0 %vm3957_vm2, %v13016_v59  ;;  %v13253_v59 = vld [vmem:[#allocation2 + $0x13a] sm:$0xff] }
 0x26c   : > { %10186 = vmatmul.mubr.msk.f32.gmra.mxu1 %vm3957_vm2, %v13235_v14 }
 0x26d   : > { %10236 = vmatmul.mubr.msk.f32.gmra.mxu0 %vm3957_vm2, %v13018_v38  ;;  %10188 = vmatprep.mubr.msk.f32.mxu1 %vm3957_vm2, %v13241_v22  ;;  %v13259_v38 = vld [vmem:[#allocation2 + $0x142] sm:$0xff] }
 0x26e   : > { %10238 = vmatprep.mubr.msk.f32.mxu0 %vm3957_vm2, %v13034_v8  ;;  %v13265_v8 = vld [vmem:[#allocation2 + $0x152] sm:$0xff] }
 0x270   : > { %10189 = vmatmul.mubr.msk.f32.gmra.mxu1 %vm3957_vm2, %v13247_v40 }
 0x271   : > { %10239 = vmatmul.mubr.msk.f32.gmra.mxu0 %vm3957_vm2, %v13036_v23  ;;  %10191 = vmatprep.mubr.msk.f32.mxu1 %vm3957_vm2, %v13253_v59  ;;  %v13271_v23 = vld [vmem:[#allocation2 + $0x15a] sm:$0xff] }
 0x272   : > { %10241 = vmatprep.mubr.msk.f32.mxu0 %vm3957_vm2, %v13052_v53  ;;  %v13277_v53 = vld [vmem:[#allocation2 + $0x16a] sm:$0xff] }
 0x274   : > { %10192 = vmatmul.mubr.msk.f32.gmra.mxu1 %vm3957_vm2, %v13259_v38 }
 0x275   : > { %10242 = vmatmul.mubr.msk.f32.gmra.mxu0 %vm3957_vm2, %v13054_v45  ;;  %10194 = vmatprep.mubr.msk.f32.mxu1 %vm3957_vm2, %v13265_v8  ;;  %v13285_v45 = vld [vmem:[#allocation2 + $0x172] sm:$0xff] }
 0x276   : > { %10244 = vmatprep.mubr.msk.f32.mxu0 %vm3957_vm2, %v13071_v30  ;;  %v13287_v30 = vld [vmem:[#allocation2 + $0x188] sm:$0xff] }
 0x278   : > { %10195 = vmatmul.mubr.msk.f32.gmra.mxu1 %vm3957_vm2, %v13271_v23 }
 0x279   : > { %10245 = vmatmul.mubr.msk.f32.gmra.mxu0 %vm3957_vm2, %v13073_v51  ;;  %10197 = vmatprep.mubr.msk.f32.mxu1 %vm3957_vm2, %v13277_v53 }
 0x27a   : > { %10247 = vmatprep.mubr.msk.f32.mxu0 %vm3957_vm2, %v13279_v11  ;;  %v13304_v11 = vld [vmem:[%s14569_s3 + $0x40] sm:$0xff] }
 0x27c   : > { %10198 = vmatmul.mubr.msk.f32.gmra.mxu1 %vm3957_vm2, %v13285_v45 }
 0x27d   : > { %10248 = vmatmul.mubr.msk.f32.gmra.mxu0 %vm3957_vm2, %v13287_v30  ;;  %10252 = vmatprep.mubr.msk.f32.mxu1 %vm3957_vm2, %v12742_v16  ;;  %v14920_v16 = vld [vmem:[#allocation48_spill] sm:$0xff] }
 0x27e   : > { %10302 = vmatprep.mubr.msk.f32.mxu0 %vm3957_vm2, %v13091_v6 }
 0x280   : > { %10253 = vmatmul.mubr.msk.f32.vlgmr.msra.gmra.mxu1 %vm3957_vm2, %v12757_v37  ;;  %v14921_v37 = vld [vmem:[#allocation37_spill] sm:$0xff] }
 0x281   : > { %10303 = vmatmul.mubr.msk.f32.vlgmr.msra.gmra.mxu0 %vm3957_vm2, %v13113_v54  ;;  %10351 = vmatpush3.msra.mxu1 %v13096_v17 }
 0x282   : > { %10255 = vmatprep.mubr.msk.f32.mxu1 %vm3957_vm2, %v12778_v58  ;;  %10305 = vmatprep.mubr.msk.f32.mxu0 %vm3957_vm2, %v13121_v43 }
 0x283   : > { %10401 = vmatpush3.msra.mxu0 %v13101_v62  ;;  %10450 = vmatprep.subr.mxu1 %v13304_v11 }
 0x284   : > { %10256 = vmatmul.mubr.msk.f32.gmra.mxu1 %vm3957_vm2, %v12790_v50 }
 0x285   : > { %10306 = vmatmul.mubr.msk.f32.gmra.mxu0 %vm3957_vm2, %v13127_v55  ;;  %10258 = vmatprep.mubr.msk.f32.mxu1 %vm3957_vm2, %v12808_v31 }
 0x286   : > { %10308 = vmatprep.mubr.msk.f32.mxu0 %vm3957_vm2, %v13133_v7 }
 0x288   : > { %10259 = vmatmul.mubr.msk.f32.gmra.mxu1 %vm3957_vm2, %v12821_v52 }
 0x289   : > { %10309 = vmatmul.mubr.msk.f32.gmra.mxu0 %vm3957_vm2, %v13139_v3  ;;  %10261 = vmatprep.mubr.msk.f32.mxu1 %vm3957_vm2, %v12833_v63 }
 0x28a   : > { %10311 = vmatprep.mubr.msk.f32.mxu0 %vm3957_vm2, %v13145_v41 }
 0x28c   : > { %10262 = vmatmul.mubr.msk.f32.gmra.mxu1 %vm3957_vm2, %v12850_v42 }
 0x28d   : > { %10312 = vmatmul.mubr.msk.f32.gmra.mxu0 %vm3957_vm2, %v13151_v44  ;;  %10264 = vmatprep.mubr.msk.f32.mxu1 %vm3957_vm2, %v12862_v2 }
 0x28e   : > { %10314 = vmatprep.mubr.msk.f32.mxu0 %vm3957_vm2, %v13157_v9 }
 0x290   : > { %10265 = vmatmul.mubr.msk.f32.gmra.mxu1 %vm3957_vm2, %v12877_v29 }
 0x291   : > { %10315 = vmatmul.mubr.msk.f32.gmra.mxu0 %vm3957_vm2, %v13163_v19  ;;  %10267 = vmatprep.mubr.msk.f32.mxu1 %vm3957_vm2, %v12891_v0 }
 0x292   : > { %10317 = vmatprep.mubr.msk.f32.mxu0 %vm3957_vm2, %v13169_v61 }
 0x294   : > { %10268 = vmatmul.mubr.msk.f32.gmra.mxu1 %vm3957_vm2, %v12902_v20 }
 0x295   : > { %10318 = vmatmul.mubr.msk.f32.gmra.mxu0 %vm3957_vm2, %v13175_v60  ;;  %10270 = vmatprep.mubr.msk.f32.mxu1 %vm3957_vm2, %v12914_v26 }
 0x296   : > { %10320 = vmatprep.mubr.msk.f32.mxu0 %vm3957_vm2, %v13181_v12 }
 0x298   : > { %10271 = vmatmul.mubr.msk.f32.gmra.mxu1 %vm3957_vm2, %v12924_v28 }
 0x299   : > { %10321 = vmatmul.mubr.msk.f32.gmra.mxu0 %vm3957_vm2, %v13187_v32  ;;  %10273 = vmatprep.mubr.msk.f32.mxu1 %vm3957_vm2, %v12932_v4 }
 0x29a   : > { %10323 = vmatprep.mubr.msk.f32.mxu0 %vm3957_vm2, %v13193_v21 }
 0x29c   : > { %10274 = vmatmul.mubr.msk.f32.gmra.mxu1 %vm3957_vm2, %v12944_v33 }
 0x29d   : > { %10324 = vmatmul.mubr.msk.f32.gmra.mxu0 %vm3957_vm2, %v13199_v34  ;;  %10276 = vmatprep.mubr.msk.f32.mxu1 %vm3957_vm2, %v12951_v47 }
 0x29e   : > { %10326 = vmatprep.mubr.msk.f32.mxu0 %vm3957_vm2, %v13205_v46 }
 0x2a0   : > { %10277 = vmatmul.mubr.msk.f32.gmra.mxu1 %vm3957_vm2, %v12962_v5 }
 0x2a1   : > { %10327 = vmatmul.mubr.msk.f32.gmra.mxu0 %vm3957_vm2, %v13211_v24  ;;  %10279 = vmatprep.mubr.msk.f32.mxu1 %vm3957_vm2, %v12970_v56 }
 0x2a2   : > { %10329 = vmatprep.mubr.msk.f32.mxu0 %vm3957_vm2, %v13217_v48 }
 0x2a4   : > { %10280 = vmatmul.mubr.msk.f32.gmra.mxu1 %vm3957_vm2, %v12982_v39 }
 0x2a5   : > { %10330 = vmatmul.mubr.msk.f32.gmra.mxu0 %vm3957_vm2, %v13223_v35  ;;  %10282 = vmatprep.mubr.msk.f32.mxu1 %vm3957_vm2, %v12992_v10 }
 0x2a6   : > { %10332 = vmatprep.mubr.msk.f32.mxu0 %vm3957_vm2, %v13229_v27 }
 0x2a8   : > { %10283 = vmatmul.mubr.msk.f32.gmra.mxu1 %vm3957_vm2, %v13002_v49 }
 0x2a9   : > { %10333 = vmatmul.mubr.msk.f32.gmra.mxu0 %vm3957_vm2, %v13235_v14  ;;  %10285 = vmatprep.mubr.msk.f32.mxu1 %vm3957_vm2, %v13014_v57  ;;  %v14922_v14 = vld [vmem:[#allocation6_spill] sm:$0xff] }
 0x2aa   : > { %10335 = vmatprep.mubr.msk.f32.mxu0 %vm3957_vm2, %v13241_v22 }
 0x2ac   : > { %10286 = vmatmul.mubr.msk.f32.gmra.mxu1 %vm3957_vm2, %v13024_v36 }
 0x2ad   : > { %10336 = vmatmul.mubr.msk.f32.gmra.mxu0 %vm3957_vm2, %v13247_v40  ;;  %10288 = vmatprep.mubr.msk.f32.mxu1 %vm3957_vm2, %v13032_v1  ;;  %v13421_v40 = vld [vmem:[#allocation2 + $0x181] sm:$0xff] }
 0x2ae   : > { %10338 = vmatprep.mubr.msk.f32.mxu0 %vm3957_vm2, %v13253_v59  ;;  %v13423_v59 = vld [vmem:[#allocation2 + $0x182] sm:$0xff] }
 0x2af   : > { %14923 = vst [vmem:[#allocation50_spill] sm:$0xff] %v13423_v59 }
 0x2b0   : > { %10289 = vmatmul.mubr.msk.f32.gmra.mxu1 %vm3957_vm2, %v13043_v25 }
 0x2b1   : > { %10339 = vmatmul.mubr.msk.f32.gmra.mxu0 %vm3957_vm2, %v13259_v38  ;;  %10291 = vmatprep.mubr.msk.f32.mxu1 %vm3957_vm2, %v13050_v18  ;;  %v13429_v38 = vld [vmem:[#allocation2 + $0x189] sm:$0xff] }
 0x2b2   : > { %10341 = vmatprep.mubr.msk.f32.mxu0 %vm3957_vm2, %v13265_v8  ;;  %v13431_v8 = vld [vmem:[#allocation2 + $0x18a] sm:$0xff] }
 0x2b3   : > { %14924 = vst [vmem:[#allocation39_spill] sm:$0xff] %v13431_v8 }
 0x2b4   : > { %10292 = vmatmul.mubr.msk.f32.gmra.mxu1 %vm3957_vm2, %v14920_v16 }
 0x2b5   : > { %10342 = vmatmul.mubr.msk.f32.gmra.mxu0 %vm3957_vm2, %v13271_v23  ;;  %10294 = vmatprep.mubr.msk.f32.mxu1 %vm3957_vm2, %v14921_v37  ;;  %v13441_v23 = vpop.f32.mrf.mxu1 }
 0x2b6   : > { %10344 = vmatprep.mubr.msk.f32.mxu0 %vm3957_vm2, %v13277_v53  ;;  %14925 = vst [vmem:[#allocation52_spill] sm:$0xff] %v13441_v23  ;;  %v13443_v53 = vpop.f32.mrf.mxu0 }
 0x2b7   : > { %14926 = vst [vmem:[#allocation23_spill] sm:$0xff] %v13443_v53 }
 0x2b8   : > { %10295 = vmatmul.mubr.msk.f32.gmra.mxu1 %vm3957_vm2, %v14922_v14 }
 0x2b9   : > { %10345 = vmatmul.mubr.msk.f32.gmra.mxu0 %vm3957_vm2, %v13285_v45  ;;  %10297 = vmatprep.mubr.msk.f32.mxu1 %vm3957_vm2, %v13421_v40 }
 0x2ba   : > { %10347 = vmatprep.mubr.msk.f32.mxu0 %vm3957_vm2, %v13423_v59 }
 0x2bc   : > { %10298 = vmatmul.mubr.msk.f32.gmra.mxu1 %vm3957_vm2, %v13429_v38 }
 0x2bd   : > { %10348 = vmatmul.mubr.msk.f32.gmra.mxu0 %vm3957_vm2, %v13431_v8  ;;  %10352 = vmatprep.mubr.msk.f32.mxu1 %vm3957_vm2, %v12780_v15  ;;  %v14927_v15 = vld [vmem:[#allocation7_spill] sm:$0xff] }
 0x2be   : > { %10402 = vmatprep.mubr.msk.f32.mxu0 %vm3957_vm2, %v12778_v58  ;;  %v10057_v45 = vpop.f32.mrf.mxu1 }
 0x2bf   : > { %v10107_v6 = vpop.f32.mrf.mxu0 }
 0x2c0   : > { %10353 = vmatmul.mubr.msk.f32.vlgmr.msra.gmra.mxu1 %vm3957_vm2, %v12782_v13  ;;  %v13449_v17 = vadd.f32 %v10107_v6, %v10057_v45  ;;  %v4285_v58 = vpop.f32.mrf.mxu1  ;;  %v14928_v13 = vld [vmem:[#allocation8_spill] sm:$0xff] }
 0x2c1   : > { %10403 = vmatmul.mubr.msk.f32.vlgmr.msra.gmra.mxu0 %vm3957_vm2, %v12790_v50  ;;  %10451 = vmatpush3.msra.mxu1 %v13304_v11  ;;  %v4606_v62 = vpop.f32.mrf.mxu0  ;;  %v14929_v11 = vld [vmem:[#allocation9_spill] sm:$0xff] }
 0x2c2   : > { %10355 = vmatprep.mubr.msk.f32.mxu1 %vm3957_vm2, %v14927_v15  ;;  %10405 = vmatprep.mubr.msk.f32.mxu0 %vm3957_vm2, %v12808_v31  ;;  %v13456_v54 = vadd.f32 %v4606_v62, %v4285_v58  ;;  %v10060_v53 = vpop.f32.mrf.mxu1  ;;  %v14930_v15 = vld [vmem:[#allocation10_spill] sm:$0xff] }
 0x2c3   : > { %v10110_v23 = vpop.f32.mrf.mxu0 }
 0x2c4   : > { %10356 = vmatmul.mubr.msk.f32.gmra.mxu1 %vm3957_vm2, %v14928_v13  ;;  %v13462_v50 = vadd.f32 %v10110_v23, %v10060_v53  ;;  %v4295_v45 = vpop.f32.mrf.mxu1  ;;  %v14931_v23 = vld [vmem:[#allocation11_spill] sm:$0xff] }
 0x2c5   : > { %10406 = vmatmul.mubr.msk.f32.gmra.mxu0 %vm3957_vm2, %v12821_v52  ;;  %10358 = vmatprep.mubr.msk.f32.mxu1 %vm3957_vm2, %v14929_v11  ;;  %v4616_v31 = vpop.f32.mrf.mxu0  ;;  %v14932_v11 = vld [vmem:[#allocation12_spill] sm:$0xff] }
 0x2c6   : > { %10408 = vmatprep.mubr.msk.f32.mxu0 %vm3957_vm2, %v12833_v63  ;;  %v13468_v6 = vadd.f32 %v4616_v31, %v4295_v45  ;;  %v14933_v31 = vld [vmem:[#allocation16_spill] sm:$0xff] }
 0x2c7   : > { %v10063_v58 = vpop.f32.mrf.mxu1 }
 0x2c8   : > { %10359 = vmatmul.mubr.msk.f32.gmra.mxu1 %vm3957_vm2, %v14930_v15  ;;  %v10113_v52 = vpop.f32.mrf.mxu0 }
 0x2c9   : > { %10409 = vmatmul.mubr.msk.f32.gmra.mxu0 %vm3957_vm2, %v12850_v42  ;;  %10361 = vmatprep.mubr.msk.f32.mxu1 %vm3957_vm2, %v14931_v23  ;;  %v13478_v53 = vadd.f32 %v10113_v52, %v10063_v58  ;;  %v4305_v63 = vpop.f32.mrf.mxu1  ;;  %v14934_v23 = vld [vmem:[#allocation18_spill] sm:$0xff] }
 0x2ca   : > { %10411 = vmatprep.mubr.msk.f32.mxu0 %vm3957_vm2, %v12862_v2  ;;  %v4626_v62 = vpop.f32.mrf.mxu0 }
 0x2cb   : > { %v13480_v13 = vadd.f32 %v4626_v62, %v4305_v63  ;;  %v10066_v42 = vpop.f32.mrf.mxu1  ;;  %v14935_v62 = vld [vmem:[#allocation27_spill] sm:$0xff] }
 0x2cc   : > { %10362 = vmatmul.mubr.msk.f32.gmra.mxu1 %vm3957_vm2, %v14932_v11  ;;  %v10116_v45 = vpop.f32.mrf.mxu0 }
 0x2cd   : > { %10412 = vmatmul.mubr.msk.f32.gmra.mxu0 %vm3957_vm2, %v12877_v29  ;;  %10364 = vmatprep.mubr.msk.f32.mxu1 %vm3957_vm2, %v14933_v31  ;;  %v13490_v2 = vadd.f32 %v10116_v45, %v10066_v42  ;;  %v4315_v15 = vpop.f32.mrf.mxu1  ;;  %v14936_v31 = vld [vmem:[#allocation34_spill] sm:$0xff] }
 0x2ce   : > { %10414 = vmatprep.mubr.msk.f32.mxu0 %vm3957_vm2, %v12891_v0  ;;  %v4636_v58 = vpop.f32.mrf.mxu0 }
 0x2cf   : > { %v13492_v52 = vadd.f32 %v4636_v58, %v4315_v15  ;;  %v10069_v29 = vpop.f32.mrf.mxu1  ;;  %v14937_v58 = vld [vmem:[#allocation13_spill] sm:$0xff] }
 0x2d0   : > { %10365 = vmatmul.mubr.msk.f32.gmra.mxu1 %vm3957_vm2, %v14934_v23  ;;  %v10119_v63 = vpop.f32.mrf.mxu0 }
 0x2d1   : > { %10415 = vmatmul.mubr.msk.f32.gmra.mxu0 %vm3957_vm2, %v12902_v20  ;;  %10367 = vmatprep.mubr.msk.f32.mxu1 %vm3957_vm2, %v14935_v62  ;;  %v13502_v0 = vadd.f32 %v10119_v63, %v10069_v29  ;;  %v4325_v11 = vpop.f32.mrf.mxu1  ;;  %v14938_v62 = vld [vmem:[#allocation15_spill] sm:$0xff] }
 0x2d2   : > { %10417 = vmatprep.mubr.msk.f32.mxu0 %vm3957_vm2, %v12914_v26  ;;  %v4646_v42 = vpop.f32.mrf.mxu0 }
 0x2d3   : > { %v13504_v45 = vadd.f32 %v4646_v42, %v4325_v11 }
 0x2d4   : > { %10368 = vmatmul.mubr.msk.f32.gmra.mxu1 %vm3957_vm2, %v14936_v31  ;;  %v10072_v20 = vpop.f32.mrf.mxu1  ;;  %v14940_v31 = vld [vmem:[#allocation31_spill] sm:$0xff] }
 0x2d5   : > { %10418 = vmatmul.mubr.msk.f32.gmra.mxu0 %vm3957_vm2, %v12924_v28  ;;  %v10122_v15 = vpop.f32.mrf.mxu0  ;;  %10370 = vmatprep.mubr.msk.f32.mxu1 %vm3957_vm2, %v14937_v58  ;;  %v14939_v28 = vld [vmem:[#allocation29_spill] sm:$0xff]  ;;  %v14941_v58 = vld [vmem:[#allocation19_spill] sm:$0xff] }
 0x2d6   : > { %10420 = vmatprep.mubr.msk.f32.mxu0 %vm3957_vm2, %v12932_v4  ;;  %v13514_v26 = vadd.f32 %v10122_v15, %v10072_v20  ;;  %v4335_v23 = vpop.f32.mrf.mxu1 }
 0x2d7   : > { %v4656_v29 = vpop.f32.mrf.mxu0 }
 0x2d8   : > { %v13516_v63 = vadd.f32 %v4656_v29, %v4335_v23  ;;  %10371 = vmatmul.mubr.msk.f32.gmra.mxu1 %vm3957_vm2, %v14938_v62  ;;  %v14942_v62 = vld [vmem:[#allocation38_spill] sm:$0xff] }
 0x2d9   : > { %10421 = vmatmul.mubr.msk.f32.gmra.mxu0 %vm3957_vm2, %v12944_v33  ;;  %10373 = vmatprep.mubr.msk.f32.mxu1 %vm3957_vm2, %v14939_v28  ;;  %v10075_v11 = vpop.f32.mrf.mxu1 }
 0x2da   : > { %10423 = vmatprep.mubr.msk.f32.mxu0 %vm3957_vm2, %v12951_v47  ;;  %v10125_v4 = vpop.f32.mrf.mxu0 }
 0x2db   : > { %v13526_v42 = vadd.f32 %v10125_v4, %v10075_v11  ;;  %v4345_v20 = vpop.f32.mrf.mxu1  ;;  %v14943_v11 = vld [vmem:[#allocation17_spill] sm:$0xff] }
 0x2dc   : > { %10374 = vmatmul.mubr.msk.f32.gmra.mxu1 %vm3957_vm2, %v14940_v31  ;;  %v4666_v15 = vpop.f32.mrf.mxu0 }
 0x2dd   : > { %10424 = vmatmul.mubr.msk.f32.gmra.mxu0 %vm3957_vm2, %v12962_v5  ;;  %10376 = vmatprep.mubr.msk.f32.mxu1 %vm3957_vm2, %v14941_v58  ;;  %v13536_v33 = vadd.f32 %v4666_v15, %v4345_v20  ;;  %v10078_v47 = vpop.f32.mrf.mxu1  ;;  %v14944_v20 = vld [vmem:[#allocation40_spill] sm:$0xff] }
 0x2de   : > { %10426 = vmatprep.mubr.msk.f32.mxu0 %vm3957_vm2, %v12970_v56  ;;  %v10128_v23 = vpop.f32.mrf.mxu0  ;;  %v14945_v58 = vld [vmem:[#allocation20_spill] sm:$0xff] }
 0x2df   : > { %v13538_v29 = vadd.f32 %v10128_v23, %v10078_v47  ;;  %v13544_v5 = vpop.f32.mrf.mxu1 }
 0x2e0   : > { %10377 = vmatmul.mubr.msk.f32.gmra.mxu1 %vm3957_vm2, %v14942_v62  ;;  %v13546_v28 = vpop.f32.mrf.mxu0  ;;  %v14946_v62 = vld [vmem:[#allocation42_spill] sm:$0xff] }
 0x2e1   : > { %10427 = vmatmul.mubr.msk.f32.gmra.mxu0 %vm3957_vm2, %v12982_v39  ;;  %10379 = vmatprep.mubr.msk.f32.mxu1 %vm3957_vm2, %v14943_v11  ;;  %v10081_v56 = vpop.f32.mrf.mxu1 }
 0x2e2   : > { %10429 = vmatprep.mubr.msk.f32.mxu0 %vm3957_vm2, %v12992_v10  ;;  %v10131_v4 = vpop.f32.mrf.mxu0 }
 0x2e3   : > { %v13552_v31 = vadd.f32 %v10131_v4, %v10081_v56  ;;  %v13558_v39 = vpop.f32.mrf.mxu1  ;;  %v14947_v56 = vld [vmem:[#allocation44_spill] sm:$0xff] }
 0x2e4   : > { %10380 = vmatmul.mubr.msk.f32.gmra.mxu1 %vm3957_vm2, %v14944_v20  ;;  %v13560_v15 = vpop.f32.mrf.mxu0 }
 0x2e5   : > { %10430 = vmatmul.mubr.msk.f32.gmra.mxu0 %vm3957_vm2, %v13002_v49  ;;  %10382 = vmatprep.mubr.msk.f32.mxu1 %vm3957_vm2, %v14945_v58  ;;  %v10084_v10 = vpop.f32.mrf.mxu1  ;;  %v14948_v58 = vld [vmem:[#allocation33_spill] sm:$0xff] }
 0x2e6   : > { %10432 = vmatprep.mubr.msk.f32.mxu0 %vm3957_vm2, %v13014_v57  ;;  %v10134_v47 = vpop.f32.mrf.mxu0 }
 0x2e7   : > { %v13566_v23 = vadd.f32 %v10134_v47, %v10084_v10  ;;  %v13572_v49 = vpop.f32.mrf.mxu1 }
 0x2e8   : > { %10383 = vmatmul.mubr.msk.f32.gmra.mxu1 %vm3957_vm2, %v14946_v62  ;;  %v13574_v11 = vpop.f32.mrf.mxu0 }
 0x2e9   : > { %10433 = vmatmul.mubr.msk.f32.gmra.mxu0 %vm3957_vm2, %v13024_v36  ;;  %10385 = vmatprep.mubr.msk.f32.mxu1 %vm3957_vm2, %v14947_v56  ;;  %v14949_v36 = vld [vmem:[#allocation21_spill] sm:$0xff]  ;;  %v14950_v56 = vld [vmem:[#allocation46_spill] sm:$0xff] }
 0x2ea   : > { %10435 = vmatprep.mubr.msk.f32.mxu0 %vm3957_vm2, %v13032_v1  ;;  %v10087_v57 = vpop.f32.mrf.mxu1 }
 0x2eb   : > { %v10137_v4 = vpop.f32.mrf.mxu0 }
 0x2ec   : > { %v13580_v20 = vadd.f32 %v10137_v4, %v10087_v57  ;;  %10386 = vmatmul.mubr.msk.f32.gmra.mxu1 %vm3957_vm2, %v14948_v58  ;;  %v13590_v10 = vpop.f32.mrf.mxu1 }
 0x2ed   : > { %10436 = vmatmul.mubr.msk.f32.gmra.mxu0 %vm3957_vm2, %v13043_v25  ;;  %10388 = vmatprep.mubr.msk.f32.mxu1 %vm3957_vm2, %v14949_v36  ;;  %v13592_v47 = vpop.f32.mrf.mxu0  ;;  %v14951_v25 = vld [vmem:[#allocation35_spill] sm:$0xff] }
 0x2ee   : > { %10438 = vmatprep.mubr.msk.f32.mxu0 %vm3957_vm2, %v13050_v18 }
 0x2ef   : > { %v10090_v1 = vpop.f32.mrf.mxu1 }
 0x2f0   : > { %v10140_v62 = vpop.f32.mrf.mxu0  ;;  %10389 = vmatmul.mubr.msk.f32.gmra.mxu1 %vm3957_vm2, %v14950_v56  ;;  %v6334_v56 = vld [vmem:[#allocation2 + $0x198] sm:$0xff] }
 0x2f1   : > { %10439 = vmatmul.mubr.msk.f32.gmra.mxu0 %vm3957_vm2, %v14920_v16  ;;  %v13598_v57 = vadd.f32 %v10140_v62, %v10090_v1  ;;  %10391 = vmatprep.mubr.msk.f32.mxu1 %vm3957_vm2, %v14951_v25  ;;  %v13604_v18 = vpop.f32.mrf.mxu1  ;;  %v14953_v1 = vld [vmem:[#allocation22_spill] sm:$0xff]  ;;  %v6721_v25 = vld [vmem:[#allocation2 + $0x199] sm:$0xff] }
 0x2f2   : > { %10441 = vmatprep.mubr.msk.f32.mxu0 %vm3957_vm2, %v14921_v37  ;;  %v13606_v4 = vpop.f32.mrf.mxu0 }
 0x2f4   : > { %v10093_v58 = vpop.f32.mrf.mxu1  ;;  %10392 = vmatmul.mubr.msk.f32.gmra.mxu1 %vm3957_vm2, %v13073_v51 }
 0x2f5   : > { %v10143_v36 = vpop.f32.mrf.mxu0  ;;  %10442 = vmatmul.mubr.msk.f32.gmra.mxu0 %vm3957_vm2, %v14922_v14  ;;  %10394 = vmatprep.mubr.msk.f32.mxu1 %vm3957_vm2, %v14953_v1  ;;  %v6335_v14 = vld [vmem:[#allocation2 + $0x1a0] sm:$0xff] }
 0x2f6   : > { %v13612_v16 = vadd.f32 %v10143_v36, %v10093_v58  ;;  %10444 = vmatprep.mubr.msk.f32.mxu0 %vm3957_vm2, %v13421_v40  ;;  %v13618_v37 = vpop.f32.mrf.mxu1  ;;  %v6722_v40 = vld [vmem:[#allocation2 + $0x1a1] sm:$0xff] }
 0x2f7   : > { %v13620_v62 = vpop.f32.mrf.mxu0 }
 0x2f8   : > { %14952 = vst [vmem:[#allocation54_spill] sm:$0xff] %v13612_v16  ;;  %v10096_v8 = vpop.f32.mrf.mxu1  ;;  %10395 = vmatmul.mubr.msk.f32.gmra.mxu1 %vm3957_vm2, %v13287_v30 }
 0x2f9   : > { %v10146_v59 = vpop.f32.mrf.mxu0  ;;  %10445 = vmatmul.mubr.msk.f32.gmra.mxu0 %vm3957_vm2, %v13429_v38  ;;  %10397 = vmatprep.mubr.msk.f32.mxu1 %vm3957_vm2, %v6334_v56 }
 0x2fa   : > { %v13626_v51 = vadd.f32 %v10146_v59, %v10096_v8  ;;  %10447 = vmatprep.mubr.msk.f32.mxu0 %vm3957_vm2, %v6721_v25  ;;  %v13630_v58 = vpop.f32.mrf.mxu1  ;;  %v14956_v25 = vld [vmem:[#allocation14_spill] sm:$0xff] }
 0x2fb   : > { %v13632_v36 = vpop.f32.mrf.mxu0 }
 0x2fc   : > { %14954 = vst [vmem:[#allocation36_spill] sm:$0xff] %v13626_v51  ;;  %v10099_v1 = vpop.f32.mrf.mxu1  ;;  %10398 = vmatmul.mubr.msk.f32.gmra.mxu1 %vm3957_vm2, %v6335_v14 }
 0x2fd   : > { %v10149_v16 = vpop.f32.mrf.mxu0  ;;  %10448 = vmatmul.mubr.msk.f32.gmra.mxu0 %vm3957_vm2, %v6722_v40  ;;  %10452 = vmatprep.mubr.msk.f32.mxu1 %vm3957_vm2, %v13121_v43 }
 0x2fe   : > { %v13636_v30 = vadd.f32 %v10149_v16, %v10099_v1  ;;  %v13640_v59 = vpop.f32.mrf.mxu1 }
 0x2ff   : > { %v13642_v38 = vpop.f32.mrf.mxu0 }
 0x300   : > { %14955 = vst [vmem:[#allocation41_spill] sm:$0xff] %v13636_v30  ;;  %v10154_v8 = vpop.f32.mrf.mxu1  ;;  %10453 = vmatmul.mubr.msk.f32.vlgmr.msra.gmra.mxu1 %vm3957_vm2, %v13127_v55 }
 0x301   : > { %v10204_v56 = vpop.f32.mrf.mxu0  ;;  %v5111_v51 = vadd.f32 %v10154_v8, %v14956_v25  ;;  %10455 = vmatprep.mubr.msk.f32.mxu1 %vm3957_vm2, %v13133_v7 }
 0x302   : > { %v13649_v14 = vpop.f32.mrf.mxu1 }
 0x303   : > { %v13651_v16 = vpop.f32.mrf.mxu0  ;;  %v13653_v40 = vadd.f32 %v10204_v56, %v5111_v51 }
 0x304   : > { %v10157_v43 = vpop.f32.mrf.mxu1  ;;  %10456 = vmatmul.mubr.msk.f32.gmra.mxu1 %vm3957_vm2, %v13139_v3 }
 0x305   : > { %v10207_v1 = vpop.f32.mrf.mxu0  ;;  %v5113_v30 = vadd.f32 %v10157_v43, %v13449_v17  ;;  %10458 = vmatprep.mubr.msk.f32.mxu1 %vm3957_vm2, %v13145_v41 }
 0x306   : > { %v4961_v55 = vpop.f32.mrf.mxu1 }
 0x307   : > { %v13660_v8 = vpop.f32.mrf.mxu0  ;;  %v13662_v7 = vadd.f32 %v10207_v1, %v5113_v30  ;;  %v13665_v25 = vadd.f32 %v4961_v55, %v13456_v54 }
 0x308   : > { %v10160_v51 = vpop.f32.mrf.mxu1  ;;  %10459 = vmatmul.mubr.msk.f32.gmra.mxu1 %vm3957_vm2, %v13151_v44 }
 0x309   : > { %v10210_v56 = vpop.f32.mrf.mxu0  ;;  %v5115_v3 = vadd.f32 %v10160_v51, %v13462_v50  ;;  %10461 = vmatprep.mubr.msk.f32.mxu1 %vm3957_vm2, %v13157_v9 }
 0x30a   : > { %v4971_v17 = vpop.f32.mrf.mxu1 }
 0x30b   : > { %v13672_v41 = vpop.f32.mrf.mxu0  ;;  %v13674_v43 = vadd.f32 %v10210_v56, %v5115_v3  ;;  %v13677_v30 = vadd.f32 %v4971_v17, %v13468_v6 }
 0x30c   : > { %v10163_v54 = vpop.f32.mrf.mxu1  ;;  %10462 = vmatmul.mubr.msk.f32.gmra.mxu1 %vm3957_vm2, %v13163_v19 }
 0x30d   : > { %v10213_v1 = vpop.f32.mrf.mxu0  ;;  %v5117_v44 = vadd.f32 %v10163_v54, %v13478_v53  ;;  %10464 = vmatprep.mubr.msk.f32.mxu1 %vm3957_vm2, %v13169_v61 }
 0x30e   : > { %v4981_v50 = vpop.f32.mrf.mxu1 }
 0x30f   : > { %v13684_v9 = vpop.f32.mrf.mxu0  ;;  %v13686_v55 = vadd.f32 %v10213_v1, %v5117_v44  ;;  %v13689_v51 = vadd.f32 %v4981_v50, %v13480_v13 }
 0x310   : > { %v10166_v6 = vpop.f32.mrf.mxu1  ;;  %10465 = vmatmul.mubr.msk.f32.gmra.mxu1 %vm3957_vm2, %v13175_v60 }
 0x311   : > { %v10216_v56 = vpop.f32.mrf.mxu0  ;;  %v5119_v19 = vadd.f32 %v10166_v6, %v13490_v2  ;;  %10467 = vmatprep.mubr.msk.f32.mxu1 %vm3957_vm2, %v13181_v12 }
 0x312   : > { %v4991_v53 = vpop.f32.mrf.mxu1 }
 0x313   : > { %v13696_v61 = vpop.f32.mrf.mxu0  ;;  %v13698_v3 = vadd.f32 %v10216_v56, %v5119_v19  ;;  %v13701_v17 = vadd.f32 %v4991_v53, %v13492_v52 }
 0x314   : > { %v10169_v13 = vpop.f32.mrf.mxu1  ;;  %10468 = vmatmul.mubr.msk.f32.gmra.mxu1 %vm3957_vm2, %v13187_v32 }
 0x315   : > { %v10219_v54 = vpop.f32.mrf.mxu0  ;;  %v5121_v60 = vadd.f32 %v10169_v13, %v13502_v0  ;;  %10470 = vmatprep.mubr.msk.f32.mxu1 %vm3957_vm2, %v13193_v21 }
 0x316   : > { %v5001_v2 = vpop.f32.mrf.mxu1 }
 0x317   : > { %v13708_v12 = vpop.f32.mrf.mxu0  ;;  %v13710_v1 = vadd.f32 %v10219_v54, %v5121_v60  ;;  %v13713_v44 = vadd.f32 %v5001_v2, %v13504_v45 }
 0x318   : > { %v10172_v52 = vpop.f32.mrf.mxu1  ;;  %10471 = vmatmul.mubr.msk.f32.gmra.mxu1 %vm3957_vm2, %v13199_v34 }
 0x319   : > { %v10222_v50 = vpop.f32.mrf.mxu0  ;;  %v5123_v32 = vadd.f32 %v10172_v52, %v13514_v26  ;;  %10473 = vmatprep.mubr.msk.f32.mxu1 %vm3957_vm2, %v13205_v46 }
 0x31a   : > { %v5011_v0 = vpop.f32.mrf.mxu1 }
 0x31b   : > { %v13720_v21 = vpop.f32.mrf.mxu0  ;;  %v13722_v6 = vadd.f32 %v10222_v50, %v5123_v32  ;;  %v13725_v56 = vadd.f32 %v5011_v0, %v13516_v63 }
 0x31c   : > { %v10175_v45 = vpop.f32.mrf.mxu1  ;;  %10474 = vmatmul.mubr.msk.f32.gmra.mxu1 %vm3957_vm2, %v13211_v24  ;;  %v4677_v24 = vadd.f32 %v13546_v28, %v13544_v5 }
 0x31d   : > { %v10225_v19 = vpop.f32.mrf.mxu0  ;;  %v5125_v34 = vadd.f32 %v10175_v45, %v13526_v42  ;;  %10476 = vmatprep.mubr.msk.f32.mxu1 %vm3957_vm2, %v13217_v48 }
 0x31e   : > { %v5021_v26 = vpop.f32.mrf.mxu1 }
 0x31f   : > { %v13732_v46 = vpop.f32.mrf.mxu0  ;;  %v13734_v53 = vadd.f32 %v10225_v19, %v5125_v34  ;;  %v13737_v13 = vadd.f32 %v5021_v26, %v13536_v33  ;;  %v7097_v33 = vld [vmem:[#allocation2 + $0x112] sm:$0xff]  ;;  %v7099_v19 = vld [vmem:[#allocation2 + $0x12a] sm:$0xff] }
 0x320   : > { %v10178_v63 = vpop.f32.mrf.mxu1  ;;  %10477 = vmatmul.mubr.msk.f32.gmra.mxu1 %vm3957_vm2, %v13223_v35  ;;  %v4687_v35 = vadd.f32 %v13560_v15, %v13558_v39  ;;  %v4697_v39 = vadd.f32 %v13574_v11, %v13572_v49  ;;  %v4707_v49 = vadd.f32 %v13592_v47, %v13590_v10  ;;  %v7104_v47 = vld [vmem:[#allocation2 + $0x16a] sm:$0xff] }
 0x321   : > { %v10228_v54 = vpop.f32.mrf.mxu0  ;;  %v5127_v42 = vadd.f32 %v10178_v63, %v13538_v29  ;;  %10479 = vmatprep.mubr.msk.f32.mxu1 %vm3957_vm2, %v13229_v27  ;;  %v7100_v63 = vld [vmem:[#allocation2 + $0x13a] sm:$0xff] }
 0x322   : > { %v5031_v48 = vpop.f32.mrf.mxu1 }
 0x323   : > { %v5418_v60 = vpop.f32.mrf.mxu0  ;;  %v13746_v2 = vadd.f32 %v10228_v54, %v5127_v42  ;;  %v5126_v52 = vadd.f32 %v5031_v48, %v4677_v24  ;;  %v7101_v48 = vld [vmem:[#allocation2 + $0x142] sm:$0xff] }
 0x324   : > { %v10181_v50 = vpop.f32.mrf.mxu1  ;;  %10480 = vmatmul.mubr.msk.f32.gmra.mxu1 %vm3957_vm2, %v7097_v33  ;;  %v7102_v33 = vld [vmem:[#allocation2 + $0x152] sm:$0xff] }
 0x325   : > { %v10231_v32 = vpop.f32.mrf.mxu0  ;;  %v13751_v0 = vadd.f32 %v5418_v60, %v5126_v52  ;;  %v5129_v29 = vadd.f32 %v10181_v50, %v13552_v31  ;;  %10482 = vmatprep.mubr.msk.f32.mxu1 %vm3957_vm2, %v13241_v22  ;;  %v7696_v50 = vld [vmem:[%s14571_s5] sm:$0xff] }
 0x326   : > { %v5041_v27 = vpop.f32.mrf.mxu1  ;;  %10500 = vmatprep.subr.mxu0 %v7696_v50 }
 0x327   : > { %v5428_v5 = vpop.f32.mrf.mxu0  ;;  %v13756_v28 = vadd.f32 %v10231_v32, %v5129_v29  ;;  %v5128_v45 = vadd.f32 %v5041_v27, %v4687_v35  ;;  %10501 = vmatpush3.msra.mxu0 %v7696_v50 }
 0x328   : > { %v10184_v34 = vpop.f32.mrf.mxu1  ;;  %10483 = vmatmul.mubr.msk.f32.gmra.mxu1 %vm3957_vm2, %v7099_v19 }
 0x329   : > { %v10234_v26 = vpop.f32.mrf.mxu0  ;;  %v13761_v15 = vadd.f32 %v5428_v5, %v5128_v45  ;;  %v5131_v31 = vadd.f32 %v10184_v34, %v13566_v23  ;;  %10485 = vmatprep.mubr.msk.f32.mxu1 %vm3957_vm2, %v7100_v63  ;;  %v7103_v5 = vld [vmem:[#allocation2 + $0x15a] sm:$0xff] }
 0x32a   : > { %v5051_v22 = vpop.f32.mrf.mxu1 }
 0x32b   : > { %v5438_v54 = vpop.f32.mrf.mxu0  ;;  %v13765_v24 = vadd.f32 %v10234_v26, %v5131_v31  ;;  %v5130_v42 = vadd.f32 %v5051_v22, %v4697_v39  ;;  %v7105_v22 = vld [vmem:[#allocation2 + $0x172] sm:$0xff] }
 0x32c   : > { %v10187_v60 = vpop.f32.mrf.mxu1  ;;  %10486 = vmatmul.mubr.msk.f32.gmra.mxu1 %vm3957_vm2, %v7101_v48  ;;  %v4727_v48 = vadd.f32 %v13620_v62, %v13618_v37  ;;  %v4737_v37 = vadd.f32 %v13632_v36, %v13630_v58  ;;  %v4747_v58 = vadd.f32 %v13642_v38, %v13640_v59 }
 0x32d   : > { %v10237_v52 = vpop.f32.mrf.mxu0  ;;  %v13770_v11 = vadd.f32 %v5438_v54, %v5130_v42  ;;  %v5133_v23 = vadd.f32 %v10187_v60, %v13580_v20  ;;  %10488 = vmatprep.mubr.msk.f32.mxu1 %vm3957_vm2, %v7102_v33  ;;  %v4717_v20 = vadd.f32 %v13606_v4, %v13604_v18  ;;  %v14957_v4 = vld [vmem:[#allocation54_spill] sm:$0xff] }
 0x32e   : > { %v5061_v32 = vpop.f32.mrf.mxu1 }
 0x32f   : > { %v5448_v35 = vpop.f32.mrf.mxu0  ;;  %v13777_v29 = vadd.f32 %v10237_v52, %v5133_v23  ;;  %v5132_v27 = vadd.f32 %v5061_v32, %v4707_v49  ;;  %v7108_v49 = vld [vmem:[#allocation2 + $0x19a] sm:$0xff] }
 0x330   : > { %v10190_v45 = vpop.f32.mrf.mxu1  ;;  %10489 = vmatmul.mubr.msk.f32.gmra.mxu1 %vm3957_vm2, %v7103_v5  ;;  %v14960_v5 = vld [vmem:[#allocation36_spill] sm:$0xff] }
 0x331   : > { %v10240_v10 = vpop.f32.mrf.mxu0  ;;  %v13782_v19 = vadd.f32 %v5448_v35, %v5132_v27  ;;  %v5135_v34 = vadd.f32 %v10190_v45, %v13598_v57  ;;  %10491 = vmatprep.mubr.msk.f32.mxu1 %vm3957_vm2, %v7104_v47  ;;  %v14958_v57 = vld [vmem:[#allocation50_spill] sm:$0xff]  ;;  %v14959_v27 = vld [vmem:[#allocation39_spill] sm:$0xff] }
 0x332   : > { %v5071_v26 = vpop.f32.mrf.mxu1 }
 0x333   : > { %v5458_v63 = vpop.f32.mrf.mxu0  ;;  %v13786_v39 = vadd.f32 %v10240_v10, %v5135_v34  ;;  %v5134_v31 = vadd.f32 %v5071_v26, %v4717_v20  ;;  %v7109_v10 = vld [vmem:[#allocation2 + $0x1a2] sm:$0xff]  ;;  %v14962_v26 = vld [vmem:[#allocation23_spill] sm:$0xff] }
 0x334   : > { %v10193_v54 = vpop.f32.mrf.mxu1  ;;  %10492 = vmatmul.mubr.msk.f32.gmra.mxu1 %vm3957_vm2, %v7105_v22  ;;  %v14961_v34 = vld [vmem:[#allocation52_spill] sm:$0xff] }
 0x335   : > { %v10243_v42 = vpop.f32.mrf.mxu0  ;;  %v13791_v18 = vadd.f32 %v5458_v63, %v5134_v31  ;;  %v5137_v60 = vadd.f32 %v10193_v54, %v14957_v4  ;;  %10494 = vmatprep.mubr.msk.f32.mxu1 %vm3957_vm2, %v14958_v57  ;;  %v4597_v63 = vadd.f32 %v14962_v26, %v14961_v34  ;;  %v14963_v4 = vld [vmem:[#allocation41_spill] sm:$0xff] }
 0x336   : > { %v5081_v52 = vpop.f32.mrf.mxu1 }
 0x337   : > { %v5468_v33 = vpop.f32.mrf.mxu0  ;;  %v13796_v23 = vadd.f32 %v10243_v42, %v5137_v60  ;;  %v5136_v50 = vadd.f32 %v5081_v52, %v4727_v48  ;;  %v5110_v36 = vadd.f32 %v13649_v14, %v4597_v63  ;;  %v5501_v63 = vadd.f32 %v13672_v41, %v13677_v30 }
 0x338   : > { %v10196_v32 = vpop.f32.mrf.mxu1  ;;  %10495 = vmatmul.mubr.msk.f32.gmra.mxu1 %vm3957_vm2, %v14959_v27 }
 0x339   : > { %v10246_v35 = vpop.f32.mrf.mxu0  ;;  %v13802_v62 = vadd.f32 %v5468_v33, %v5136_v50  ;;  %v5139_v45 = vadd.f32 %v10196_v32, %v14960_v5  ;;  %10497 = vmatprep.mubr.msk.f32.mxu1 %vm3957_vm2, %v7108_v49 }
 0x33a   : > { %v5091_v47 = vpop.f32.mrf.mxu1 }
 0x33b   : > { %v5478_v20 = vpop.f32.mrf.mxu0  ;;  %v13808_v31 = vadd.f32 %v10246_v35, %v5139_v45  ;;  %v5138_v22 = vadd.f32 %v5091_v47, %v4737_v37  ;;  %v5497_v35 = vadd.f32 %v13651_v16, %v5110_v36 }
 0x33c   : > { %v10199_v54 = vpop.f32.mrf.mxu1  ;;  %10498 = vmatmul.mubr.msk.f32.gmra.mxu1 %vm3957_vm2, %v7109_v10  ;;  %v5499_v10 = vadd.f32 %v13660_v8, %v13665_v25 }
 0x33d   : > { %v10249_v42 = vpop.f32.mrf.mxu0  ;;  %v13814_v48 = vadd.f32 %v5478_v20, %v5138_v22  ;;  %v5141_v60 = vadd.f32 %v10199_v54, %v14963_v4 }
 0x33e   : > { %v5101_v57 = vpop.f32.mrf.mxu1 }
 0x33f   : > { %v5488_v52 = vpop.f32.mrf.mxu0  ;;  %v13817_v33 = vadd.f32 %v10249_v42, %v5141_v60  ;;  %v5140_v49 = vadd.f32 %v5101_v57, %v4747_v58  ;;  %v5503_v58 = vadd.f32 %v13684_v9, %v13689_v51  ;;  %v5505_v57 = vadd.f32 %v13696_v61, %v13701_v17 }
 0x340   : > { %v10254_v50 = vpop.f32.mrf.mxu1 }
 0x341   : > { %v13819_v32 = vpop.f32.mrf.mxu0  ;;  %v13822_v27 = vadd.f32 %v5488_v52, %v5140_v49  ;;  %v13825_v59 = vadd.f32 %v10254_v50, %v13653_v40 }
 0x342   : > { %v5725_v38 = vpop.f32.mrf.mxu1 }
 0x343   : > { %v13827_v14 = vpop.f32.mrf.mxu0  ;;  %v13829_v37 = vadd.f32 %v5725_v38, %v5497_v35  ;;  %v5507_v38 = vadd.f32 %v13708_v12, %v13713_v44 }
 0x344   : > { %v10257_v5 = vpop.f32.mrf.mxu1 }
 0x345   : > { %v13831_v45 = vpop.f32.mrf.mxu0  ;;  %v13836_v47 = vadd.f32 %v10257_v5, %v13662_v7 }
 0x346   : > { %v5735_v16 = vpop.f32.mrf.mxu1 }
 0x347   : > { %v13838_v20 = vpop.f32.mrf.mxu0  ;;  %v13840_v34 = vadd.f32 %v5735_v16, %v5499_v10 }
 0x348   : > { %v10260_v40 = vpop.f32.mrf.mxu1 }
 0x349   : > { %v13842_v26 = vpop.f32.mrf.mxu0  ;;  %v13847_v22 = vadd.f32 %v10260_v40, %v13674_v43 }
 0x34a   : > { %v5745_v54 = vpop.f32.mrf.mxu1 }
 0x34b   : > { %v13849_v42 = vpop.f32.mrf.mxu0  ;;  %v13851_v8 = vadd.f32 %v5745_v54, %v5501_v63  ;;  %v5509_v63 = vadd.f32 %v13720_v21, %v13725_v56 }
 0x34c   : > { %v10263_v7 = vpop.f32.mrf.mxu1 }
 0x34d   : > { %v13853_v25 = vpop.f32.mrf.mxu0  ;;  %v13858_v36 = vadd.f32 %v10263_v7, %v13686_v55 }
 0x34e   : > { %v5755_v4 = vpop.f32.mrf.mxu1 }
 0x34f   : > { %v13860_v60 = vpop.f32.mrf.mxu0  ;;  %v13862_v41 = vadd.f32 %v5755_v4, %v5503_v58 }
 0x350   : > { %v10266_v43 = vpop.f32.mrf.mxu1 }
 0x351   : > { %v10316_v30 = vpop.f32.mrf.mxu0  ;;  %v5893_v52 = vadd.f32 %v10266_v43, %v13698_v3  ;;  %v5511_v43 = vadd.f32 %v13732_v46, %v13737_v13 }
 0x352   : > { %v5765_v49 = vpop.f32.mrf.mxu1 }
 0x353   : > { %v13867_v50 = vpop.f32.mrf.mxu0  ;;  %v13869_v35 = vadd.f32 %v10316_v30, %v5893_v52  ;;  %v13871_v9 = vadd.f32 %v5765_v49, %v5505_v57 }
 0x354   : > { %v10269_v55 = vpop.f32.mrf.mxu1 }
 0x355   : > { %v10319_v51 = vpop.f32.mrf.mxu0  ;;  %v5895_v5 = vadd.f32 %v10269_v55, %v13710_v1 }
 0x356   : > { %v5775_v10 = vpop.f32.mrf.mxu1 }
 0x357   : > { %v13876_v16 = vpop.f32.mrf.mxu0  ;;  %v13878_v61 = vadd.f32 %v10319_v51, %v5895_v5  ;;  %v13880_v3 = vadd.f32 %v5775_v10, %v5507_v38 }
 0x358   : > { %v10272_v17 = vpop.f32.mrf.mxu1 }
 0x359   : > { %v10322_v40 = vpop.f32.mrf.mxu0  ;;  %v5897_v54 = vadd.f32 %v10272_v17, %v13722_v6 }
 0x35a   : > { %v5785_v7 = vpop.f32.mrf.mxu1 }
 0x35b   : > { %v13885_v58 = vpop.f32.mrf.mxu0  ;;  %v13887_v12 = vadd.f32 %v10322_v40, %v5897_v54  ;;  %v13889_v1 = vadd.f32 %v5785_v7, %v5509_v63 }
 0x35c   : > { %v10275_v44 = vpop.f32.mrf.mxu1 }
 0x35d   : > { %v10325_v4 = vpop.f32.mrf.mxu0  ;;  %v5899_v30 = vadd.f32 %v10275_v44, %v13734_v53 }
 0x35e   : > { %v5795_v57 = vpop.f32.mrf.mxu1 }
 0x35f   : > { %v13894_v52 = vpop.f32.mrf.mxu0  ;;  %v13896_v21 = vadd.f32 %v10325_v4, %v5899_v30  ;;  %v13898_v6 = vadd.f32 %v5795_v57, %v5511_v43 }
 0x360   : > { %v10278_v56 = vpop.f32.mrf.mxu1 }
 0x361   : > { %v10328_v49 = vpop.f32.mrf.mxu0  ;;  %v5901_v55 = vadd.f32 %v10278_v56, %v13746_v2 }
 0x362   : > { %v5805_v51 = vpop.f32.mrf.mxu1 }
 0x363   : > { %v13901_v38 = vpop.f32.mrf.mxu0  ;;  %v13903_v5 = vadd.f32 %v10328_v49, %v5901_v55  ;;  %v13906_v46 = vadd.f32 %v5805_v51, %v13751_v0 }
 0x364   : > { %v10281_v53 = vpop.f32.mrf.mxu1 }
 0x365   : > { %v10331_v13 = vpop.f32.mrf.mxu0  ;;  %v5903_v10 = vadd.f32 %v10281_v53, %v13756_v28 }
 0x366   : > { %v5815_v17 = vpop.f32.mrf.mxu1 }
 0x367   : > { %v13909_v40 = vpop.f32.mrf.mxu0  ;;  %v13911_v63 = vadd.f32 %v10331_v13, %v5903_v10  ;;  %v13914_v54 = vadd.f32 %v5815_v17, %v13761_v15 }
 0x368   : > { %v10284_v2 = vpop.f32.mrf.mxu1 }
 0x369   : > { %v10334_v7 = vpop.f32.mrf.mxu0  ;;  %v5905_v44 = vadd.f32 %v10284_v2, %v13765_v24 }
 0x36a   : > { %v5825_v4 = vpop.f32.mrf.mxu1 }
 0x36b   : > { %v13917_v43 = vpop.f32.mrf.mxu0  ;;  %v13919_v0 = vadd.f32 %v10334_v7, %v5905_v44  ;;  %v13922_v30 = vadd.f32 %v5825_v4, %v13770_v11 }
 0x36c   : > { %v10287_v28 = vpop.f32.mrf.mxu1 }
 0x36d   : > { %v10337_v57 = vpop.f32.mrf.mxu0  ;;  %v5907_v56 = vadd.f32 %v10287_v28, %v13777_v29 }
 0x36e   : > { %v5835_v49 = vpop.f32.mrf.mxu1 }
 0x36f   : > { %v13925_v55 = vpop.f32.mrf.mxu0  ;;  %v13927_v15 = vadd.f32 %v10337_v57, %v5907_v56  ;;  %v13930_v51 = vadd.f32 %v5835_v49, %v13782_v19 }
 0x370   : > { %v10290_v24 = vpop.f32.mrf.mxu1 }
 0x371   : > { %v10340_v53 = vpop.f32.mrf.mxu0  ;;  %v5909_v13 = vadd.f32 %v10290_v24, %v13786_v39 }
 0x372   : > { %v5845_v10 = vpop.f32.mrf.mxu1 }
 0x373   : > { %v13933_v17 = vpop.f32.mrf.mxu0  ;;  %v13935_v11 = vadd.f32 %v10340_v53, %v5909_v13  ;;  %v13938_v2 = vadd.f32 %v5845_v10, %v13791_v18 }
 0x374   : > { %14964 = vst [vmem:[#allocation43_spill] sm:$0xff] %v13933_v17  ;;  %v10293_v29 = vpop.f32.mrf.mxu1 }
 0x375   : > { %14965 = vst [vmem:[#allocation45_spill] sm:$0xff] %v13938_v2  ;;  %v10343_v7 = vpop.f32.mrf.mxu0  ;;  %v5911_v44 = vadd.f32 %v10293_v29, %v13796_v23 }
 0x376   : > { %v5855_v4 = vpop.f32.mrf.mxu1 }
 0x377   : > { %v13941_v28 = vpop.f32.mrf.mxu0  ;;  %v13943_v19 = vadd.f32 %v10343_v7, %v5911_v44  ;;  %v13946_v57 = vadd.f32 %v5855_v4, %v13802_v62 }
 0x378   : > { %14966 = vst [vmem:[#allocation47_spill] sm:$0xff] %v13941_v28  ;;  %v10296_v39 = vpop.f32.mrf.mxu1 }
 0x379   : > { %14967 = vst [vmem:[#allocation49_spill] sm:$0xff] %v13946_v57  ;;  %v10346_v56 = vpop.f32.mrf.mxu0  ;;  %v5913_v49 = vadd.f32 %v10296_v39, %v13808_v31 }
 0x37a   : > { %v5865_v24 = vpop.f32.mrf.mxu1 }
 0x37b   : > { %v13949_v53 = vpop.f32.mrf.mxu0  ;;  %v13951_v18 = vadd.f32 %v10346_v56, %v5913_v49  ;;  %v13954_v13 = vadd.f32 %v5865_v24, %v13814_v48 }
 0x37c   : > { %14968 = vst [vmem:[#allocation56_spill] sm:$0xff] %v13949_v53  ;;  %v10299_v23 = vpop.f32.mrf.mxu1 }
 0x37d   : > { %14969 = vst [vmem:[#allocation51_spill] sm:$0xff] %v13954_v13  ;;  %v10349_v10 = vpop.f32.mrf.mxu0  ;;  %v5915_v29 = vadd.f32 %v10299_v23, %v13817_v33 }
 0x37e   : > { %v5875_v7 = vpop.f32.mrf.mxu1 }
 0x37f   : > { %v6262_v44 = vpop.f32.mrf.mxu0  ;;  %v13957_v62 = vadd.f32 %v10349_v10, %v5915_v29  ;;  %v5914_v4 = vadd.f32 %v5875_v7, %v13822_v27 }
 0x380   : > { %v13960_v28 = vpop.f32.mrf.mxu1 }
 0x381   : > { %v13962_v31 = vpop.f32.mrf.mxu0  ;;  %v13964_v39 = vadd.f32 %v6262_v44, %v5914_v4 }
 0x382   : > { %v13966_v56 = vpop.f32.mrf.mxu1 }
 0x383   : > { %v13968_v48 = vpop.f32.mrf.mxu0 }
 0x384   : > { %v13970_v49 = vpop.f32.mrf.mxu1 }
 0x385   : > { %v13972_v24 = vpop.f32.mrf.mxu0 }
 0x386   : > { %v13974_v33 = vpop.f32.mrf.mxu1 }
 0x387   : > { %v13976_v23 = vpop.f32.mrf.mxu0 }
 0x388   : > { %14970 = vst [vmem:[#allocation24_spill] sm:$0xff] %v13976_v23  ;;  %v13978_v10 = vpop.f32.mrf.mxu1 }
 0x389   : > { %v13980_v27 = vpop.f32.mrf.mxu0 }
 0x38a   : > { %14971 = vst [vmem:[#allocation58_spill] sm:$0xff] %v13980_v27  ;;  %v13982_v29 = vpop.f32.mrf.mxu1 }
 0x38b   : > { %14972 = vst [vmem:[#allocation60_spill] sm:$0xff] %v13982_v29  ;;  %v13984_v7 = vpop.f32.mrf.mxu0 }
 0x38c   : > { %14973 = vst [vmem:[#allocation25_spill] sm:$0xff] %v13984_v7  ;;  %v13986_v44 = vpop.f32.mrf.mxu1 }
 0x38d   : > { %14974 = vst [vmem:[#allocation62_spill] sm:$0xff] %v13986_v44  ;;  %v13988_v4 = vpop.f32.mrf.mxu0 }
 0x38e   : > { %14975 = vst [vmem:[#allocation53_spill] sm:$0xff] %v13988_v4  ;;  %v13990_v53 = vpop.f32.mrf.mxu1 }
 0x38f   : > { %14976 = vst [vmem:[#allocation55_spill] sm:$0xff] %v13990_v53  ;;  %v13992_v13 = vpop.f32.mrf.mxu0 }
 0x390   : > { %14977 = vst [vmem:[#allocation64_spill] sm:$0xff] %v13992_v13  ;;  %v10366_v57 = vpop.f32.mrf.mxu1 }
 0x391   : > { %v13995_v17 = vadd.f32 %v10366_v57, %v13869_v35  ;;  %v13997_v23 = vpop.f32.mrf.mxu0 }
 0x392   : > { %14979 = vst [vmem:[#allocation66_spill] sm:$0xff] %v13997_v23  ;;  %v13999_v2 = vpop.f32.mrf.mxu1 }
 0x393   : > { %14978 = vst [vmem:[#allocation26_spill] sm:$0xff] %v13995_v17  ;;  %v14004_v7 = vpop.f32.mrf.mxu0 }
 0x394   : > { %v10369_v27 = vpop.f32.mrf.mxu1  ;;  %14981 = vst [vmem:[#allocation28_spill] sm:$0xff] %v14004_v7 }
 0x395   : > { %v14002_v29 = vadd.f32 %v10369_v27, %v13878_v61  ;;  %v14011_v13 = vpop.f32.mrf.mxu0 }
 0x396   : > { %v14006_v44 = vpop.f32.mrf.mxu1  ;;  %14983 = vst [vmem:[#allocation57_spill] sm:$0xff] %v14011_v13 }
 0x397   : > { %14980 = vst [vmem:[#allocation68_spill] sm:$0xff] %v14002_v29  ;;  %v14018_v17 = vpop.f32.mrf.mxu0 }
 0x398   : > { %v10372_v4 = vpop.f32.mrf.mxu1 }
 0x399   : > { %v14009_v53 = vadd.f32 %v10372_v4, %v13887_v12  ;;  %v14025_v7 = vpop.f32.mrf.mxu0 }
 0x39a   : > { %v14013_v35 = vpop.f32.mrf.mxu1 }
 0x39b   : > { %14982 = vst [vmem:[#allocation70_spill] sm:$0xff] %v14009_v53  ;;  %v14032_v13 = vpop.f32.mrf.mxu0 }
 0x39c   : > { %v10375_v57 = vpop.f32.mrf.mxu1 }
 0x39d   : > { %v14016_v23 = vadd.f32 %v10375_v57, %v13896_v21 }
 0x39e   : > { %v14020_v61 = vpop.f32.mrf.mxu1 }
 0x39f   : > { %14984 = vst [vmem:[#allocation59_spill] sm:$0xff] %v14016_v23  ;;  %14985 = vst [vmem:[#allocation61_spill] sm:$0xff] %v14020_v61  ;;  %v14039_v61 = vpop.f32.mrf.mxu0 }
 0x3a0   : > { %v10378_v27 = vpop.f32.mrf.mxu1 }
 0x3a1   : > { %v14023_v29 = vadd.f32 %v10378_v27, %v13903_v5 }
 0x3a2   : > { %v14027_v12 = vpop.f32.mrf.mxu1 }
 0x3a3   : > { %14986 = vst [vmem:[#allocation63_spill] sm:$0xff] %v14023_v29  ;;  %14987 = vst [vmem:[#allocation72_spill] sm:$0xff] %v14027_v12  ;;  %v14046_v12 = vpop.f32.mrf.mxu0 }
 0x3a4   : > { %v10381_v4 = vpop.f32.mrf.mxu1 }
 0x3a5   : > { %v14030_v53 = vadd.f32 %v10381_v4, %v13911_v63 }
 0x3a6   : > { %v14034_v21 = vpop.f32.mrf.mxu1 }
 0x3a7   : > { %14988 = vst [vmem:[#allocation65_spill] sm:$0xff] %v14030_v53  ;;  %14989 = vst [vmem:[#allocation67_spill] sm:$0xff] %v14034_v21  ;;  %v14053_v21 = vpop.f32.mrf.mxu0 }
 0x3a8   : > { %v10384_v57 = vpop.f32.mrf.mxu1 }
 0x3a9   : > { %v14037_v23 = vadd.f32 %v10384_v57, %v13919_v0 }
 0x3aa   : > { %v14041_v5 = vpop.f32.mrf.mxu1 }
 0x3ab   : > { %14990 = vst [vmem:[#allocation69_spill] sm:$0xff] %v14037_v23  ;;  %14991 = vst [vmem:[#allocation71_spill] sm:$0xff] %v14041_v5  ;;  %v14060_v5 = vpop.f32.mrf.mxu0 }
 0x3ac   : > { %v10387_v27 = vpop.f32.mrf.mxu1 }
 0x3ad   : > { %v14044_v29 = vadd.f32 %v10387_v27, %v13927_v15 }
 0x3ae   : > { %v14048_v63 = vpop.f32.mrf.mxu1 }
 0x3af   : > { %14992 = vst [vmem:[#allocation73_spill] sm:$0xff] %v14044_v29  ;;  %14993 = vst [vmem:[#allocation30_spill] sm:$0xff] %v14048_v63  ;;  %v6272_v29 = vadd.f32 %v13819_v32, %v13825_v59  ;;  %v6273_v59 = vadd.f32 %v13838_v20, %v13840_v34  ;;  %v6277_v20 = vadd.f32 %v13860_v60, %v13862_v41 }
 0x3b0   : > { %v10390_v4 = vpop.f32.mrf.mxu1  ;;  %v6279_v34 = vadd.f32 %v13867_v50, %v13871_v9  ;;  %v6287_v50 = vadd.f32 %v13901_v38, %v13906_v46  ;;  %v14118_v9 = vadd.f32 %v13909_v40, %v13914_v54  ;;  %v14997_v40 = vld [vmem:[#allocation45_spill] sm:$0xff]  ;;  %v14998_v54 = vld [vmem:[#allocation43_spill] sm:$0xff] }
 0x3b1   : > { %v14051_v53 = vadd.f32 %v10390_v4, %v13935_v11  ;;  %v14069_v11 = vpop.f32.mrf.mxu0  ;;  %v6661_v60 = vadd.f32 %v13974_v33, %v6273_v59 }
 0x3b2   : > { %v14055_v0 = vpop.f32.mrf.mxu1 }
 0x3b3   : > { %14994 = vst [vmem:[#allocation74_spill] sm:$0xff] %v14051_v53  ;;  %v6271_v53 = vadd.f32 %v13827_v14, %v13829_v37  ;;  %v6275_v14 = vadd.f32 %v13849_v42, %v13851_v8  ;;  %v14088_v37 = vpop.f32.mrf.mxu0  ;;  %v14108_v8 = vld [vmem:[%s14570_s4] ss:$0 sm:$0xff] }
 0x3b4   : > { %v10393_v57 = vpop.f32.mrf.mxu1 }
 0x3b5   : > { %v14058_v23 = vadd.f32 %v10393_v57, %v13943_v19  ;;  %v6660_v19 = vadd.f32 %v13960_v28, %v6272_v29  ;;  %v15003_v29 = vld [vmem:[#allocation49_spill] sm:$0xff] }
 0x3b6   : > { %v14062_v15 = vpop.f32.mrf.mxu1 }
 0x3b7   : > { %14995 = vst [vmem:[#allocation76_spill] sm:$0xff] %v14058_v23  ;;  %14996 = vst [vmem:[#allocation32_spill] sm:$0xff] %v14062_v15  ;;  %v6274_v15 = vadd.f32 %v13831_v45, %v13836_v47  ;;  %v6659_v23 = vadd.f32 %v13966_v56, %v6271_v53  ;;  %v6278_v45 = vadd.f32 %v13853_v25, %v13858_v36 }
 0x3b8   : > { %v10396_v27 = vpop.f32.mrf.mxu1  ;;  %v7047_v47 = vadd.f32 %v13962_v31, %v6660_v19  ;;  %v6285_v25 = vadd.f32 %v13894_v52, %v13898_v6  ;;  %v14129_v52 = vadd.f32 %v13925_v55, %v13930_v51  ;;  %v14137_v31 = vadd.f32 %v14998_v54, %v14997_v40  ;;  %v15005_v19 = vld [vmem:[#allocation51_spill] sm:$0xff] }
 0x3b9   : > { %v14067_v63 = vadd.f32 %v10396_v27, %v13951_v18  ;;  %v6276_v18 = vadd.f32 %v13842_v26, %v13847_v22  ;;  %v6662_v53 = vadd.f32 %v13970_v49, %v6274_v15  ;;  %v6281_v26 = vadd.f32 %v13876_v16, %v13880_v3  ;;  %v15004_v15 = vld [vmem:[#allocation47_spill] sm:$0xff] }
 0x3ba   : > { %v14071_v4 = vpop.f32.mrf.mxu1  ;;  %v6283_v22 = vadd.f32 %v13885_v58, %v13889_v1  ;;  %v7046_v36 = vadd.f32 %v13968_v48, %v6659_v23  ;;  %v14122_v16 = vadd.f32 %v13917_v43, %v13922_v30  ;;  %v14125_v58 = vpop.f32.mrf.mxu0  ;;  %v14999_v43 = vld [vmem:[#allocation60_spill] sm:$0xff]  ;;  %v15001_v48 = vld [vmem:[#allocation55_spill] sm:$0xff]  ;;  %v14149_v27 = vadd.f32 %v15004_v15, %v15003_v29  ;;  %v15015_v15 = vld [vmem:[#allocation57_spill] sm:$0xff] }
 0x3bb   : > { %v6664_v3 = vadd.f32 %v13978_v10, %v6276_v18  ;;  %v7049_v6 = vadd.f32 %v13972_v24, %v6662_v53  ;;  %v6663_v30 = vadd.f32 %v14999_v43, %v6275_v14  ;;  %v6665_v49 = vadd.f32 %v15001_v48, %v6277_v20  ;;  %v15002_v23 = vld [vmem:[#allocation24_spill] sm:$0xff]  ;;  %v15007_v18 = vld [vmem:[#allocation58_spill] sm:$0xff] }
 0x3bc   : > { %v10399_v57 = vpop.f32.mrf.mxu1  ;;  %v7048_v55 = vadd.f32 %v15002_v23, %v6661_v60  ;;  %v15008_v60 = vld [vmem:[#allocation25_spill] sm:$0xff]  ;;  %v15012_v48 = vld [vmem:[#allocation66_spill] sm:$0xff]  ;;  %v15013_v23 = vld [vmem:[#allocation28_spill] sm:$0xff] }
 0x3bd   : > { %v14080_v32 = vadd.f32 %v10399_v57, %v13957_v62  ;;  %v15006_v57 = vld [vmem:[#allocation56_spill] sm:$0xff]  ;;  %v7051_v14 = vadd.f32 %v15007_v18, %v6664_v3  ;;  %v6669_v3 = vadd.f32 %v14006_v44, %v6281_v26  ;;  %v15016_v18 = vld [vmem:[#allocation61_spill] sm:$0xff] }
 0x3be   : > { %v6650_v28 = vpop.f32.mrf.mxu1  ;;  %v14153_v59 = vadd.f32 %v15006_v57, %v15005_v19  ;;  %v15014_v29 = vld [vmem:[#allocation68_spill] sm:$0xff] }
 0x3bf   : > { %v14095_v62 = vadd.f32 %v6650_v28, %v13964_v39  ;;  %v15000_v39 = vld [vmem:[#allocation62_spill] sm:$0xff]  ;;  %v6667_v28 = vadd.f32 %v13999_v2, %v6279_v34  ;;  %v7057_v19 = vadd.f32 %v15015_v15, %v15014_v29  ;;  %v7056_v57 = vadd.f32 %v14018_v17, %v6669_v3 }
 0x3c0   : > { %v10454_v42 = vpop.f32.mrf.mxu1  ;;  %v6666_v56 = vadd.f32 %v15000_v39, %v6278_v45  ;;  %v14157_v45 = vpop.f32.mrf.mxu0  ;;  %v15011_v39 = vld [vmem:[#allocation26_spill] sm:$0xff] }
 0x3c1   : > { %v7434_v41 = vadd.f32 %v10454_v42, %v7047_v47 }
 0x3c2   : > { %v7274_v1 = vpop.f32.mrf.mxu1 }
 0x3c3   : > { %v14133_v38 = vadd.f32 %v14108_v8, %v7434_v41  ;;  %v7433_v46 = vadd.f32 %v7274_v1, %v7046_v36  ;;  %v7050_v41 = vadd.f32 %v15008_v60, %v6663_v30  ;;  %v15009_v1 = vld [vmem:[#allocation53_spill] sm:$0xff]  ;;  %v6671_v30 = vadd.f32 %v14013_v35, %v6283_v22 }
 0x3c4   : > { %v10457_v33 = vpop.f32.mrf.mxu1 }
 0x3c5   : > { %v7505_v51 = vsub.f32 0.0, %v14133_v38  ;;  %v14145_v24 = vadd.f32 %v14108_v8, %v7433_v46  ;;  %v7436_v10 = vadd.f32 %v10457_v33, %v7049_v6  ;;  %v7053_v6 = vadd.f32 %v15009_v1, %v6666_v56  ;;  %v15010_v46 = vld [vmem:[#allocation64_spill] sm:$0xff]  ;;  %v10437_v56 = vpop.f32.mrf.mxu0 }
 0x3c6   : > { %v7284_v47 = vpop.f32.mrf.mxu1  ;;  %v7052_v40 = vadd.f32 %v15010_v46, %v6665_v49  ;;  %v7055_v33 = vadd.f32 %v15012_v48, %v15011_v39  ;;  %v14189_v60 = vadd.f32 %v14032_v13, %v6671_v30 }
 0x3c7   : > { %v7538_v53 = vmul.f32 1.442695, %v7505_v51  ;;  %v7504_v20 = vsub.f32 0.0, %v14145_v24  ;;  %v14161_v42 = vadd.f32 %v14108_v8, %v7436_v10  ;;  %v7435_v36 = vadd.f32 %v7284_v47, %v7048_v55  ;;  %v6997_v1 = vpop.f32.mrf.mxu0 }
 0x3c8   : > { %v10460_v54 = vpop.f32.mrf.mxu1  ;;  %v7054_v55 = vadd.f32 %v15013_v23, %v6667_v28  ;;  %v6673_v47 = vadd.f32 %v15016_v18, %v6285_v25 }
 0x3c9   : > { %10723 = vpow2.f32 %v7538_v53  ;;  %v7536_v2 = vmul.f32 1.442695, %v7504_v20  ;;  %v7507_v34 = vsub.f32 0.0, %v14161_v42  ;;  %v14169_v43 = vadd.f32 %v14108_v8, %v7435_v36  ;;  %v15017_v20 = vld [vmem:[#allocation70_spill] sm:$0xff] }
 0x3ca   : > { %v7438_v51 = vadd.f32 %v10460_v54, %v7051_v14  ;;  %v7294_v49 = vpop.f32.mrf.mxu1  ;;  %v7059_v36 = vadd.f32 %v14025_v7, %v15017_v20  ;;  %v14202_v13 = vadd.f32 %v14046_v12, %v6673_v47  ;;  %v15020_v7 = vld [vmem:[#allocation67_spill] sm:$0xff]  ;;  %v15024_v47 = vld [vmem:[#allocation30_spill] sm:$0xff] }
 0x3cb   : > { %10725 = vpow2.f32 %v7536_v2  ;;  %v7542_v44 = vmul.f32 1.442695, %v7507_v34  ;;  %v7506_v26 = vsub.f32 0.0, %v14169_v43  ;;  %v7437_v10 = vadd.f32 %v7294_v49, %v7050_v41  ;;  %v15018_v41 = vld [vmem:[#allocation72_spill] sm:$0xff]  ;;  %v15022_v12 = vld [vmem:[#allocation71_spill] sm:$0xff] }
 0x3cc   : > { %v14181_v53 = vadd.f32 %v14108_v8, %v7438_v51  ;;  %v10463_v28 = vpop.f32.mrf.mxu1  ;;  %v6675_v17 = vadd.f32 %v15018_v41, %v6287_v50  ;;  %v6677_v50 = vadd.f32 %v15020_v7, %v14118_v9  ;;  %v10440_v9 = vpop.f32.mrf.mxu0 }
 0x3cd   : > { %10727 = vpow2.f32 %v7542_v44  ;;  %v7540_v35 = vmul.f32 1.442695, %v7506_v26  ;;  %v14184_v22 = vadd.f32 %v14108_v8, %v7437_v10  ;;  %v7440_v14 = vadd.f32 %v10463_v28, %v7053_v6  ;;  %v15019_v6 = vld [vmem:[#allocation59_spill] sm:$0xff] }
 0x3ce   : > { %v7509_v25 = vsub.f32 0.0, %v14181_v53  ;;  %v7304_v46 = vpop.f32.mrf.mxu1  ;;  %v14199_v34 = vadd.f32 %v14039_v61, %v15019_v6  ;;  %v14215_v61 = vadd.f32 %v14060_v5, %v6675_v17  ;;  %v6679_v26 = vadd.f32 %v15022_v12, %v14122_v16  ;;  %v15027_v12 = vld [vmem:[#allocation74_spill] sm:$0xff] }
 0x3cf   : > { %10729 = vpow2.f32 %v7540_v35  ;;  %v7508_v3 = vsub.f32 0.0, %v14184_v22  ;;  %v14195_v54 = vadd.f32 %v14108_v8, %v7440_v14  ;;  %v7439_v2 = vadd.f32 %v7304_v46, %v7052_v40  ;;  %v15021_v40 = vld [vmem:[#allocation63_spill] sm:$0xff] }
 0x3d0   : > { %v7546_v39 = vmul.f32 1.442695, %v7509_v25  ;;  %v10466_v48 = vpop.f32.mrf.mxu1  ;;  %v14212_v44 = vadd.f32 %v14053_v21, %v15021_v40  ;;  %v14228_v5 = vadd.f32 %v14088_v37, %v6677_v50  ;;  %v6681_v16 = vadd.f32 %v15024_v47, %v14129_v52  ;;  %v15025_v25 = vld [vmem:[#allocation69_spill] sm:$0xff] }
 0x3d1   : > { %v7544_v23 = vmul.f32 1.442695, %v7508_v3  ;;  %v7511_v30 = vsub.f32 0.0, %v14195_v54  ;;  %v14208_v51 = vadd.f32 %v14108_v8, %v7439_v2  ;;  %v7442_v49 = vadd.f32 %v10466_v48, %v7055_v33  ;;  %v15023_v33 = vld [vmem:[#allocation65_spill] sm:$0xff]  ;;  %v7007_v2 = vpop.f32.mrf.mxu0 }
 0x3d2   : > { %10731 = vpow2.f32 %v7546_v39  ;;  %v7314_v10 = vpop.f32.mrf.mxu1  ;;  %v14225_v21 = vadd.f32 %v14069_v11, %v15023_v33  ;;  %v14235_v46 = vadd.f32 %v14125_v58, %v15025_v25  ;;  %v14238_v11 = vadd.f32 %v14157_v45, %v6679_v26  ;;  %v15026_v37 = vld [vmem:[#allocation73_spill] sm:$0xff] }
 0x3d3   : > { %10733 = vpow2.f32 %v7544_v23  ;;  %v7550_v29 = vmul.f32 1.442695, %v7511_v30  ;;  %v7510_v15 = vsub.f32 0.0, %v14208_v51  ;;  %v14221_v18 = vadd.f32 %v14108_v8, %v7442_v49 }
 0x3d4   : > { %v7441_v28 = vadd.f32 %v7314_v10, %v7054_v55  ;;  %v10469_v35 = vpop.f32.mrf.mxu1  ;;  %v14241_v3 = vadd.f32 %v10437_v56, %v15026_v37  ;;  %v14249_v58 = vadd.f32 %v6997_v1, %v6681_v16  ;;  %v6683_v45 = vadd.f32 %v14055_v0, %v14137_v31  ;;  %v10443_v10 = vpop.f32.mrf.mxu0 }
 0x3d5   : > { %10735 = vpow2.f32 %v7550_v29  ;;  %v7548_v14 = vmul.f32 1.442695, %v7510_v15  ;;  %v7513_v20 = vsub.f32 0.0, %v14221_v18  ;;  %v7444_v41 = vadd.f32 %v10469_v35, %v7057_v19 }
 0x3d6   : > { %v10724_v17 = vpop.eup %10723  ;;  %v14244_v52 = vadd.f32 %v14108_v8, %v7441_v28  ;;  %v7324_v55 = vpop.f32.mrf.mxu1  ;;  %v14256_v26 = vadd.f32 %v10440_v9, %v15027_v12  ;;  %v14264_v47 = vadd.f32 %v7007_v2, %v6683_v45 }
 0x3d7   : > { %v7601_v6 = vadd.f32 1.0, %v10724_v17  ;;  %10737 = vpow2.f32 %v7548_v14  ;;  %v7554_v7 = vmul.f32 1.442695, %v7513_v20  ;;  %v14247_v19 = vadd.f32 %v14108_v8, %v7444_v41  ;;  %v15028_v20 = vld [vmem:[#allocation76_spill] sm:$0xff]  ;;  %v7017_v17 = vpop.f32.mrf.mxu0 }
 0x3d8   : > { %v10726_v50 = vpop.eup %10725  ;;  %v7512_v56 = vsub.f32 0.0, %v14244_v52  ;;  %v7443_v39 = vadd.f32 %v7324_v55, %v7056_v57  ;;  %v10472_v48 = vpop.f32.mrf.mxu1  ;;  %v14271_v41 = vadd.f32 %v10443_v10, %v15028_v20 }
 0x3d9   : > { %10739 = vrcp.f32 %v7601_v6  ;;  %v7600_v23 = vadd.f32 1.0, %v10726_v50  ;;  %v7515_v30 = vsub.f32 0.0, %v14247_v19  ;;  %v7446_v49 = vadd.f32 %v10472_v48, %v7059_v36  ;;  %v10446_v12 = vpop.f32.mrf.mxu0 }
 0x3da   : > { %v10728_v40 = vpop.eup %10727  ;;  %10741 = vpow2.f32 %v7554_v7  ;;  %v7552_v1 = vmul.f32 1.442695, %v7512_v56  ;;  %v14259_v29 = vadd.f32 %v14108_v8, %v7443_v39  ;;  %v7334_v0 = vpop.f32.mrf.mxu1 }
 0x3db   : > { %10743 = vrcp.f32 %v7600_v23  ;;  %v7603_v31 = vadd.f32 1.0, %v10728_v40  ;;  %v7558_v57 = vmul.f32 1.442695, %v7515_v30  ;;  %v14262_v15 = vadd.f32 %v14108_v8, %v7446_v49  ;;  %v7027_v20 = vpop.f32.mrf.mxu0 }
 0x3dc   : > { %v10730_v33 = vpop.eup %10729  ;;  %10745 = vpow2.f32 %v7552_v1  ;;  %v7514_v36 = vsub.f32 0.0, %v14259_v29  ;;  %v7445_v9 = vadd.f32 %v7334_v0, %v14189_v60  ;;  %v10475_v16 = vpop.f32.mrf.mxu1 }
 0x3dd   : > { %10747 = vrcp.f32 %v7603_v31  ;;  %v7602_v28 = vadd.f32 1.0, %v10730_v33  ;;  %v7517_v35 = vsub.f32 0.0, %v14262_v15  ;;  %v7448_v14 = vadd.f32 %v10475_v16, %v14199_v34  ;;  %v15029_v34 = vld [vmem:[#allocation32_spill] sm:$0xff] }
 0x3de   : > { %10749 = vpow2.f32 %v7558_v57  ;;  %v7556_v25 = vmul.f32 1.442695, %v7514_v36  ;;  %v14274_v37 = vadd.f32 %v14108_v8, %v7445_v9  ;;  %v7344_v2 = vpop.f32.mrf.mxu1  ;;  %v6685_v45 = vadd.f32 %v15029_v34, %v14149_v27 }
 0x3df   : > { %v10732_v55 = vpop.eup %10731  ;;  %10751 = vrcp.f32 %v7602_v28  ;;  %v7562_v60 = vmul.f32 1.442695, %v7517_v35  ;;  %v14277_v6 = vadd.f32 %v14108_v8, %v7448_v14  ;;  %v7447_v7 = vadd.f32 %v7344_v2, %v14202_v13 }
 0x3e0   : > { %v10734_v50 = vpop.eup %10733  ;;  %v7605_v56 = vadd.f32 1.0, %v10732_v55  ;;  %10753 = vpow2.f32 %v7556_v25  ;;  %v7516_v39 = vsub.f32 0.0, %v14274_v37  ;;  %v10478_v48 = vpop.f32.mrf.mxu1  ;;  %v6687_v13 = vadd.f32 %v14071_v4, %v14153_v59 }
 0x3e1   : > { %v7604_v23 = vadd.f32 1.0, %v10734_v50  ;;  %10755 = vpow2.f32 %v7562_v60  ;;  %v7519_v30 = vsub.f32 0.0, %v14277_v6  ;;  %v14285_v49 = vadd.f32 %v14108_v8, %v7447_v7 }
 0x3e2   : > { %v10736_v40 = vpop.eup %10735  ;;  %10757 = vrcp.f32 %v7605_v56  ;;  %v7560_v10 = vmul.f32 1.442695, %v7516_v39  ;;  %v7450_v27 = vadd.f32 %v10478_v48, %v14212_v44  ;;  %v7354_v1 = vpop.f32.mrf.mxu1  ;;  %v14291_v36 = vadd.f32 %v7017_v17, %v6685_v45 }
 0x3e3   : > { %10759 = vrcp.f32 %v7604_v23  ;;  %v7607_v0 = vadd.f32 1.0, %v10736_v40  ;;  %v7566_v31 = vmul.f32 1.442695, %v7519_v30  ;;  %v7518_v57 = vsub.f32 0.0, %v14285_v49 }
 0x3e4   : > { %v10738_v33 = vpop.eup %10737  ;;  %10761 = vpow2.f32 %v7560_v10  ;;  %v14294_v9 = vadd.f32 %v14108_v8, %v7450_v27  ;;  %v7449_v16 = vadd.f32 %v7354_v1, %v14215_v61  ;;  %v10481_v4 = vpop.f32.mrf.mxu1  ;;  %v14299_v14 = vadd.f32 %v10446_v12, %v14067_v63 }
 0x3e5   : > { %10763 = vrcp.f32 %v7607_v0  ;;  %v7606_v59 = vadd.f32 1.0, %v10738_v33  ;;  %v7564_v28 = vmul.f32 1.442695, %v7518_v57  ;;  %v7452_v44 = vadd.f32 %v10481_v4, %v14225_v21 }
 0x3e6   : > { %v10740_v35 = vpop.eup %10739  ;;  %10765 = vpow2.f32 %v7566_v31  ;;  %v7521_v17 = vsub.f32 0.0, %v14294_v9  ;;  %v14303_v25 = vadd.f32 %v14108_v8, %v7449_v16  ;;  %v7364_v2 = vpop.f32.mrf.mxu1  ;;  %v14305_v61 = vadd.f32 %v7027_v20, %v6687_v13 }
 0x3e7   : > { %v10742_v55 = vpop.eup %10741  ;;  %10767 = vrcp.f32 %v7606_v59  ;;  %v14308_v60 = vadd.f32 %v14108_v8, %v7452_v44  ;;  %v7451_v21 = vadd.f32 %v7364_v2, %v14228_v5  ;;  %v7665_v5 = vmul.f32 %v10740_v35, %v14133_v38 }
 0x3e8   : > { %v10744_v7 = vpop.eup %10743  ;;  %v7609_v63 = vadd.f32 1.0, %v10742_v55  ;;  %10769 = vpow2.f32 %v7564_v28  ;;  %v7570_v50 = vmul.f32 1.442695, %v7521_v17  ;;  %v7520_v34 = vsub.f32 0.0, %v14303_v25  ;;  %v10484_v45 = vpop.f32.mrf.mxu1 }
 0x3e9   : > { %v10746_v56 = vpop.eup %10745  ;;  %v7664_v39 = vmul.f32 %v10744_v7, %v14145_v24  ;;  %v7523_v48 = vsub.f32 0.0, %v14308_v60  ;;  %v14315_v23 = vadd.f32 %v14108_v8, %v7451_v21  ;;  %v7454_v30 = vadd.f32 %v10484_v45, %v14235_v46 }
 0x3ea   : > { %v10748_v40 = vpop.eup %10747  ;;  %10771 = vrcp.f32 %v7609_v63  ;;  %v7608_v12 = vadd.f32 1.0, %v10746_v56  ;;  %v7568_v13 = vmul.f32 1.442695, %v7520_v34  ;;  %v7374_v10 = vpop.f32.mrf.mxu1 }
 0x3eb   : > { %v10750_v27 = vpop.eup %10749  ;;  %v7667_v1 = vmul.f32 %v10748_v40, %v14161_v42  ;;  %10773 = vpow2.f32 %v7570_v50  ;;  %v7574_v0 = vmul.f32 1.442695, %v7523_v48  ;;  %v7522_v24 = vsub.f32 0.0, %v14315_v23  ;;  %10502 = vmatprep.mubr.msk.f32.mxu0 %vm3957_vm2, %v7664_v39 }
 0x3ec   : > { %v10752_v31 = vpop.eup %10751  ;;  %10775 = vrcp.f32 %v7608_v12  ;;  %v7611_v57 = vadd.f32 1.0, %v10750_v27  ;;  %v14323_v46 = vadd.f32 %v14108_v8, %v7454_v30  ;;  %v7453_v38 = vadd.f32 %v7374_v10, %v14238_v11  ;;  %v10487_v33 = vpop.f32.mrf.mxu1  ;;  %10503 = vmatmul.mubr.msk.f32.vlgmr.msra.gmra.mxu0 %vm3957_vm2, %v7665_v5 }
 0x3ed   : > { %v10754_v16 = vpop.eup %10753  ;;  %v7666_v42 = vmul.f32 %v10752_v31, %v14169_v43  ;;  %10777 = vpow2.f32 %v7568_v13  ;;  %v7572_v4 = vmul.f32 1.442695, %v7522_v24  ;;  %v7456_v59 = vadd.f32 %v10487_v33, %v14241_v3  ;;  %v10449_v27 = vpop.f32.mrf.mxu0 }
 0x3ee   : > { %v10756_v28 = vpop.eup %10755  ;;  %10779 = vrcp.f32 %v7611_v57  ;;  %v7610_v44 = vadd.f32 1.0, %v10754_v16  ;;  %v7525_v35 = vsub.f32 0.0, %v14323_v46  ;;  %v14331_v20 = vadd.f32 %v14108_v8, %v7453_v38  ;;  %v7384_v17 = vpop.f32.mrf.mxu1 }
 0x3ef   : > { %v10758_v11 = vpop.eup %10757  ;;  %v7613_v2 = vadd.f32 1.0, %v10756_v28  ;;  %10781 = vpow2.f32 %v7574_v0  ;;  %v14334_v55 = vadd.f32 %v14108_v8, %v7456_v59  ;;  %v7455_v43 = vadd.f32 %v7384_v17, %v14249_v58  ;;  %10505 = vmatprep.mubr.msk.f32.mxu0 %vm3957_vm2, %v7666_v42 }
 0x3f0   : > { %v10760_v3 = vpop.eup %10759  ;;  %v7669_v21 = vmul.f32 %v10758_v11, %v14181_v53  ;;  %10783 = vrcp.f32 %v7610_v44  ;;  %v7578_v7 = vmul.f32 1.442695, %v7525_v35  ;;  %v7524_v63 = vsub.f32 0.0, %v14331_v20  ;;  %v10490_v50 = vpop.f32.mrf.mxu1  ;;  %10506 = vmatmul.mubr.msk.f32.gmra.mxu0 %vm3957_vm2, %v7667_v1 }
 0x3f1   : > { %v10762_v34 = vpop.eup %10761  ;;  %v7668_v45 = vmul.f32 %v10760_v3, %v14184_v22  ;;  %10785 = vrcp.f32 %v7613_v2  ;;  %v7527_v56 = vsub.f32 0.0, %v14334_v55  ;;  %v14344_v58 = vadd.f32 %v14108_v8, %v7455_v43 }
 0x3f2   : > { %v10764_v39 = vpop.eup %10763  ;;  %v7612_v48 = vadd.f32 1.0, %v10762_v34  ;;  %10787 = vpow2.f32 %v7572_v4  ;;  %v7576_v53 = vmul.f32 1.442695, %v7524_v63  ;;  %v7458_v30 = vadd.f32 %v10490_v50, %v14256_v26  ;;  %v7394_v40 = vpop.f32.mrf.mxu1 }
 0x3f3   : > { %v10766_v5 = vpop.eup %10765  ;;  %v7671_v12 = vmul.f32 %v10764_v39, %v14195_v54  ;;  %10789 = vpow2.f32 %v7578_v7  ;;  %v7582_v13 = vmul.f32 1.442695, %v7527_v56  ;;  %v7526_v22 = vsub.f32 0.0, %v14344_v58  ;;  %10508 = vmatprep.mubr.msk.f32.mxu0 %vm3957_vm2, %v7668_v45 }
 0x3f4   : > { %v10768_v10 = vpop.eup %10767  ;;  %10791 = vrcp.f32 %v7612_v48  ;;  %v7615_v1 = vadd.f32 1.0, %v10766_v5  ;;  %v14351_v0 = vadd.f32 %v14108_v8, %v7458_v30  ;;  %v7457_v24 = vadd.f32 %v7394_v40, %v14264_v47  ;;  %v10493_v26 = vpop.f32.mrf.mxu1  ;;  %10509 = vmatmul.mubr.msk.f32.gmra.mxu0 %vm3957_vm2, %v7669_v21 }
 0x3f5   : > { %v10770_v31 = vpop.eup %10769  ;;  %v7670_v54 = vmul.f32 %v10768_v10, %v14208_v51  ;;  %10793 = vpow2.f32 %v7576_v53  ;;  %v7580_v57 = vmul.f32 1.442695, %v7526_v22  ;;  %v7460_v38 = vadd.f32 %v10493_v26, %v14271_v41 }
 0x3f6   : > { %10795 = vrcp.f32 %v7615_v1  ;;  %v7614_v33 = vadd.f32 1.0, %v10770_v31  ;;  %v7529_v16 = vsub.f32 0.0, %v14351_v0  ;;  %v14359_v42 = vadd.f32 %v14108_v8, %v7457_v24  ;;  %v7404_v4 = vpop.f32.mrf.mxu1 }
 0x3f7   : > { %v10772_v59 = vpop.eup %10771  ;;  %v7077_v47 = vadd.f32 %v10449_v27, %v14080_v32  ;;  %10797 = vpow2.f32 %v7582_v13  ;;  %v14363_v28 = vadd.f32 %v14108_v8, %v7460_v38  ;;  %v7459_v51 = vadd.f32 %v7404_v4, %v14291_v36  ;;  %10511 = vmatprep.mubr.msk.f32.mxu0 %vm3957_vm2, %v7670_v54  ;;  %v7037_v32 = vpop.f32.mrf.mxu0 }
 0x3f8   : > { %v10774_v41 = vpop.eup %10773  ;;  %v7673_v44 = vmul.f32 %v10772_v59, %v14221_v18  ;;  %10799 = vrcp.f32 %v7614_v33  ;;  %v7586_v35 = vmul.f32 1.442695, %v7529_v16  ;;  %v7528_v17 = vsub.f32 0.0, %v14359_v42  ;;  %v10496_v11 = vpop.f32.mrf.mxu1  ;;  %10512 = vmatmul.mubr.msk.f32.gmra.mxu0 %vm3957_vm2, %v7671_v12 }
 0x3f9   : > { %v10776_v2 = vpop.eup %10775  ;;  %v7617_v43 = vadd.f32 1.0, %v10774_v41  ;;  %10801 = vpow2.f32 %v7580_v57  ;;  %v7531_v3 = vsub.f32 0.0, %v14363_v28  ;;  %v14372_v36 = vadd.f32 %v14108_v8, %v7459_v51 }
 0x3fa   : > { %v10778_v21 = vpop.eup %10777  ;;  %v7672_v7 = vmul.f32 %v10776_v2, %v14244_v52  ;;  %10803 = vpow2.f32 %v7586_v35  ;;  %v7584_v18 = vmul.f32 1.442695, %v7528_v17  ;;  %v7462_v63 = vadd.f32 %v10496_v11, %v14299_v14  ;;  %v7414_v50 = vpop.f32.mrf.mxu1 }
 0x3fb   : > { %v10780_v34 = vpop.eup %10779  ;;  %10805 = vrcp.f32 %v7617_v43  ;;  %v7616_v45 = vadd.f32 1.0, %v10778_v21  ;;  %v7590_v56 = vmul.f32 1.442695, %v7531_v3  ;;  %v7530_v39 = vsub.f32 0.0, %v14372_v36 }
 0x3fc   : > { %v10782_v48 = vpop.eup %10781  ;;  %v7076_v53 = vadd.f32 %v7037_v32, %v14095_v62  ;;  %10807 = vpow2.f32 %v7584_v18  ;;  %v14379_v30 = vadd.f32 %v14108_v8, %v7462_v63  ;;  %v7461_v52 = vadd.f32 %v7414_v50, %v14305_v61  ;;  %10514 = vmatprep.mubr.msk.f32.mxu0 %vm3957_vm2, %v7672_v7  ;;  %v10499_v40 = vpop.f32.mrf.mxu1 }
 0x3fd   : > { %v10784_v14 = vpop.eup %10783  ;;  %10809 = vrcp.f32 %v7616_v45  ;;  %v7619_v5 = vadd.f32 1.0, %v10782_v48  ;;  %v7588_v12 = vmul.f32 1.442695, %v7530_v39  ;;  %v7464_v13 = vadd.f32 %v10499_v40, %v7077_v47  ;;  %10515 = vmatmul.mubr.msk.f32.gmra.mxu0 %vm3957_vm2, %v7673_v44 }
 0x3fe   : > { %v10786_v22 = vpop.eup %10785  ;;  %v7674_v10 = vmul.f32 %v10784_v14, %v14259_v29  ;;  %10811 = vpow2.f32 %v7590_v56  ;;  %v7533_v62 = vsub.f32 0.0, %v14379_v30  ;;  %v14387_v27 = vadd.f32 %v14108_v8, %v7461_v52  ;;  %v7424_v61 = vpop.f32.mrf.mxu1 }
 0x3ff   : > { %v10788_v1 = vpop.eup %10787  ;;  %v7675_v24 = vmul.f32 %v10780_v34, %v14247_v19  ;;  %v14391_v26 = vadd.f32 %v14108_v8, %v7464_v13  ;;  %v7463_v31 = vadd.f32 %v7424_v61, %v7076_v53  ;;  %10813 = vpow2.f32 %v7588_v12 }
 0x400   : > { %v10790_v54 = vpop.eup %10789  ;;  %v7618_v57 = vadd.f32 1.0, %v10788_v1  ;;  %v7594_v38 = vmul.f32 1.442695, %v7533_v62  ;;  %v7532_v29 = vsub.f32 0.0, %v14387_v27  ;;  %10517 = vmatprep.mubr.msk.f32.mxu0 %vm3957_vm2, %v7674_v10  ;;  %10815 = vrcp.f32 %v7619_v5 }
 0x401   : > { %v10792_v33 = vpop.eup %10791  ;;  %v7621_v16 = vadd.f32 1.0, %v10790_v54  ;;  %v7535_v4 = vsub.f32 0.0, %v14391_v26  ;;  %v14397_v59 = vadd.f32 %v14108_v8, %v7463_v31  ;;  %10518 = vmatmul.mubr.msk.f32.gmra.mxu0 %vm3957_vm2, %v7675_v24  ;;  %v7677_v44 = vmul.f32 %v10786_v22, %v14262_v15 }
 0x402   : > { %v10794_v19 = vpop.eup %10793  ;;  %v7676_v47 = vmul.f32 %v10792_v33, %v14274_v37  ;;  %10817 = vrcp.f32 %v7618_v57  ;;  %v7592_v51 = vmul.f32 1.442695, %v7532_v29 }
 0x403   : > { %v10796_v41 = vpop.eup %10795  ;;  %10819 = vrcp.f32 %v7621_v16  ;;  %v7620_v35 = vadd.f32 1.0, %v10794_v19  ;;  %v7534_v17 = vsub.f32 0.0, %v14397_v59  ;;  %v7598_v2 = vmul.f32 1.442695, %v7535_v4 }
 0x404   : > { %v10798_v11 = vpop.eup %10797  ;;  %10821 = vpow2.f32 %v7594_v38  ;;  %10520 = vmatprep.mubr.msk.f32.mxu0 %vm3957_vm2, %v7676_v47  ;;  %v7679_v15 = vmul.f32 %v10796_v41, %v14277_v6 }
 0x405   : > { %v10800_v8 = vpop.eup %10799  ;;  %10823 = vrcp.f32 %v7620_v35  ;;  %v7623_v32 = vadd.f32 1.0, %v10798_v11  ;;  %10521 = vmatmul.mubr.msk.f32.gmra.mxu0 %vm3957_vm2, %v7677_v44  ;;  %v7596_v7 = vmul.f32 1.442695, %v7534_v17 }
 0x406   : > { %v10802_v37 = vpop.eup %10801  ;;  %v7678_v43 = vmul.f32 %v10800_v8, %v14285_v49  ;;  %10825 = vpow2.f32 %v7592_v51 }
 0x407   : > { %v10804_v3 = vpop.eup %10803  ;;  %10827 = vrcp.f32 %v7623_v32  ;;  %v7622_v21 = vadd.f32 1.0, %v10802_v37 }
 0x408   : > { %v10806_v18 = vpop.eup %10805  ;;  %10829 = vpow2.f32 %v7598_v2  ;;  %10523 = vmatprep.mubr.msk.f32.mxu0 %vm3957_vm2, %v7678_v43  ;;  %v7625_v50 = vadd.f32 1.0, %v10804_v3 }
 0x409   : > { %v10808_v63 = vpop.eup %10807  ;;  %10831 = vrcp.f32 %v7622_v21  ;;  %10524 = vmatmul.mubr.msk.f32.gmra.mxu0 %vm3957_vm2, %v7679_v15  ;;  %v7681_v6 = vmul.f32 %v10806_v18, %v14294_v9 }
 0x40a   : > { %v10810_v34 = vpop.eup %10809  ;;  %v7624_v45 = vadd.f32 1.0, %v10808_v63  ;;  %10833 = vpow2.f32 %v7596_v7 }
 0x40b   : > { %v10812_v56 = vpop.eup %10811  ;;  %v7680_v49 = vmul.f32 %v10810_v34, %v14303_v25 }
 0x40c   : > { %10835 = vrcp.f32 %v7624_v45  ;;  %v10814_v39 = vpop.eup %10813  ;;  %v7627_v48 = vadd.f32 1.0, %v10812_v56 }
 0x40d   : > { %10837 = vrcp.f32 %v7625_v50  ;;  %10526 = vmatprep.mubr.msk.f32.mxu0 %vm3957_vm2, %v7680_v49  ;;  %v10816_v53 = vpop.eup %10815  ;;  %v7626_v52 = vadd.f32 1.0, %v10814_v39 }
 0x40e   : > { %10527 = vmatmul.mubr.msk.f32.gmra.mxu0 %vm3957_vm2, %v7681_v6  ;;  %v7683_v25 = vmul.f32 %v10816_v53, %v14308_v60 }
 0x40f   : > { %v10818_v40 = vpop.eup %10817  ;;  %10839 = vrcp.f32 %v7626_v52 }
 0x410   : > { %v10820_v14 = vpop.eup %10819  ;;  %v7682_v5 = vmul.f32 %v10818_v40, %v14315_v23  ;;  %10841 = vrcp.f32 %v7627_v48 }
 0x411   : > { %v10822_v12 = vpop.eup %10821  ;;  %v7685_v24 = vmul.f32 %v10820_v14, %v14323_v46 }
 0x412   : > { %v10824_v9 = vpop.eup %10823  ;;  %v7629_v13 = vadd.f32 1.0, %v10822_v12  ;;  %10529 = vmatprep.mubr.msk.f32.mxu0 %vm3957_vm2, %v7682_v5 }
 0x413   : > { %v10826_v22 = vpop.eup %10825  ;;  %v7684_v10 = vmul.f32 %v10824_v9, %v14331_v20  ;;  %10530 = vmatmul.mubr.msk.f32.gmra.mxu0 %vm3957_vm2, %v7683_v25 }
 0x414   : > { %v10828_v62 = vpop.eup %10827  ;;  %v7628_v61 = vadd.f32 1.0, %v10826_v22  ;;  %10843 = vrcp.f32 %v7629_v13 }
 0x415   : > { %v10830_v1 = vpop.eup %10829  ;;  %10532 = vmatprep.mubr.msk.f32.mxu0 %vm3957_vm2, %v7684_v10  ;;  %v7687_v20 = vmul.f32 %v10828_v62, %v14334_v55 }
 0x416   : > { %v10832_v23 = vpop.eup %10831  ;;  %10845 = vrcp.f32 %v7628_v61  ;;  %v7631_v60 = vadd.f32 1.0, %v10830_v1 }
 0x417   : > { %v7686_v31 = vmul.f32 %v10832_v23, %v14344_v58  ;;  %10533 = vmatmul.mubr.msk.f32.gmra.mxu0 %vm3957_vm2, %v7685_v24  ;;  %v10834_v54 = vpop.eup %10833 }
 0x418   : > { %v7630_v38 = vadd.f32 1.0, %v10834_v54  ;;  %10847 = vrcp.f32 %v7631_v60 }
 0x419   : > { %v10836_v57 = vpop.eup %10835  ;;  %10535 = vmatprep.mubr.msk.f32.mxu0 %vm3957_vm2, %v7686_v31 }
 0x41a   : > { %v10838_v29 = vpop.eup %10837  ;;  %v7688_v46 = vmul.f32 %v10836_v57, %v14359_v42  ;;  %10849 = vrcp.f32 %v7630_v38 }
 0x41b   : > { %10536 = vmatmul.mubr.msk.f32.gmra.mxu0 %vm3957_vm2, %v7687_v20  ;;  %v7689_v58 = vmul.f32 %v10838_v29, %v14351_v0 }
 0x41c   : > { %10538 = vmatprep.mubr.msk.f32.mxu0 %vm3957_vm2, %v7688_v46  ;;  %v10840_v33 = vpop.eup %10839 }
 0x41d   : > { %v10842_v16 = vpop.eup %10841  ;;  %v7690_v4 = vmul.f32 %v10840_v33, %v14372_v36 }
 0x41e   : > { %v7691_v55 = vmul.f32 %v10842_v16, %v14363_v28  ;;  %v14447_v28 = vld [vmem:[%s14572_s6] ss:$0 sm:$0xff] }
 0x41f   : > { %10539 = vmatmul.mubr.msk.f32.gmra.mxu0 %vm3957_vm2, %v7689_v58 }
 0x420   : > { %10541 = vmatprep.mubr.msk.f32.mxu0 %vm3957_vm2, %v7690_v4 }
 0x421   : > { %v10844_v42 = vpop.eup %10843 }
 0x422   : > { %v7693_v51 = vmul.f32 %v10844_v42, %v14379_v30 }
 0x423   : > { %v10846_v19 = vpop.eup %10845  ;;  %10542 = vmatmul.mubr.msk.f32.gmra.mxu0 %vm3957_vm2, %v7691_v55 }
 0x424   : > { %v7692_v47 = vmul.f32 %v10846_v19, %v14387_v27 }
 0x425   : > { %v10848_v0 = vpop.eup %10847 }
 0x426   : > { %10544 = vmatprep.mubr.msk.f32.mxu0 %vm3957_vm2, %v7692_v47  ;;  %v7695_v44 = vmul.f32 %v10848_v0, %v14391_v26 }
 0x427   : > { %10545 = vmatmul.mubr.msk.f32.gmra.mxu0 %vm3957_vm2, %v7693_v51  ;;  %v10850_v36 = vpop.eup %10849 }
 0x428   : > { %v7694_v41 = vmul.f32 %v10850_v36, %v14397_v59 }
 0x42a   : > { %10547 = vmatprep.mubr.msk.f32.mxu0 %vm3957_vm2, %v7694_v41 }
 0x42b   : > { %10548 = vmatmul.mubr.msk.f32.gmra.mxu0 %vm3957_vm2, %v7695_v44 }
 0x4ac   : > { %v10504_v30 = vpop.f32.mrf.mxu0 }
 0x4ad   : > { %v7872_v27 = vadd.f32 %v10504_v30, %v14447_v28 }
 0x4ae   : > { %v7866_v35 = vpop.f32.mrf.mxu0 }
 0x4af   : > { %8026 = vst [vmem:[%s14450_s23 + $0x8] sm:$0xff] %v7872_v27  ;;  %v7867_v26 = vadd.f32 %v14447_v28, %v7866_v35 }
 0x4b0   : > { %v10507_v59 = vpop.f32.mrf.mxu0 }
 0x4b1   : > { %8025 = vst [vmem:[%s14450_s23] sm:$0xff] %v7867_v26  ;;  %v7882_v17 = vadd.f32 %v10507_v59, %v14447_v28 }
 0x4b2   : > { %v7876_v11 = vpop.f32.mrf.mxu0 }
 0x4b3   : > { %8028 = vst [vmem:[%s14450_s23 + $0x18] sm:$0xff] %v7882_v17  ;;  %v7877_v2 = vadd.f32 %v14447_v28, %v7876_v11 }
 0x4b4   : > { %v10510_v8 = vpop.f32.mrf.mxu0 }
 0x4b5   : > { %8027 = vst [vmem:[%s14450_s23 + $0x10] sm:$0xff] %v7877_v2  ;;  %v7892_v32 = vadd.f32 %v10510_v8, %v14447_v28 }
 0x4b6   : > { %v7886_v37 = vpop.f32.mrf.mxu0 }
 0x4b7   : > { %8030 = vst [vmem:[%s14450_s23 + $0x28] sm:$0xff] %v7892_v32  ;;  %v7887_v43 = vadd.f32 %v14447_v28, %v7886_v37 }
 0x4b8   : > { %v10513_v3 = vpop.f32.mrf.mxu0 }
 0x4b9   : > { %8029 = vst [vmem:[%s14450_s23 + $0x20] sm:$0xff] %v7887_v43  ;;  %v7902_v15 = vadd.f32 %v10513_v3, %v14447_v28 }
 0x4ba   : > { %v7896_v21 = vpop.f32.mrf.mxu0 }
 0x4bb   : > { %8032 = vst [vmem:[%s14450_s23 + $0x38] sm:$0xff] %v7902_v15  ;;  %v7897_v7 = vadd.f32 %v14447_v28, %v7896_v21 }
 0x4bd   : > { %8031 = vst [vmem:[%s14450_s23 + $0x30] sm:$0xff] %v7897_v7  ;;  %v10516_v18 = vpop.f32.mrf.mxu0 }
 0x4be   : > { %v7912_v63 = vadd.f32 %v10516_v18, %v14447_v28 }
 0x4bf   : > { %v7906_v50 = vpop.f32.mrf.mxu0 }
 0x4c0   : > { %8034 = vst [vmem:[%s14450_s23 + $0x48] sm:$0xff] %v7912_v63  ;;  %v7907_v34 = vadd.f32 %v14447_v28, %v7906_v50 }
 0x4c1   : > { %v10519_v45 = vpop.f32.mrf.mxu0 }
 0x4c2   : > { %8033 = vst [vmem:[%s14450_s23 + $0x40] sm:$0xff] %v7907_v34  ;;  %v7922_v56 = vadd.f32 %v10519_v45, %v14447_v28 }
 0x4c3   : > { %v7916_v49 = vpop.f32.mrf.mxu0 }
 0x4c4   : > { %8036 = vst [vmem:[%s14450_s23 + $0x58] sm:$0xff] %v7922_v56  ;;  %v7917_v6 = vadd.f32 %v14447_v28, %v7916_v49 }
 0x4c5   : > { %v10522_v39 = vpop.f32.mrf.mxu0 }
 0x4c6   : > { %8035 = vst [vmem:[%s14450_s23 + $0x50] sm:$0xff] %v7917_v6  ;;  %v7932_v48 = vadd.f32 %v10522_v39, %v14447_v28 }
 0x4c7   : > { %v7926_v53 = vpop.f32.mrf.mxu0 }
 0x4c8   : > { %8038 = vst [vmem:[%s14450_s23 + $0x68] sm:$0xff] %v7932_v48  ;;  %v7927_v52 = vadd.f32 %v14447_v28, %v7926_v53 }
 0x4c9   : > { %v10525_v40 = vpop.f32.mrf.mxu0 }
 0x4ca   : > { %8037 = vst [vmem:[%s14450_s23 + $0x60] sm:$0xff] %v7927_v52  ;;  %v7942_v14 = vadd.f32 %v10525_v40, %v14447_v28 }
 0x4cb   : > { %v7936_v5 = vpop.f32.mrf.mxu0 }
 0x4cc   : > { %8040 = vst [vmem:[%s14450_s23 + $0x78] sm:$0xff] %v7942_v14  ;;  %v7937_v12 = vadd.f32 %v14447_v28, %v7936_v5 }
 0x4ce   : > { %8039 = vst [vmem:[%s14450_s23 + $0x70] sm:$0xff] %v7937_v12  ;;  %v10528_v25 = vpop.f32.mrf.mxu0 }
 0x4cf   : > { %v7952_v9 = vadd.f32 %v10528_v25, %v14447_v28 }
 0x4d0   : > { %v7946_v13 = vpop.f32.mrf.mxu0 }
 0x4d1   : > { %8042 = vst [vmem:[%s14450_s23 + $0x88] sm:$0xff] %v7952_v9  ;;  %v7947_v22 = vadd.f32 %v14447_v28, %v7946_v13 }
 0x4d3   : > { %8041 = vst [vmem:[%s14450_s23 + $0x80] sm:$0xff] %v7947_v22  ;;  %v10531_v10 = vpop.f32.mrf.mxu0 }
 0x4d4   : > { %v7962_v62 = vadd.f32 %v10531_v10, %v14447_v28 }
 0x4d5   : > { %v7956_v61 = vpop.f32.mrf.mxu0 }
 0x4d6   : > { %8044 = vst [vmem:[%s14450_s23 + $0x98] sm:$0xff] %v7962_v62  ;;  %v7957_v1 = vadd.f32 %v14447_v28, %v7956_v61 }
 0x4d7   : > { %v10534_v24 = vpop.f32.mrf.mxu0 }
 0x4d8   : > { %8043 = vst [vmem:[%s14450_s23 + $0x90] sm:$0xff] %v7957_v1  ;;  %v7972_v23 = vadd.f32 %v10534_v24, %v14447_v28 }
 0x4d9   : > { %v7966_v60 = vpop.f32.mrf.mxu0 }
 0x4da   : > { %8046 = vst [vmem:[%s14450_s23 + $0xa8] sm:$0xff] %v7972_v23  ;;  %v7967_v31 = vadd.f32 %v14447_v28, %v7966_v60 }
 0x4db   : > { %v10537_v54 = vpop.f32.mrf.mxu0 }
 0x4dc   : > { %8045 = vst [vmem:[%s14450_s23 + $0xa0] sm:$0xff] %v7967_v31  ;;  %v7982_v57 = vadd.f32 %v10537_v54, %v14447_v28 }
 0x4dd   : > { %v7976_v20 = vpop.f32.mrf.mxu0 }
 0x4de   : > { %8048 = vst [vmem:[%s14450_s23 + $0xb8] sm:$0xff] %v7982_v57  ;;  %v7977_v38 = vadd.f32 %v14447_v28, %v7976_v20 }
 0x4df   : > { %v10540_v29 = vpop.f32.mrf.mxu0 }
 0x4e0   : > { %8047 = vst [vmem:[%s14450_s23 + $0xb0] sm:$0xff] %v7977_v38  ;;  %v7992_v46 = vadd.f32 %v10540_v29, %v14447_v28 }
 0x4e1   : > { %v7986_v33 = vpop.f32.mrf.mxu0 }
 0x4e2   : > { %8050 = vst [vmem:[%s14450_s23 + $0xc8] sm:$0xff] %v7992_v46  ;;  %v7987_v58 = vadd.f32 %v14447_v28, %v7986_v33 }
 0x4e3   : > { %v10543_v16 = vpop.f32.mrf.mxu0 }
 0x4e4   : > { %8049 = vst [vmem:[%s14450_s23 + $0xc0] sm:$0xff] %v7987_v58  ;;  %v8002_v4 = vadd.f32 %v10543_v16, %v14447_v28 }
 0x4e5   : > { %v7996_v55 = vpop.f32.mrf.mxu0 }
 0x4e6   : > { %8052 = vst [vmem:[%s14450_s23 + $0xd8] sm:$0xff] %v8002_v4  ;;  %v7997_v42 = vadd.f32 %v14447_v28, %v7996_v55 }
 0x4e7   : > { %v10546_v19 = vpop.f32.mrf.mxu0 }
 0x4e8   : > { %8051 = vst [vmem:[%s14450_s23 + $0xd0] sm:$0xff] %v7997_v42  ;;  %v8012_v47 = vadd.f32 %v10546_v19, %v14447_v28 }
 0x4e9   : > { %v8006_v51 = vpop.f32.mrf.mxu0 }
 0x4ea   : > { %8054 = vst [vmem:[%s14450_s23 + $0xe8] sm:$0xff] %v8012_v47  ;;  %v8007_v0 = vadd.f32 %v14447_v28, %v8006_v51 }
 0x4eb   : > { %v10549_v36 = vpop.f32.mrf.mxu0 }
 0x4ec   : > { %8053 = vst [vmem:[%s14450_s23 + $0xe0] sm:$0xff] %v8007_v0  ;;  %v8022_v41 = vadd.f32 %v10549_v36, %v14447_v28 }
 0x4ed   : > { %v8016_v44 = vpop.f32.mrf.mxu0 }
 0x4ee   : > { %8056 = vst [vmem:[%s14450_s23 + $0xf8] sm:$0xff] %v8022_v41  ;;  %v8017_v30 = vadd.f32 %v14447_v28, %v8016_v44 }
 0x4f0   : > { %8055 = vst [vmem:[%s14450_s23 + $0xf0] sm:$0xff] %v8017_v30 }
 0x4f1   : > { %10865 = shalt.err (!%p10862_p3)
}
 0x4f2   : > { %s10866_s20 = scalar_lea.hbm %s14517_s15, 4096  ;;  %s10870_s29 = scalar_lea.hbm %s14573_s7, 8192 }
 0x4f3   : > { %p10867_p4 = scmp.ne.s32.totalorder %s14517_s15, %s10866_s20  ;;  %p10871_p9 = scmp.lt.s32.totalorder %s14517_s15, %s14573_s7 }
 0x4f4   : > { %p10872_p10 = scmp.lt.s32.totalorder %s10870_s29, %s10866_s20 }
 0x4f5   : > { %p10868_p7 = pnand %p10867_p4, %p10996_p5 }
 0x4f6   : > { %p10873_p11 = por %p10872_p10, %p10871_p9 }
 0x4f7   : > { %p10869_p8 = pneg %p10868_p7 }
 0x4f9   : > { %p10874_p12 = pnand %p10873_p11, %p10869_p8 }
 0x4fb   : > { %10877 = shalt.err (!%p10874_p12)
}
 0x4fc   : > { %s10916_s13 = smov 128   ;;  %s10917_s14 = smov 8  }
 0x4fd   : > { %10553 = dma.vmem_to_hbm [thread:$0]  (%p10996_p5), %s14519_s9, 4096, %s14517_s15, %s14526_s28, %s10916_s13, %s10916_s13, %s10917_s14  }
 0x4fe PF: > { %p10559_p13 = scmp.ge.s32.totalorder %s10912_s27, 2  ;;  %s8086_s16 = sand.u32 1, %s10900_s24  }
 0x4ff   : > { %s8087_s17 = scalar_lea.sflag [#allocation4], %s8086_s16 }
 0x500   : > { %p10556_p0 = pnand %p10559_p13, %p11000_p6 }
 0x502   : > { %p10557_p1 = pneg %p10556_p0 }
 0x504   : > { %10895 = dma.done.wait (%p10557_p1), %s8087_s17, 4096  }
 0x505   : > { %10897 = vsyncadd (%p10557_p1), %s8087_s17, 4294963200  ;;  %p17_p2 = scmp.ge.s32.totalorder %s10983_s30, 4   ;;  %s15030_s24 = smov %s10904_s25 }
 0x506   : > { %s15031_s25 = smov %s10908_s26  ;;  %s15032_s26 = smov %s10994_s10 }
 0x507   : > { %s15033_s27 = smov %s10983_s30  ;;  %19 = sbr.rel (!%p17_p2) target bundleno = 3 (0x3), region = 103 }
 0x50c   :  { %8092 = vsyncpa [#allocation4], 1 }
 0x50d   :  { %8094 = vsyncpa [#allocation4 + $0x1], 1 }

</bundles_post_ra>
